<compile_context>
chip_gen: v7x
topology: tpu7x:2x2x1
jax: 0.10.0
libtpu: 0.0.40
codegen_flags: <defaults>
</compile_context>

<pallas_src>
import jax
import jax.numpy as jnp
from jax import lax
from jax.experimental import pallas as pl
from jax.experimental.pallas import tpu as pltpu

# ----------------------------------------------------------------------------
# Model configuration: CNNModel_protocol(ntoken=32, ninp=16, input_length=64,
# kernel_sizes=(3, 5), kernel_nums=(8, 16, 32, 64), reductionRatio=4)
# ----------------------------------------------------------------------------
NTOKEN = 32
NINP = 16
SEQ_LEN = 64
BATCH = 2
KERNEL_SIZES = (3, 5)
KERNEL_NUMS = (8, 16, 32, 64)
REDUCTION = 4
CMAX = 64                       # widest channel count -> lane width of packed slabs
EPS = 1e-5

NUM_BRANCHES = len(KERNEL_SIZES)
N_BLOCKS = 4
KS_MAX = max(KERNEL_SIZES)      # uniform tap count (ks=3 weights zero-padded to 5)
PAD = KS_MAX // 2
HF0 = BATCH * SEQ_LEN           # batch-fused row count

_VEC_ROWS_PER_BLOCK = 10
_N_VEC_ROWS = 3 + N_BLOCKS * _VEC_ROWS_PER_BLOCK   # 43

# 'same'-conv / residual-shape requirements of the torch module for this config.
for _i, _ks in enumerate(KERNEL_SIZES):
    assert _ks == 2 * (_i + 1) + 1, "padding=(i+1,0) must give 'same' convs"
for _b in range(N_BLOCKS - 1):
    assert KERNEL_NUMS[_b + 1] == 2 * KERNEL_NUMS[_b]
assert all(k % REDUCTION == 0 for k in KERNEL_NUMS)
assert SEQ_LEN % (2 ** (N_BLOCKS + 1)) == 0


def _block_channels():
    out = []
    for b in range(N_BLOCKS):
        cin = KERNEL_NUMS[b]
        cds = KERNEL_NUMS[b] * 2 if b < N_BLOCKS - 1 else KERNEL_NUMS[-1]
        out.append((cin, cin // REDUCTION, cds))
    return out


_BLOCKS = _block_channels()


def _wslab_layout():
    """Row offsets (8-aligned) of every weight matrix inside the per-branch slab."""
    layout, off = {}, 0

    def add(name, rows):
        nonlocal off
        layout[name] = off
        off += -(-rows // 8) * 8

    add("conv1", KS_MAX * NINP)
    for b, (cin, cr, cds) in enumerate(_BLOCKS):
        add(f"sq{b}", cin)
        add(f"cv{b}", KS_MAX * cr)
        add(f"ex{b}", cr)
        add(f"ds{b}", cin)
    return layout, off


_W_LAYOUT, _W_ROWS = _wslab_layout()


# ----------------------------------------------------------------------------
# The single fused kernel (one grid step == one conv branch)
# ----------------------------------------------------------------------------
def _fused_forward_kernel(emb_ref, dec_w_ref, vec_ref, w_ref, out_ref):
    f32 = jnp.float32

    def vrow(r, n):
        return vec_ref[0, r:r + 1, 0:n]                     # (1, n)

    def wmat(name, rows, cols):
        r0 = _W_LAYOUT[name]
        return w_ref[0, r0:r0 + rows, 0:cols]               # (rows, cols)

    def sel_even(h):
        r = lax.broadcasted_iota(jnp.int32, (h // 2, h), 0)
        c = lax.broadcasted_iota(jnp.int32, (h // 2, h), 1)
        return jnp.where(c == 2 * r, 1.0, 0.0).astype(f32)

    def pick_rows(h, h_item, o):
        r = lax.broadcasted_iota(jnp.int32, (BATCH, h), 0)
        c = lax.broadcasted_iota(jnp.int32, (BATCH, h), 1)
        return jnp.where(c == r * h_item + o, 1.0, 0.0).astype(f32)

    def shift_mask(h, h_item, s):
        # 1 for rows whose shifted source row stays inside the same batch item.
        r = lax.broadcasted_iota(jnp.int32, (h, 1), 0)
        loc = jnp.bitwise_and(r, h_item - 1)                # h_item is a power of 2
        ok = jnp.logical_and(loc + s >= 0, loc + s < h_item)
        return jnp.where(ok, 1.0, 0.0).astype(f32)

    def shifted(x, s, h_item):
        # shifted[r] = x[r + s] within the same item, zero where it would pad.
        if s == 0:
            return x
        h = x.shape[0]
        y = pltpu.roll(x, (-s) % h, axis=0)
        return y * shift_mask(h, h_item, s)

    def conv_h(x, w_flat, bias, h_item):
        # 'same' conv over the row axis: lane-axis im2col (KS_MAX shifted copies)
        # followed by ONE MXU matmul against the tap-major flattened weight.
        xc = jnp.concatenate(
            [shifted(x, k - PAD, h_item) for k in range(KS_MAX)], axis=1)
        return jnp.dot(xc, w_flat, preferred_element_type=f32) + bias

    def bn_scale_shift(x, gamma, beta):
        # single-pass train-mode BatchNorm statistics (biased variance), f32.
        inv_n = 1.0 / x.shape[0]
        mean = jnp.sum(x, axis=0, keepdims=True) * inv_n
        ex2 = jnp.sum(x * x, axis=0, keepdims=True) * inv_n
        scale = gamma * lax.rsqrt(ex2 - mean * mean + EPS)
        return scale, beta - mean * scale

    # ---- batch-fused embedding slab: (BATCH*SEQ_LEN, NINP) ----
    x = emb_ref[...]
    hf, h_item = HF0, SEQ_LEN

    # ---- BatchNorm2d(1): statistics over every element of the batch ----
    inv_n = 1.0 / (hf * NINP)
    s1 = jnp.sum(jnp.sum(x, axis=1, keepdims=True), axis=0, keepdims=True)
    s2 = jnp.sum(jnp.sum(x * x, axis=1, keepdims=True), axis=0, keepdims=True)
    mean = s1 * inv_n
    scale = vrow(0, 1) * lax.rsqrt(s2 * inv_n - mean * mean + EPS)
    x = x * scale + (vrow(1, 1) - mean * scale)

    # ---- conv1 (uniform KS_MAX taps) -> ReLU -> max_pool1d(2) ----
    c0 = KERNEL_NUMS[0]
    y = conv_h(x, wmat("conv1", KS_MAX * NINP, c0), vrow(2, c0), h_item)
    y = jnp.maximum(y, 0.0)
    y = jnp.maximum(y, pltpu.roll(y, hf - 1, axis=0))       # pairwise max with next row
    x = jnp.dot(sel_even(hf), y, preferred_element_type=f32)  # keep even rows
    hf, h_item = hf // 2, h_item // 2

    # ---- residual bottleneck blocks ----
    row = 3
    for b, (cin, cr, cds) in enumerate(_BLOCKS):
        g_a, b_a = vrow(row + 0, cin), vrow(row + 1, cin)
        b_sq = vrow(row + 2, cr)
        g_b, b_b = vrow(row + 3, cr), vrow(row + 4, cr)
        b_cv = vrow(row + 5, cr)
        g_c, b_c = vrow(row + 6, cr), vrow(row + 7, cr)
        b_ex = vrow(row + 8, cin)
        b_ds = vrow(row + 9, cds)
        row += _VEC_ROWS_PER_BLOCK

        res = x
        sc, sh = bn_scale_shift(x, g_a, b_a)
        t = jnp.maximum(x * sc + sh, 0.0)
        t = jnp.dot(t, wmat(f"sq{b}", cin, cr), preferred_element_type=f32) + b_sq
        sc, sh = bn_scale_shift(t, g_b, b_b)
        t = jnp.maximum(t * sc + sh, 0.0)
        t = conv_h(t, wmat(f"cv{b}", KS_MAX * cr, cr), b_cv, h_item)
        # bn_c statistics come from the full-height conv output ...
        sc, sh = bn_scale_shift(t, g_c, b_c)
        # ... but only even rows survive the stride-2 downsample, so compact
        # [conv_out | residual] once before the expand / residual add.
        comb = jnp.dot(sel_even(hf), jnp.concatenate([t, res], axis=1),
                       preferred_element_type=f32)
        t_e = jnp.maximum(comb[:, 0:cr] * sc + sh, 0.0)
        y = (jnp.dot(t_e, wmat(f"ex{b}", cr, cin), preferred_element_type=f32)
             + b_ex + comb[:, cr:cr + cin])
        x = jnp.dot(y, wmat(f"ds{b}", cin, cds), preferred_element_type=f32) + b_ds
        hf, h_item = hf // 2, h_item // 2

    # ---- F.max_pool1d(x, x.size(2)): per-item global max over remaining rows ----
    feats = jnp.dot(pick_rows(hf, h_item, 0), x, preferred_element_type=f32)
    for o in range(1, h_item):
        feats = jnp.maximum(
            feats, jnp.dot(pick_rows(hf, h_item, o), x, preferred_element_type=f32))

    # ---- per-branch partial decoder logits (bias + branch sum added in XLA) ----
    out_ref[0, :, :] = jnp.dot(feats, dec_w_ref[0], preferred_element_type=f32)


# ----------------------------------------------------------------------------
# Parameter init (torch-default-style) + slab packing
# ----------------------------------------------------------------------------
def _uniform(key, shape, fan_in):
    bound = 1.0 / float(fan_in) ** 0.5
    return jax.random.uniform(key, shape, jnp.float32, -bound, bound)


def _pack_rows(vectors):
    assert len(vectors) == _N_VEC_ROWS
    rows = []
    for v in vectors:
        v = jnp.asarray(v, jnp.float32).reshape(-1)
        rows.append(jnp.pad(v, (0, CMAX - v.shape[0])))
    return jnp.stack(rows, axis=0)                           # (_N_VEC_ROWS, CMAX)


def _embed_taps(w_real, pad_real):
    """(ks_real, cin, cout) -> (KS_MAX, cin, cout) with zero taps (exact)."""
    ks_real = w_real.shape[0]
    off = PAD - pad_real
    w = jnp.zeros((KS_MAX,) + w_real.shape[1:], jnp.float32)
    return w.at[off:off + ks_real].set(w_real)


def _place(slab, name, mat):
    r0 = _W_LAYOUT[name]
    return slab.at[r0:r0 + mat.shape[0], 0:mat.shape[1]].set(mat)


def init_params(key):
    keys = iter(jax.random.split(key, 128))
    nxt = lambda: next(keys)
    din = NUM_BRANCHES * KERNEL_NUMS[-1]
    c_last = KERNEL_NUMS[-1]
    c0 = KERNEL_NUMS[0]

    emb = jax.random.normal(nxt(), (NTOKEN, NINP), jnp.float32)
    dec_w = _uniform(nxt(), (din, NTOKEN), din)              # Linear weight, transposed
    dec_b = _uniform(nxt(), (1, NTOKEN), din)
    dec_w_stacked = jnp.stack(
        [dec_w[br * c_last:(br + 1) * c_last] for br in range(NUM_BRANCHES)])

    vec_slabs, w_slabs = [], []
    for br, ks in enumerate(KERNEL_SIZES):
        pad = br + 1
        slab = jnp.zeros((_W_ROWS, CMAX), jnp.float32)

        w1 = _uniform(nxt(), (ks, NINP, c0), ks * NINP)
        slab = _place(slab, "conv1",
                      _embed_taps(w1, pad).reshape(KS_MAX * NINP, c0))
        vecs = [jnp.ones((1,)), jnp.zeros((1,)),             # BatchNorm2d(1)
                _uniform(nxt(), (c0,), ks * NINP)]           # convs1 bias

        for b, (cin, cr, cds) in enumerate(_BLOCKS):
            slab = _place(slab, f"sq{b}", _uniform(nxt(), (cin, cr), cin))
            wcv = _uniform(nxt(), (ks, cr, cr), ks * cr)
            slab = _place(slab, f"cv{b}",
                          _embed_taps(wcv, pad).reshape(KS_MAX * cr, cr))
            slab = _place(slab, f"ex{b}", _uniform(nxt(), (cr, cin), cr))
            slab = _place(slab, f"ds{b}", _uniform(nxt(), (cin, cds), cin))
            vecs += [
                jnp.ones((cin,)), jnp.zeros((cin,)),         # bn_a gamma/beta
                _uniform(nxt(), (cr,), cin),                 # squeeze bias
                jnp.ones((cr,)), jnp.zeros((cr,)),           # bn_b gamma/beta
                _uniform(nxt(), (cr,), ks * cr),             # (ks,1) conv bias
                jnp.ones((cr,)), jnp.zeros((cr,)),           # bn_c gamma/beta
                _uniform(nxt(), (cin,), cr),                 # expand bias
                _uniform(nxt(), (cds,), cin),                # downsample bias
            ]

        vec_slabs.append(_pack_rows(vecs))
        w_slabs.append(slab)

    return {
        "embedding": emb,
        "dec_w_stacked": dec_w_stacked,                      # (branches, 64, NTOKEN)
        "dec_b": dec_b,                                      # (1, NTOKEN)
        "vecs": jnp.stack(vec_slabs),                        # (branches, 43, 64)
        "wslab": jnp.stack(w_slabs),                         # (branches, _W_ROWS, 64)
    }


# ----------------------------------------------------------------------------
# Forward wrapper: embedding gather (XLA) + ONE fused pallas_call over branches
# ----------------------------------------------------------------------------
def forward(params, tokens):
    emb = jnp.take(params["embedding"], tokens, axis=0).astype(jnp.float32)
    emb2d = emb.reshape(BATCH * SEQ_LEN, NINP)               # batch fused on sublanes

    partial = pl.pallas_call(
        _fused_forward_kernel,
        grid=(NUM_BRANCHES,),
        in_specs=[
            pl.BlockSpec((BATCH * SEQ_LEN, NINP), lambda i: (0, 0)),
            pl.BlockSpec((1, KERNEL_NUMS[-1], NTOKEN), lambda i: (i, 0, 0)),
            pl.BlockSpec((1, _N_VEC_ROWS, CMAX), lambda i: (i, 0, 0)),
            pl.BlockSpec((1, _W_ROWS, CMAX), lambda i: (i, 0, 0)),
        ],
        out_specs=pl.BlockSpec((1, BATCH, NTOKEN), lambda i: (i, 0, 0)),
        out_shape=jax.ShapeDtypeStruct((NUM_BRANCHES, BATCH, NTOKEN), jnp.float32),
        compiler_params=pltpu.CompilerParams(
            dimension_semantics=("parallel",)),               # 2-TC split on v7x
    )(emb2d, params["dec_w_stacked"], params["vecs"], params["wslab"])

    return jnp.sum(partial, axis=0) + params["dec_b"]


if __name__ == "__main__":
    key = jax.random.PRNGKey(0)
    k_param, k_tok = jax.random.split(key)
    params = init_params(k_param)
    tokens = jax.random.randint(k_tok, (BATCH, SEQ_LEN), 0, NTOKEN, dtype=jnp.int32)

    out = jax.jit(forward)(params, tokens)
    out = jax.block_until_ready(out)
    assert out.shape == (BATCH, NTOKEN), out.shape
    assert bool(jnp.all(jnp.isfinite(out)))
    print("KERNEL_OK")
</pallas_src>

<mosaic_0001>
module attributes {stable_mosaic.version = 11 : i64} {
  func.func @_fused_forward_kernel(%arg0: i32, %arg1: memref<128x16xf32, #tpu.memory_space<vmem>>, %arg2: memref<1x64x32xf32, #tpu.memory_space<vmem>>, %arg3: memref<1x43x64xf32, #tpu.memory_space<vmem>>, %arg4: memref<1x520x64xf32, #tpu.memory_space<vmem>>, %arg5: memref<1x2x32xf32, #tpu.memory_space<vmem>>) attributes {dimension_semantics = [#tpu.dimension_semantics<parallel>], iteration_bounds = array<i64: 2>, scalar_prefetch = 0 : i64, scratch_operands = 0 : i64, tpu.core_type = #tpu.core_type<tc>, window_params = [{pipeline_mode = #tpu.pipeline_mode<synchronous>, transform_indices = @transform_0, window_bounds = array<i64: 128, 16>}, {transform_indices = @transform_1, window_bounds = array<i64: 1, 64, 32>}, {transform_indices = @transform_2, window_bounds = array<i64: 1, 43, 64>}, {transform_indices = @transform_3, window_bounds = array<i64: 1, 520, 64>}, {transform_indices = @transform_4, window_bounds = array<i64: 1, 2, 32>}]} {
    %c0 = arith.constant 0 : index
    %c0_0 = arith.constant 0 : index
    %0 = vector.load %arg1[%c0, %c0_0] : memref<128x16xf32, #tpu.memory_space<vmem>>, vector<128x16xf32>
    %cst = arith.constant dense<0.000000e+00> : vector<128xf32>
    %1 = vector.multi_reduction <add>, %0, %cst [1] : vector<128x16xf32> to vector<128xf32>
    %2 = vector.shape_cast %1 : vector<128xf32> to vector<128x1xf32>
    %cst_1 = arith.constant dense<0.000000e+00> : vector<1xf32>
    %3 = vector.multi_reduction <add>, %2, %cst_1 [0] : vector<128x1xf32> to vector<1xf32>
    %4 = vector.shape_cast %3 : vector<1xf32> to vector<1x1xf32>
    %5 = arith.mulf %0, %0 : vector<128x16xf32>
    %cst_2 = arith.constant dense<0.000000e+00> : vector<128xf32>
    %6 = vector.multi_reduction <add>, %5, %cst_2 [1] : vector<128x16xf32> to vector<128xf32>
    %7 = vector.shape_cast %6 : vector<128xf32> to vector<128x1xf32>
    %cst_3 = arith.constant dense<0.000000e+00> : vector<1xf32>
    %8 = vector.multi_reduction <add>, %7, %cst_3 [0] : vector<128x1xf32> to vector<1xf32>
    %9 = vector.shape_cast %8 : vector<1xf32> to vector<1x1xf32>
    %cst_4 = arith.constant 4.8828125E-4 : f32
    %10 = vector.broadcast %cst_4 : f32 to vector<1x1xf32>
    %11 = arith.mulf %4, %10 : vector<1x1xf32>
    %c0_5 = arith.constant 0 : index
    %c0_6 = arith.constant 0 : index
    %c0_7 = arith.constant 0 : index
    %12 = vector.load %arg3[%c0_5, %c0_6, %c0_7] : memref<1x43x64xf32, #tpu.memory_space<vmem>>, vector<1x1x1xf32>
    %13 = vector.shape_cast %12 : vector<1x1x1xf32> to vector<1x1xf32>
    %cst_8 = arith.constant 4.8828125E-4 : f32
    %14 = vector.broadcast %cst_8 : f32 to vector<1x1xf32>
    %15 = arith.mulf %9, %14 : vector<1x1xf32>
    %16 = arith.mulf %11, %11 : vector<1x1xf32>
    %17 = arith.subf %15, %16 : vector<1x1xf32>
    %cst_9 = arith.constant 9.99999974E-6 : f32
    %18 = vector.broadcast %cst_9 : f32 to vector<1x1xf32>
    %19 = arith.addf %17, %18 : vector<1x1xf32>
    %20 = math.rsqrt %19 : vector<1x1xf32>
    %21 = arith.mulf %13, %20 : vector<1x1xf32>
    %22 = vector.broadcast %21 : vector<1x1xf32> to vector<128x16xf32>
    %23 = arith.mulf %0, %22 : vector<128x16xf32>
    %c0_10 = arith.constant 0 : index
    %c1 = arith.constant 1 : index
    %c0_11 = arith.constant 0 : index
    %24 = vector.load %arg3[%c0_10, %c1, %c0_11] : memref<1x43x64xf32, #tpu.memory_space<vmem>>, vector<1x1x1xf32>
    %25 = vector.shape_cast %24 : vector<1x1x1xf32> to vector<1x1xf32>
    %26 = arith.mulf %11, %21 : vector<1x1xf32>
    %27 = arith.subf %25, %26 : vector<1x1xf32>
    %28 = vector.broadcast %27 : vector<1x1xf32> to vector<128x16xf32>
    %29 = arith.addf %23, %28 : vector<128x16xf32>
    %c0_12 = arith.constant 0 : index
    %c0_13 = arith.constant 0 : index
    %c0_14 = arith.constant 0 : index
    %30 = vector.load %arg4[%c0_12, %c0_13, %c0_14] : memref<1x520x64xf32, #tpu.memory_space<vmem>>, vector<1x80x8xf32>
    %31 = vector.shape_cast %30 : vector<1x80x8xf32> to vector<80x8xf32>
    %c0_15 = arith.constant 0 : index
    %c2 = arith.constant 2 : index
    %c0_16 = arith.constant 0 : index
    %32 = vector.load %arg3[%c0_15, %c2, %c0_16] : memref<1x43x64xf32, #tpu.memory_space<vmem>>, vector<1x1x8xf32>
    %33 = vector.shape_cast %32 : vector<1x1x8xf32> to vector<1x8xf32>
    %c2_i32 = arith.constant 2 : i32
    %34 = tpu.dynamic_rotate %29 by %c2_i32 dim 0 : vector<128x16xf32>, i32 -> vector<128x16xf32>
    %35 = tpu.iota {dimensions = array<i32: 0>} : vector<128x1xi32>
    %c63_i32 = arith.constant 63 : i32
    %36 = vector.broadcast %c63_i32 : i32 to vector<128x1xi32>
    %37 = arith.andi %35, %36 : vector<128x1xi32>
    %c-2_i32 = arith.constant -2 : i32
    %38 = vector.broadcast %c-2_i32 : i32 to vector<128x1xi32>
    %39 = arith.addi %37, %38 : vector<128x1xi32>
    %c0_i32 = arith.constant 0 : i32
    %40 = vector.broadcast %c0_i32 : i32 to vector<128x1xi32>
    %41 = arith.cmpi sge, %39, %40 : vector<128x1xi32>
    %c-2_i32_17 = arith.constant -2 : i32
    %42 = vector.broadcast %c-2_i32_17 : i32 to vector<128x1xi32>
    %43 = arith.addi %37, %42 : vector<128x1xi32>
    %c64_i32 = arith.constant 64 : i32
    %44 = vector.broadcast %c64_i32 : i32 to vector<128x1xi32>
    %45 = arith.cmpi slt, %43, %44 : vector<128x1xi32>
    %46 = arith.andi %41, %45 : vector<128x1xi1>
    %cst_18 = arith.constant 1.000000e+00 : f32
    %cst_19 = arith.constant 0.000000e+00 : f32
    %47 = vector.broadcast %cst_18 : f32 to vector<128x1xf32>
    %48 = vector.broadcast %cst_19 : f32 to vector<128x1xf32>
    %49 = arith.select %46, %47, %48 : vector<128x1xi1>, vector<128x1xf32>
    %50 = vector.broadcast %49 : vector<128x1xf32> to vector<128x16xf32>
    %51 = arith.mulf %34, %50 : vector<128x16xf32>
    %c1_i32 = arith.constant 1 : i32
    %52 = tpu.dynamic_rotate %29 by %c1_i32 dim 0 : vector<128x16xf32>, i32 -> vector<128x16xf32>
    %53 = tpu.iota {dimensions = array<i32: 0>} : vector<128x1xi32>
    %c63_i32_20 = arith.constant 63 : i32
    %54 = vector.broadcast %c63_i32_20 : i32 to vector<128x1xi32>
    %55 = arith.andi %53, %54 : vector<128x1xi32>
    %c-1_i32 = arith.constant -1 : i32
    %56 = vector.broadcast %c-1_i32 : i32 to vector<128x1xi32>
    %57 = arith.addi %55, %56 : vector<128x1xi32>
    %c0_i32_21 = arith.constant 0 : i32
    %58 = vector.broadcast %c0_i32_21 : i32 to vector<128x1xi32>
    %59 = arith.cmpi sge, %57, %58 : vector<128x1xi32>
    %c-1_i32_22 = arith.constant -1 : i32
    %60 = vector.broadcast %c-1_i32_22 : i32 to vector<128x1xi32>
    %61 = arith.addi %55, %60 : vector<128x1xi32>
    %c64_i32_23 = arith.constant 64 : i32
    %62 = vector.broadcast %c64_i32_23 : i32 to vector<128x1xi32>
    %63 = arith.cmpi slt, %61, %62 : vector<128x1xi32>
    %64 = arith.andi %59, %63 : vector<128x1xi1>
    %cst_24 = arith.constant 1.000000e+00 : f32
    %cst_25 = arith.constant 0.000000e+00 : f32
    %65 = vector.broadcast %cst_24 : f32 to vector<128x1xf32>
    %66 = vector.broadcast %cst_25 : f32 to vector<128x1xf32>
    %67 = arith.select %64, %65, %66 : vector<128x1xi1>, vector<128x1xf32>
    %68 = vector.broadcast %67 : vector<128x1xf32> to vector<128x16xf32>
    %69 = arith.mulf %52, %68 : vector<128x16xf32>
    %c127_i32 = arith.constant 127 : i32
    %70 = tpu.dynamic_rotate %29 by %c127_i32 dim 0 : vector<128x16xf32>, i32 -> vector<128x16xf32>
    %71 = tpu.iota {dimensions = array<i32: 0>} : vector<128x1xi32>
    %c63_i32_26 = arith.constant 63 : i32
    %72 = vector.broadcast %c63_i32_26 : i32 to vector<128x1xi32>
    %73 = arith.andi %71, %72 : vector<128x1xi32>
    %c1_i32_27 = arith.constant 1 : i32
    %74 = vector.broadcast %c1_i32_27 : i32 to vector<128x1xi32>
    %75 = arith.addi %73, %74 : vector<128x1xi32>
    %c0_i32_28 = arith.constant 0 : i32
    %76 = vector.broadcast %c0_i32_28 : i32 to vector<128x1xi32>
    %77 = arith.cmpi sge, %75, %76 : vector<128x1xi32>
    %c1_i32_29 = arith.constant 1 : i32
    %78 = vector.broadcast %c1_i32_29 : i32 to vector<128x1xi32>
    %79 = arith.addi %73, %78 : vector<128x1xi32>
    %c64_i32_30 = arith.constant 64 : i32
    %80 = vector.broadcast %c64_i32_30 : i32 to vector<128x1xi32>
    %81 = arith.cmpi slt, %79, %80 : vector<128x1xi32>
    %82 = arith.andi %77, %81 : vector<128x1xi1>
    %cst_31 = arith.constant 1.000000e+00 : f32
    %cst_32 = arith.constant 0.000000e+00 : f32
    %83 = vector.broadcast %cst_31 : f32 to vector<128x1xf32>
    %84 = vector.broadcast %cst_32 : f32 to vector<128x1xf32>
    %85 = arith.select %82, %83, %84 : vector<128x1xi1>, vector<128x1xf32>
    %86 = vector.broadcast %85 : vector<128x1xf32> to vector<128x16xf32>
    %87 = arith.mulf %70, %86 : vector<128x16xf32>
    %c126_i32 = arith.constant 126 : i32
    %88 = tpu.dynamic_rotate %29 by %c126_i32 dim 0 : vector<128x16xf32>, i32 -> vector<128x16xf32>
    %89 = tpu.iota {dimensions = array<i32: 0>} : vector<128x1xi32>
    %c63_i32_33 = arith.constant 63 : i32
    %90 = vector.broadcast %c63_i32_33 : i32 to vector<128x1xi32>
    %91 = arith.andi %89, %90 : vector<128x1xi32>
    %c2_i32_34 = arith.constant 2 : i32
    %92 = vector.broadcast %c2_i32_34 : i32 to vector<128x1xi32>
    %93 = arith.addi %91, %92 : vector<128x1xi32>
    %c0_i32_35 = arith.constant 0 : i32
    %94 = vector.broadcast %c0_i32_35 : i32 to vector<128x1xi32>
    %95 = arith.cmpi sge, %93, %94 : vector<128x1xi32>
    %c2_i32_36 = arith.constant 2 : i32
    %96 = vector.broadcast %c2_i32_36 : i32 to vector<128x1xi32>
    %97 = arith.addi %91, %96 : vector<128x1xi32>
    %c64_i32_37 = arith.constant 64 : i32
    %98 = vector.broadcast %c64_i32_37 : i32 to vector<128x1xi32>
    %99 = arith.cmpi slt, %97, %98 : vector<128x1xi32>
    %100 = arith.andi %95, %99 : vector<128x1xi1>
    %cst_38 = arith.constant 1.000000e+00 : f32
    %cst_39 = arith.constant 0.000000e+00 : f32
    %101 = vector.broadcast %cst_38 : f32 to vector<128x1xf32>
    %102 = vector.broadcast %cst_39 : f32 to vector<128x1xf32>
    %103 = arith.select %100, %101, %102 : vector<128x1xi1>, vector<128x1xf32>
    %104 = vector.broadcast %103 : vector<128x1xf32> to vector<128x16xf32>
    %105 = arith.mulf %88, %104 : vector<128x16xf32>
    %106 = tpu.concatenate %51, %69, %29, %87, %105 in 1 : vector<128x16xf32>, vector<128x16xf32>, vector<128x16xf32>, vector<128x16xf32>, vector<128x16xf32> -> vector<128x80xf32>
    %cst_40 = arith.constant dense<0.000000e+00> : vector<128x8xf32>
    %107 = tpu.matmul %106, %31, %cst_40 {dimension_numbers = #tpu.dot_dimension_numbers<[1], [0], [0], [1], [0, 0, 1, 1], [], []>} : vector<128x80xf32>, vector<80x8xf32>, vector<128x8xf32> -> vector<128x8xf32>
    %108 = vector.broadcast %33 : vector<1x8xf32> to vector<128x8xf32>
    %109 = arith.addf %107, %108 : vector<128x8xf32>
    %cst_41 = arith.constant 0.000000e+00 : f32
    %110 = vector.broadcast %cst_41 : f32 to vector<128x8xf32>
    %111 = arith.maximumf %109, %110 : vector<128x8xf32>
    %c127_i32_42 = arith.constant 127 : i32
    %112 = tpu.dynamic_rotate %111 by %c127_i32_42 dim 0 : vector<128x8xf32>, i32 -> vector<128x8xf32>
    %113 = arith.maximumf %111, %112 : vector<128x8xf32>
    %114 = tpu.iota {dimensions = array<i32: 0>} : vector<64x128xi32>
    %115 = tpu.iota {dimensions = array<i32: 1>} : vector<64x128xi32>
    %c2_i32_43 = arith.constant 2 : i32
    %116 = vector.broadcast %c2_i32_43 : i32 to vector<64x128xi32>
    %117 = arith.muli %116, %114 : vector<64x128xi32>
    %118 = arith.cmpi eq, %115, %117 : vector<64x128xi32>
    %cst_44 = arith.constant 1.000000e+00 : f32
    %cst_45 = arith.constant 0.000000e+00 : f32
    %119 = vector.broadcast %cst_44 : f32 to vector<64x128xf32>
    %120 = vector.broadcast %cst_45 : f32 to vector<64x128xf32>
    %121 = arith.select %118, %119, %120 : vector<64x128xi1>, vector<64x128xf32>
    %cst_46 = arith.constant dense<0.000000e+00> : vector<64x8xf32>
    %122 = tpu.matmul %121, %113, %cst_46 {dimension_numbers = #tpu.dot_dimension_numbers<[1], [0], [0], [1], [0, 0, 1, 1], [], []>} : vector<64x128xf32>, vector<128x8xf32>, vector<64x8xf32> -> vector<64x8xf32>
    %c0_47 = arith.constant 0 : index
    %c3 = arith.constant 3 : index
    %c0_48 = arith.constant 0 : index
    %123 = vector.load %arg3[%c0_47, %c3, %c0_48] : memref<1x43x64xf32, #tpu.memory_space<vmem>>, vector<1x1x8xf32>
    %124 = vector.shape_cast %123 : vector<1x1x8xf32> to vector<1x8xf32>
    %c0_49 = arith.constant 0 : index
    %c4 = arith.constant 4 : index
    %c0_50 = arith.constant 0 : index
    %125 = vector.load %arg3[%c0_49, %c4, %c0_50] : memref<1x43x64xf32, #tpu.memory_space<vmem>>, vector<1x1x8xf32>
    %126 = vector.shape_cast %125 : vector<1x1x8xf32> to vector<1x8xf32>
    %c0_51 = arith.constant 0 : index
    %c5 = arith.constant 5 : index
    %c0_52 = arith.constant 0 : index
    %127 = vector.load %arg3[%c0_51, %c5, %c0_52] : memref<1x43x64xf32, #tpu.memory_space<vmem>>, vector<1x1x2xf32>
    %128 = vector.shape_cast %127 : vector<1x1x2xf32> to vector<1x2xf32>
    %c0_53 = arith.constant 0 : index
    %c6 = arith.constant 6 : index
    %c0_54 = arith.constant 0 : index
    %129 = vector.load %arg3[%c0_53, %c6, %c0_54] : memref<1x43x64xf32, #tpu.memory_space<vmem>>, vector<1x1x2xf32>
    %130 = vector.shape_cast %129 : vector<1x1x2xf32> to vector<1x2xf32>
    %c0_55 = arith.constant 0 : index
    %c7 = arith.constant 7 : index
    %c0_56 = arith.constant 0 : index
    %131 = vector.load %arg3[%c0_55, %c7, %c0_56] : memref<1x43x64xf32, #tpu.memory_space<vmem>>, vector<1x1x2xf32>
    %132 = vector.shape_cast %131 : vector<1x1x2xf32> to vector<1x2xf32>
    %c0_57 = arith.constant 0 : index
    %c8 = arith.constant 8 : index
    %c0_58 = arith.constant 0 : index
    %133 = vector.load %arg3[%c0_57, %c8, %c0_58] : memref<1x43x64xf32, #tpu.memory_space<vmem>>, vector<1x1x2xf32>
    %134 = vector.shape_cast %133 : vector<1x1x2xf32> to vector<1x2xf32>
    %c0_59 = arith.constant 0 : index
    %c9 = arith.constant 9 : index
    %c0_60 = arith.constant 0 : index
    %135 = vector.load %arg3[%c0_59, %c9, %c0_60] : memref<1x43x64xf32, #tpu.memory_space<vmem>>, vector<1x1x2xf32>
    %136 = vector.shape_cast %135 : vector<1x1x2xf32> to vector<1x2xf32>
    %c0_61 = arith.constant 0 : index
    %c10 = arith.constant 10 : index
    %c0_62 = arith.constant 0 : index
    %137 = vector.load %arg3[%c0_61, %c10, %c0_62] : memref<1x43x64xf32, #tpu.memory_space<vmem>>, vector<1x1x2xf32>
    %138 = vector.shape_cast %137 : vector<1x1x2xf32> to vector<1x2xf32>
    %c0_63 = arith.constant 0 : index
    %c11 = arith.constant 11 : index
    %c0_64 = arith.constant 0 : index
    %139 = vector.load %arg3[%c0_63, %c11, %c0_64] : memref<1x43x64xf32, #tpu.memory_space<vmem>>, vector<1x1x8xf32>
    %140 = vector.shape_cast %139 : vector<1x1x8xf32> to vector<1x8xf32>
    %c0_65 = arith.constant 0 : index
    %c12 = arith.constant 12 : index
    %c0_66 = arith.constant 0 : index
    %141 = vector.load %arg3[%c0_65, %c12, %c0_66] : memref<1x43x64xf32, #tpu.memory_space<vmem>>, vector<1x1x16xf32>
    %142 = vector.shape_cast %141 : vector<1x1x16xf32> to vector<1x16xf32>
    %cst_67 = arith.constant dense<0.000000e+00> : vector<8xf32>
    %143 = vector.multi_reduction <add>, %122, %cst_67 [0] : vector<64x8xf32> to vector<8xf32>
    %144 = vector.shape_cast %143 : vector<8xf32> to vector<1x8xf32>
    %cst_68 = arith.constant 1.562500e-02 : f32
    %145 = vector.broadcast %cst_68 : f32 to vector<1x8xf32>
    %146 = arith.mulf %144, %145 : vector<1x8xf32>
    %147 = arith.mulf %122, %122 : vector<64x8xf32>
    %cst_69 = arith.constant dense<0.000000e+00> : vector<8xf32>
    %148 = vector.multi_reduction <add>, %147, %cst_69 [0] : vector<64x8xf32> to vector<8xf32>
    %149 = vector.shape_cast %148 : vector<8xf32> to vector<1x8xf32>
    %cst_70 = arith.constant 1.562500e-02 : f32
    %150 = vector.broadcast %cst_70 : f32 to vector<1x8xf32>
    %151 = arith.mulf %149, %150 : vector<1x8xf32>
    %152 = arith.mulf %146, %146 : vector<1x8xf32>
    %153 = arith.subf %151, %152 : vector<1x8xf32>
    %cst_71 = arith.constant 9.99999974E-6 : f32
    %154 = vector.broadcast %cst_71 : f32 to vector<1x8xf32>
    %155 = arith.addf %153, %154 : vector<1x8xf32>
    %156 = math.rsqrt %155 : vector<1x8xf32>
    %157 = arith.mulf %124, %156 : vector<1x8xf32>
    %158 = arith.mulf %146, %157 : vector<1x8xf32>
    %159 = arith.subf %126, %158 : vector<1x8xf32>
    %160 = vector.broadcast %157 : vector<1x8xf32> to vector<64x8xf32>
    %161 = arith.mulf %122, %160 : vector<64x8xf32>
    %162 = vector.broadcast %159 : vector<1x8xf32> to vector<64x8xf32>
    %163 = arith.addf %161, %162 : vector<64x8xf32>
    %cst_72 = arith.constant 0.000000e+00 : f32
    %164 = vector.broadcast %cst_72 : f32 to vector<64x8xf32>
    %165 = arith.maximumf %163, %164 : vector<64x8xf32>
    %c0_73 = arith.constant 0 : index
    %c80 = arith.constant 80 : index
    %c0_74 = arith.constant 0 : index
    %166 = vector.load %arg4[%c0_73, %c80, %c0_74] : memref<1x520x64xf32, #tpu.memory_space<vmem>>, vector<1x8x2xf32>
    %167 = vector.shape_cast %166 : vector<1x8x2xf32> to vector<8x2xf32>
    %cst_75 = arith.constant dense<0.000000e+00> : vector<64x2xf32>
    %168 = tpu.matmul %165, %167, %cst_75 {dimension_numbers = #tpu.dot_dimension_numbers<[1], [0], [0], [1], [0, 0, 1, 1], [], []>} : vector<64x8xf32>, vector<8x2xf32>, vector<64x2xf32> -> vector<64x2xf32>
    %169 = vector.broadcast %128 : vector<1x2xf32> to vector<64x2xf32>
    %170 = arith.addf %168, %169 : vector<64x2xf32>
    %cst_76 = arith.constant dense<0.000000e+00> : vector<2xf32>
    %171 = vector.multi_reduction <add>, %170, %cst_76 [0] : vector<64x2xf32> to vector<2xf32>
    %172 = vector.shape_cast %171 : vector<2xf32> to vector<1x2xf32>
    %cst_77 = arith.constant 1.562500e-02 : f32
    %173 = vector.broadcast %cst_77 : f32 to vector<1x2xf32>
    %174 = arith.mulf %172, %173 : vector<1x2xf32>
    %175 = arith.mulf %170, %170 : vector<64x2xf32>
    %cst_78 = arith.constant dense<0.000000e+00> : vector<2xf32>
    %176 = vector.multi_reduction <add>, %175, %cst_78 [0] : vector<64x2xf32> to vector<2xf32>
    %177 = vector.shape_cast %176 : vector<2xf32> to vector<1x2xf32>
    %cst_79 = arith.constant 1.562500e-02 : f32
    %178 = vector.broadcast %cst_79 : f32 to vector<1x2xf32>
    %179 = arith.mulf %177, %178 : vector<1x2xf32>
    %180 = arith.mulf %174, %174 : vector<1x2xf32>
    %181 = arith.subf %179, %180 : vector<1x2xf32>
    %cst_80 = arith.constant 9.99999974E-6 : f32
    %182 = vector.broadcast %cst_80 : f32 to vector<1x2xf32>
    %183 = arith.addf %181, %182 : vector<1x2xf32>
    %184 = math.rsqrt %183 : vector<1x2xf32>
    %185 = arith.mulf %130, %184 : vector<1x2xf32>
    %186 = arith.mulf %174, %185 : vector<1x2xf32>
    %187 = arith.subf %132, %186 : vector<1x2xf32>
    %188 = vector.broadcast %185 : vector<1x2xf32> to vector<64x2xf32>
    %189 = arith.mulf %170, %188 : vector<64x2xf32>
    %190 = vector.broadcast %187 : vector<1x2xf32> to vector<64x2xf32>
    %191 = arith.addf %189, %190 : vector<64x2xf32>
    %cst_81 = arith.constant 0.000000e+00 : f32
    %192 = vector.broadcast %cst_81 : f32 to vector<64x2xf32>
    %193 = arith.maximumf %191, %192 : vector<64x2xf32>
    %c0_82 = arith.constant 0 : index
    %c88 = arith.constant 88 : index
    %c0_83 = arith.constant 0 : index
    %194 = vector.load %arg4[%c0_82, %c88, %c0_83] : memref<1x520x64xf32, #tpu.memory_space<vmem>>, vector<1x10x2xf32>
    %195 = vector.shape_cast %194 : vector<1x10x2xf32> to vector<10x2xf32>
    %c2_i32_84 = arith.constant 2 : i32
    %196 = tpu.dynamic_rotate %193 by %c2_i32_84 dim 0 : vector<64x2xf32>, i32 -> vector<64x2xf32>
    %197 = tpu.iota {dimensions = array<i32: 0>} : vector<64x1xi32>
    %c31_i32 = arith.constant 31 : i32
    %198 = vector.broadcast %c31_i32 : i32 to vector<64x1xi32>
    %199 = arith.andi %197, %198 : vector<64x1xi32>
    %c-2_i32_85 = arith.constant -2 : i32
    %200 = vector.broadcast %c-2_i32_85 : i32 to vector<64x1xi32>
    %201 = arith.addi %199, %200 : vector<64x1xi32>
    %c0_i32_86 = arith.constant 0 : i32
    %202 = vector.broadcast %c0_i32_86 : i32 to vector<64x1xi32>
    %203 = arith.cmpi sge, %201, %202 : vector<64x1xi32>
    %c-2_i32_87 = arith.constant -2 : i32
    %204 = vector.broadcast %c-2_i32_87 : i32 to vector<64x1xi32>
    %205 = arith.addi %199, %204 : vector<64x1xi32>
    %c32_i32 = arith.constant 32 : i32
    %206 = vector.broadcast %c32_i32 : i32 to vector<64x1xi32>
    %207 = arith.cmpi slt, %205, %206 : vector<64x1xi32>
    %208 = arith.andi %203, %207 : vector<64x1xi1>
    %cst_88 = arith.constant 1.000000e+00 : f32
    %cst_89 = arith.constant 0.000000e+00 : f32
    %209 = vector.broadcast %cst_88 : f32 to vector<64x1xf32>
    %210 = vector.broadcast %cst_89 : f32 to vector<64x1xf32>
    %211 = arith.select %208, %209, %210 : vector<64x1xi1>, vector<64x1xf32>
    %212 = vector.broadcast %211 : vector<64x1xf32> to vector<64x2xf32>
    %213 = arith.mulf %196, %212 : vector<64x2xf32>
    %c1_i32_90 = arith.constant 1 : i32
    %214 = tpu.dynamic_rotate %193 by %c1_i32_90 dim 0 : vector<64x2xf32>, i32 -> vector<64x2xf32>
    %215 = tpu.iota {dimensions = array<i32: 0>} : vector<64x1xi32>
    %c31_i32_91 = arith.constant 31 : i32
    %216 = vector.broadcast %c31_i32_91 : i32 to vector<64x1xi32>
    %217 = arith.andi %215, %216 : vector<64x1xi32>
    %c-1_i32_92 = arith.constant -1 : i32
    %218 = vector.broadcast %c-1_i32_92 : i32 to vector<64x1xi32>
    %219 = arith.addi %217, %218 : vector<64x1xi32>
    %c0_i32_93 = arith.constant 0 : i32
    %220 = vector.broadcast %c0_i32_93 : i32 to vector<64x1xi32>
    %221 = arith.cmpi sge, %219, %220 : vector<64x1xi32>
    %c-1_i32_94 = arith.constant -1 : i32
    %222 = vector.broadcast %c-1_i32_94 : i32 to vector<64x1xi32>
    %223 = arith.addi %217, %222 : vector<64x1xi32>
    %c32_i32_95 = arith.constant 32 : i32
    %224 = vector.broadcast %c32_i32_95 : i32 to vector<64x1xi32>
    %225 = arith.cmpi slt, %223, %224 : vector<64x1xi32>
    %226 = arith.andi %221, %225 : vector<64x1xi1>
    %cst_96 = arith.constant 1.000000e+00 : f32
    %cst_97 = arith.constant 0.000000e+00 : f32
    %227 = vector.broadcast %cst_96 : f32 to vector<64x1xf32>
    %228 = vector.broadcast %cst_97 : f32 to vector<64x1xf32>
    %229 = arith.select %226, %227, %228 : vector<64x1xi1>, vector<64x1xf32>
    %230 = vector.broadcast %229 : vector<64x1xf32> to vector<64x2xf32>
    %231 = arith.mulf %214, %230 : vector<64x2xf32>
    %c63_i32_98 = arith.constant 63 : i32
    %232 = tpu.dynamic_rotate %193 by %c63_i32_98 dim 0 : vector<64x2xf32>, i32 -> vector<64x2xf32>
    %233 = tpu.iota {dimensions = array<i32: 0>} : vector<64x1xi32>
    %c31_i32_99 = arith.constant 31 : i32
    %234 = vector.broadcast %c31_i32_99 : i32 to vector<64x1xi32>
    %235 = arith.andi %233, %234 : vector<64x1xi32>
    %c1_i32_100 = arith.constant 1 : i32
    %236 = vector.broadcast %c1_i32_100 : i32 to vector<64x1xi32>
    %237 = arith.addi %235, %236 : vector<64x1xi32>
    %c0_i32_101 = arith.constant 0 : i32
    %238 = vector.broadcast %c0_i32_101 : i32 to vector<64x1xi32>
    %239 = arith.cmpi sge, %237, %238 : vector<64x1xi32>
    %c1_i32_102 = arith.constant 1 : i32
    %240 = vector.broadcast %c1_i32_102 : i32 to vector<64x1xi32>
    %241 = arith.addi %235, %240 : vector<64x1xi32>
    %c32_i32_103 = arith.constant 32 : i32
    %242 = vector.broadcast %c32_i32_103 : i32 to vector<64x1xi32>
    %243 = arith.cmpi slt, %241, %242 : vector<64x1xi32>
    %244 = arith.andi %239, %243 : vector<64x1xi1>
    %cst_104 = arith.constant 1.000000e+00 : f32
    %cst_105 = arith.constant 0.000000e+00 : f32
    %245 = vector.broadcast %cst_104 : f32 to vector<64x1xf32>
    %246 = vector.broadcast %cst_105 : f32 to vector<64x1xf32>
    %247 = arith.select %244, %245, %246 : vector<64x1xi1>, vector<64x1xf32>
    %248 = vector.broadcast %247 : vector<64x1xf32> to vector<64x2xf32>
    %249 = arith.mulf %232, %248 : vector<64x2xf32>
    %c62_i32 = arith.constant 62 : i32
    %250 = tpu.dynamic_rotate %193 by %c62_i32 dim 0 : vector<64x2xf32>, i32 -> vector<64x2xf32>
    %251 = tpu.iota {dimensions = array<i32: 0>} : vector<64x1xi32>
    %c31_i32_106 = arith.constant 31 : i32
    %252 = vector.broadcast %c31_i32_106 : i32 to vector<64x1xi32>
    %253 = arith.andi %251, %252 : vector<64x1xi32>
    %c2_i32_107 = arith.constant 2 : i32
    %254 = vector.broadcast %c2_i32_107 : i32 to vector<64x1xi32>
    %255 = arith.addi %253, %254 : vector<64x1xi32>
    %c0_i32_108 = arith.constant 0 : i32
    %256 = vector.broadcast %c0_i32_108 : i32 to vector<64x1xi32>
    %257 = arith.cmpi sge, %255, %256 : vector<64x1xi32>
    %c2_i32_109 = arith.constant 2 : i32
    %258 = vector.broadcast %c2_i32_109 : i32 to vector<64x1xi32>
    %259 = arith.addi %253, %258 : vector<64x1xi32>
    %c32_i32_110 = arith.constant 32 : i32
    %260 = vector.broadcast %c32_i32_110 : i32 to vector<64x1xi32>
    %261 = arith.cmpi slt, %259, %260 : vector<64x1xi32>
    %262 = arith.andi %257, %261 : vector<64x1xi1>
    %cst_111 = arith.constant 1.000000e+00 : f32
    %cst_112 = arith.constant 0.000000e+00 : f32
    %263 = vector.broadcast %cst_111 : f32 to vector<64x1xf32>
    %264 = vector.broadcast %cst_112 : f32 to vector<64x1xf32>
    %265 = arith.select %262, %263, %264 : vector<64x1xi1>, vector<64x1xf32>
    %266 = vector.broadcast %265 : vector<64x1xf32> to vector<64x2xf32>
    %267 = arith.mulf %250, %266 : vector<64x2xf32>
    %268 = tpu.concatenate %213, %231, %193, %249, %267 in 1 : vector<64x2xf32>, vector<64x2xf32>, vector<64x2xf32>, vector<64x2xf32>, vector<64x2xf32> -> vector<64x10xf32>
    %cst_113 = arith.constant dense<0.000000e+00> : vector<64x2xf32>
    %269 = tpu.matmul %268, %195, %cst_113 {dimension_numbers = #tpu.dot_dimension_numbers<[1], [0], [0], [1], [0, 0, 1, 1], [], []>} : vector<64x10xf32>, vector<10x2xf32>, vector<64x2xf32> -> vector<64x2xf32>
    %270 = vector.broadcast %134 : vector<1x2xf32> to vector<64x2xf32>
    %271 = arith.addf %269, %270 : vector<64x2xf32>
    %cst_114 = arith.constant dense<0.000000e+00> : vector<2xf32>
    %272 = vector.multi_reduction <add>, %271, %cst_114 [0] : vector<64x2xf32> to vector<2xf32>
    %273 = vector.shape_cast %272 : vector<2xf32> to vector<1x2xf32>
    %cst_115 = arith.constant 1.562500e-02 : f32
    %274 = vector.broadcast %cst_115 : f32 to vector<1x2xf32>
    %275 = arith.mulf %273, %274 : vector<1x2xf32>
    %276 = arith.mulf %271, %271 : vector<64x2xf32>
    %cst_116 = arith.constant dense<0.000000e+00> : vector<2xf32>
    %277 = vector.multi_reduction <add>, %276, %cst_116 [0] : vector<64x2xf32> to vector<2xf32>
    %278 = vector.shape_cast %277 : vector<2xf32> to vector<1x2xf32>
    %cst_117 = arith.constant 1.562500e-02 : f32
    %279 = vector.broadcast %cst_117 : f32 to vector<1x2xf32>
    %280 = arith.mulf %278, %279 : vector<1x2xf32>
    %281 = arith.mulf %275, %275 : vector<1x2xf32>
    %282 = arith.subf %280, %281 : vector<1x2xf32>
    %cst_118 = arith.constant 9.99999974E-6 : f32
    %283 = vector.broadcast %cst_118 : f32 to vector<1x2xf32>
    %284 = arith.addf %282, %283 : vector<1x2xf32>
    %285 = math.rsqrt %284 : vector<1x2xf32>
    %286 = arith.mulf %136, %285 : vector<1x2xf32>
    %287 = arith.mulf %275, %286 : vector<1x2xf32>
    %288 = arith.subf %138, %287 : vector<1x2xf32>
    %289 = tpu.iota {dimensions = array<i32: 0>} : vector<32x64xi32>
    %290 = tpu.iota {dimensions = array<i32: 1>} : vector<32x64xi32>
    %c2_i32_119 = arith.constant 2 : i32
    %291 = vector.broadcast %c2_i32_119 : i32 to vector<32x64xi32>
    %292 = arith.muli %291, %289 : vector<32x64xi32>
    %293 = arith.cmpi eq, %290, %292 : vector<32x64xi32>
    %cst_120 = arith.constant 1.000000e+00 : f32
    %cst_121 = arith.constant 0.000000e+00 : f32
    %294 = vector.broadcast %cst_120 : f32 to vector<32x64xf32>
    %295 = vector.broadcast %cst_121 : f32 to vector<32x64xf32>
    %296 = arith.select %293, %294, %295 : vector<32x64xi1>, vector<32x64xf32>
    %297 = tpu.concatenate %271, %122 in 1 : vector<64x2xf32>, vector<64x8xf32> -> vector<64x10xf32>
    %cst_122 = arith.constant dense<0.000000e+00> : vector<32x10xf32>
    %298 = tpu.matmul %296, %297, %cst_122 {dimension_numbers = #tpu.dot_dimension_numbers<[1], [0], [0], [1], [0, 0, 1, 1], [], []>} : vector<32x64xf32>, vector<64x10xf32>, vector<32x10xf32> -> vector<32x10xf32>
    %299 = vector.extract_strided_slice %298 {offsets = [0, 0], sizes = [32, 2], strides = [1, 1]} : vector<32x10xf32> to vector<32x2xf32>
    %300 = vector.broadcast %286 : vector<1x2xf32> to vector<32x2xf32>
    %301 = arith.mulf %299, %300 : vector<32x2xf32>
    %302 = vector.broadcast %288 : vector<1x2xf32> to vector<32x2xf32>
    %303 = arith.addf %301, %302 : vector<32x2xf32>
    %cst_123 = arith.constant 0.000000e+00 : f32
    %304 = vector.broadcast %cst_123 : f32 to vector<32x2xf32>
    %305 = arith.maximumf %303, %304 : vector<32x2xf32>
    %c0_124 = arith.constant 0 : index
    %c104 = arith.constant 104 : index
    %c0_125 = arith.constant 0 : index
    %306 = vector.load %arg4[%c0_124, %c104, %c0_125] : memref<1x520x64xf32, #tpu.memory_space<vmem>>, vector<1x2x8xf32>
    %307 = vector.shape_cast %306 : vector<1x2x8xf32> to vector<2x8xf32>
    %cst_126 = arith.constant dense<0.000000e+00> : vector<32x8xf32>
    %308 = tpu.matmul %305, %307, %cst_126 {dimension_numbers = #tpu.dot_dimension_numbers<[1], [0], [0], [1], [0, 0, 1, 1], [], []>} : vector<32x2xf32>, vector<2x8xf32>, vector<32x8xf32> -> vector<32x8xf32>
    %309 = vector.broadcast %140 : vector<1x8xf32> to vector<32x8xf32>
    %310 = arith.addf %308, %309 : vector<32x8xf32>
    %311 = vector.extract_strided_slice %298 {offsets = [0, 2], sizes = [32, 8], strides = [1, 1]} : vector<32x10xf32> to vector<32x8xf32>
    %312 = arith.addf %310, %311 : vector<32x8xf32>
    %c0_127 = arith.constant 0 : index
    %c112 = arith.constant 112 : index
    %c0_128 = arith.constant 0 : index
    %313 = vector.load %arg4[%c0_127, %c112, %c0_128] : memref<1x520x64xf32, #tpu.memory_space<vmem>>, vector<1x8x16xf32>
    %314 = vector.shape_cast %313 : vector<1x8x16xf32> to vector<8x16xf32>
    %cst_129 = arith.constant dense<0.000000e+00> : vector<32x16xf32>
    %315 = tpu.matmul %312, %314, %cst_129 {dimension_numbers = #tpu.dot_dimension_numbers<[1], [0], [0], [1], [0, 0, 1, 1], [], []>} : vector<32x8xf32>, vector<8x16xf32>, vector<32x16xf32> -> vector<32x16xf32>
    %316 = vector.broadcast %142 : vector<1x16xf32> to vector<32x16xf32>
    %317 = arith.addf %315, %316 : vector<32x16xf32>
    %c0_130 = arith.constant 0 : index
    %c13 = arith.constant 13 : index
    %c0_131 = arith.constant 0 : index
    %318 = vector.load %arg3[%c0_130, %c13, %c0_131] : memref<1x43x64xf32, #tpu.memory_space<vmem>>, vector<1x1x16xf32>
    %319 = vector.shape_cast %318 : vector<1x1x16xf32> to vector<1x16xf32>
    %c0_132 = arith.constant 0 : index
    %c14 = arith.constant 14 : index
    %c0_133 = arith.constant 0 : index
    %320 = vector.load %arg3[%c0_132, %c14, %c0_133] : memref<1x43x64xf32, #tpu.memory_space<vmem>>, vector<1x1x16xf32>
    %321 = vector.shape_cast %320 : vector<1x1x16xf32> to vector<1x16xf32>
    %c0_134 = arith.constant 0 : index
    %c15 = arith.constant 15 : index
    %c0_135 = arith.constant 0 : index
    %322 = vector.load %arg3[%c0_134, %c15, %c0_135] : memref<1x43x64xf32, #tpu.memory_space<vmem>>, vector<1x1x4xf32>
    %323 = vector.shape_cast %322 : vector<1x1x4xf32> to vector<1x4xf32>
    %c0_136 = arith.constant 0 : index
    %c16 = arith.constant 16 : index
    %c0_137 = arith.constant 0 : index
    %324 = vector.load %arg3[%c0_136, %c16, %c0_137] : memref<1x43x64xf32, #tpu.memory_space<vmem>>, vector<1x1x4xf32>
    %325 = vector.shape_cast %324 : vector<1x1x4xf32> to vector<1x4xf32>
    %c0_138 = arith.constant 0 : index
    %c17 = arith.constant 17 : index
    %c0_139 = arith.constant 0 : index
    %326 = vector.load %arg3[%c0_138, %c17, %c0_139] : memref<1x43x64xf32, #tpu.memory_space<vmem>>, vector<1x1x4xf32>
    %327 = vector.shape_cast %326 : vector<1x1x4xf32> to vector<1x4xf32>
    %c0_140 = arith.constant 0 : index
    %c18 = arith.constant 18 : index
    %c0_141 = arith.constant 0 : index
    %328 = vector.load %arg3[%c0_140, %c18, %c0_141] : memref<1x43x64xf32, #tpu.memory_space<vmem>>, vector<1x1x4xf32>
    %329 = vector.shape_cast %328 : vector<1x1x4xf32> to vector<1x4xf32>
    %c0_142 = arith.constant 0 : index
    %c19 = arith.constant 19 : index
    %c0_143 = arith.constant 0 : index
    %330 = vector.load %arg3[%c0_142, %c19, %c0_143] : memref<1x43x64xf32, #tpu.memory_space<vmem>>, vector<1x1x4xf32>
    %331 = vector.shape_cast %330 : vector<1x1x4xf32> to vector<1x4xf32>
    %c0_144 = arith.constant 0 : index
    %c20 = arith.constant 20 : index
    %c0_145 = arith.constant 0 : index
    %332 = vector.load %arg3[%c0_144, %c20, %c0_145] : memref<1x43x64xf32, #tpu.memory_space<vmem>>, vector<1x1x4xf32>
    %333 = vector.shape_cast %332 : vector<1x1x4xf32> to vector<1x4xf32>
    %c0_146 = arith.constant 0 : index
    %c21 = arith.constant 21 : index
    %c0_147 = arith.constant 0 : index
    %334 = vector.load %arg3[%c0_146, %c21, %c0_147] : memref<1x43x64xf32, #tpu.memory_space<vmem>>, vector<1x1x16xf32>
    %335 = vector.shape_cast %334 : vector<1x1x16xf32> to vector<1x16xf32>
    %c0_148 = arith.constant 0 : index
    %c22 = arith.constant 22 : index
    %c0_149 = arith.constant 0 : index
    %336 = vector.load %arg3[%c0_148, %c22, %c0_149] : memref<1x43x64xf32, #tpu.memory_space<vmem>>, vector<1x1x32xf32>
    %337 = vector.shape_cast %336 : vector<1x1x32xf32> to vector<1x32xf32>
    %cst_150 = arith.constant dense<0.000000e+00> : vector<16xf32>
    %338 = vector.multi_reduction <add>, %317, %cst_150 [0] : vector<32x16xf32> to vector<16xf32>
    %339 = vector.shape_cast %338 : vector<16xf32> to vector<1x16xf32>
    %cst_151 = arith.constant 3.125000e-02 : f32
    %340 = vector.broadcast %cst_151 : f32 to vector<1x16xf32>
    %341 = arith.mulf %339, %340 : vector<1x16xf32>
    %342 = arith.mulf %317, %317 : vector<32x16xf32>
    %cst_152 = arith.constant dense<0.000000e+00> : vector<16xf32>
    %343 = vector.multi_reduction <add>, %342, %cst_152 [0] : vector<32x16xf32> to vector<16xf32>
    %344 = vector.shape_cast %343 : vector<16xf32> to vector<1x16xf32>
    %cst_153 = arith.constant 3.125000e-02 : f32
    %345 = vector.broadcast %cst_153 : f32 to vector<1x16xf32>
    %346 = arith.mulf %344, %345 : vector<1x16xf32>
    %347 = arith.mulf %341, %341 : vector<1x16xf32>
    %348 = arith.subf %346, %347 : vector<1x16xf32>
    %cst_154 = arith.constant 9.99999974E-6 : f32
    %349 = vector.broadcast %cst_154 : f32 to vector<1x16xf32>
    %350 = arith.addf %348, %349 : vector<1x16xf32>
    %351 = math.rsqrt %350 : vector<1x16xf32>
    %352 = arith.mulf %319, %351 : vector<1x16xf32>
    %353 = arith.mulf %341, %352 : vector<1x16xf32>
    %354 = arith.subf %321, %353 : vector<1x16xf32>
    %355 = vector.broadcast %352 : vector<1x16xf32> to vector<32x16xf32>
    %356 = arith.mulf %317, %355 : vector<32x16xf32>
    %357 = vector.broadcast %354 : vector<1x16xf32> to vector<32x16xf32>
    %358 = arith.addf %356, %357 : vector<32x16xf32>
    %cst_155 = arith.constant 0.000000e+00 : f32
    %359 = vector.broadcast %cst_155 : f32 to vector<32x16xf32>
    %360 = arith.maximumf %358, %359 : vector<32x16xf32>
    %c0_156 = arith.constant 0 : index
    %c120 = arith.constant 120 : index
    %c0_157 = arith.constant 0 : index
    %361 = vector.load %arg4[%c0_156, %c120, %c0_157] : memref<1x520x64xf32, #tpu.memory_space<vmem>>, vector<1x16x4xf32>
    %362 = vector.shape_cast %361 : vector<1x16x4xf32> to vector<16x4xf32>
    %cst_158 = arith.constant dense<0.000000e+00> : vector<32x4xf32>
    %363 = tpu.matmul %360, %362, %cst_158 {dimension_numbers = #tpu.dot_dimension_numbers<[1], [0], [0], [1], [0, 0, 1, 1], [], []>} : vector<32x16xf32>, vector<16x4xf32>, vector<32x4xf32> -> vector<32x4xf32>
    %364 = vector.broadcast %323 : vector<1x4xf32> to vector<32x4xf32>
    %365 = arith.addf %363, %364 : vector<32x4xf32>
    %cst_159 = arith.constant dense<0.000000e+00> : vector<4xf32>
    %366 = vector.multi_reduction <add>, %365, %cst_159 [0] : vector<32x4xf32> to vector<4xf32>
    %367 = vector.shape_cast %366 : vector<4xf32> to vector<1x4xf32>
    %cst_160 = arith.constant 3.125000e-02 : f32
    %368 = vector.broadcast %cst_160 : f32 to vector<1x4xf32>
    %369 = arith.mulf %367, %368 : vector<1x4xf32>
    %370 = arith.mulf %365, %365 : vector<32x4xf32>
    %cst_161 = arith.constant dense<0.000000e+00> : vector<4xf32>
    %371 = vector.multi_reduction <add>, %370, %cst_161 [0] : vector<32x4xf32> to vector<4xf32>
    %372 = vector.shape_cast %371 : vector<4xf32> to vector<1x4xf32>
    %cst_162 = arith.constant 3.125000e-02 : f32
    %373 = vector.broadcast %cst_162 : f32 to vector<1x4xf32>
    %374 = arith.mulf %372, %373 : vector<1x4xf32>
    %375 = arith.mulf %369, %369 : vector<1x4xf32>
    %376 = arith.subf %374, %375 : vector<1x4xf32>
    %cst_163 = arith.constant 9.99999974E-6 : f32
    %377 = vector.broadcast %cst_163 : f32 to vector<1x4xf32>
    %378 = arith.addf %376, %377 : vector<1x4xf32>
    %379 = math.rsqrt %378 : vector<1x4xf32>
    %380 = arith.mulf %325, %379 : vector<1x4xf32>
    %381 = arith.mulf %369, %380 : vector<1x4xf32>
    %382 = arith.subf %327, %381 : vector<1x4xf32>
    %383 = vector.broadcast %380 : vector<1x4xf32> to vector<32x4xf32>
    %384 = arith.mulf %365, %383 : vector<32x4xf32>
    %385 = vector.broadcast %382 : vector<1x4xf32> to vector<32x4xf32>
    %386 = arith.addf %384, %385 : vector<32x4xf32>
    %cst_164 = arith.constant 0.000000e+00 : f32
    %387 = vector.broadcast %cst_164 : f32 to vector<32x4xf32>
    %388 = arith.maximumf %386, %387 : vector<32x4xf32>
    %c0_165 = arith.constant 0 : index
    %c136 = arith.constant 136 : index
    %c0_166 = arith.constant 0 : index
    %389 = vector.load %arg4[%c0_165, %c136, %c0_166] : memref<1x520x64xf32, #tpu.memory_space<vmem>>, vector<1x20x4xf32>
    %390 = vector.shape_cast %389 : vector<1x20x4xf32> to vector<20x4xf32>
    %c2_i32_167 = arith.constant 2 : i32
    %391 = tpu.dynamic_rotate %388 by %c2_i32_167 dim 0 : vector<32x4xf32>, i32 -> vector<32x4xf32>
    %392 = tpu.iota {dimensions = array<i32: 0>} : vector<32x1xi32>
    %c15_i32 = arith.constant 15 : i32
    %393 = vector.broadcast %c15_i32 : i32 to vector<32x1xi32>
    %394 = arith.andi %392, %393 : vector<32x1xi32>
    %c-2_i32_168 = arith.constant -2 : i32
    %395 = vector.broadcast %c-2_i32_168 : i32 to vector<32x1xi32>
    %396 = arith.addi %394, %395 : vector<32x1xi32>
    %c0_i32_169 = arith.constant 0 : i32
    %397 = vector.broadcast %c0_i32_169 : i32 to vector<32x1xi32>
    %398 = arith.cmpi sge, %396, %397 : vector<32x1xi32>
    %c-2_i32_170 = arith.constant -2 : i32
    %399 = vector.broadcast %c-2_i32_170 : i32 to vector<32x1xi32>
    %400 = arith.addi %394, %399 : vector<32x1xi32>
    %c16_i32 = arith.constant 16 : i32
    %401 = vector.broadcast %c16_i32 : i32 to vector<32x1xi32>
    %402 = arith.cmpi slt, %400, %401 : vector<32x1xi32>
    %403 = arith.andi %398, %402 : vector<32x1xi1>
    %cst_171 = arith.constant 1.000000e+00 : f32
    %cst_172 = arith.constant 0.000000e+00 : f32
    %404 = vector.broadcast %cst_171 : f32 to vector<32x1xf32>
    %405 = vector.broadcast %cst_172 : f32 to vector<32x1xf32>
    %406 = arith.select %403, %404, %405 : vector<32x1xi1>, vector<32x1xf32>
    %407 = vector.broadcast %406 : vector<32x1xf32> to vector<32x4xf32>
    %408 = arith.mulf %391, %407 : vector<32x4xf32>
    %c1_i32_173 = arith.constant 1 : i32
    %409 = tpu.dynamic_rotate %388 by %c1_i32_173 dim 0 : vector<32x4xf32>, i32 -> vector<32x4xf32>
    %410 = tpu.iota {dimensions = array<i32: 0>} : vector<32x1xi32>
    %c15_i32_174 = arith.constant 15 : i32
    %411 = vector.broadcast %c15_i32_174 : i32 to vector<32x1xi32>
    %412 = arith.andi %410, %411 : vector<32x1xi32>
    %c-1_i32_175 = arith.constant -1 : i32
    %413 = vector.broadcast %c-1_i32_175 : i32 to vector<32x1xi32>
    %414 = arith.addi %412, %413 : vector<32x1xi32>
    %c0_i32_176 = arith.constant 0 : i32
    %415 = vector.broadcast %c0_i32_176 : i32 to vector<32x1xi32>
    %416 = arith.cmpi sge, %414, %415 : vector<32x1xi32>
    %c-1_i32_177 = arith.constant -1 : i32
    %417 = vector.broadcast %c-1_i32_177 : i32 to vector<32x1xi32>
    %418 = arith.addi %412, %417 : vector<32x1xi32>
    %c16_i32_178 = arith.constant 16 : i32
    %419 = vector.broadcast %c16_i32_178 : i32 to vector<32x1xi32>
    %420 = arith.cmpi slt, %418, %419 : vector<32x1xi32>
    %421 = arith.andi %416, %420 : vector<32x1xi1>
    %cst_179 = arith.constant 1.000000e+00 : f32
    %cst_180 = arith.constant 0.000000e+00 : f32
    %422 = vector.broadcast %cst_179 : f32 to vector<32x1xf32>
    %423 = vector.broadcast %cst_180 : f32 to vector<32x1xf32>
    %424 = arith.select %421, %422, %423 : vector<32x1xi1>, vector<32x1xf32>
    %425 = vector.broadcast %424 : vector<32x1xf32> to vector<32x4xf32>
    %426 = arith.mulf %409, %425 : vector<32x4xf32>
    %c31_i32_181 = arith.constant 31 : i32
    %427 = tpu.dynamic_rotate %388 by %c31_i32_181 dim 0 : vector<32x4xf32>, i32 -> vector<32x4xf32>
    %428 = tpu.iota {dimensions = array<i32: 0>} : vector<32x1xi32>
    %c15_i32_182 = arith.constant 15 : i32
    %429 = vector.broadcast %c15_i32_182 : i32 to vector<32x1xi32>
    %430 = arith.andi %428, %429 : vector<32x1xi32>
    %c1_i32_183 = arith.constant 1 : i32
    %431 = vector.broadcast %c1_i32_183 : i32 to vector<32x1xi32>
    %432 = arith.addi %430, %431 : vector<32x1xi32>
    %c0_i32_184 = arith.constant 0 : i32
    %433 = vector.broadcast %c0_i32_184 : i32 to vector<32x1xi32>
    %434 = arith.cmpi sge, %432, %433 : vector<32x1xi32>
    %c1_i32_185 = arith.constant 1 : i32
    %435 = vector.broadcast %c1_i32_185 : i32 to vector<32x1xi32>
    %436 = arith.addi %430, %435 : vector<32x1xi32>
    %c16_i32_186 = arith.constant 16 : i32
    %437 = vector.broadcast %c16_i32_186 : i32 to vector<32x1xi32>
    %438 = arith.cmpi slt, %436, %437 : vector<32x1xi32>
    %439 = arith.andi %434, %438 : vector<32x1xi1>
    %cst_187 = arith.constant 1.000000e+00 : f32
    %cst_188 = arith.constant 0.000000e+00 : f32
    %440 = vector.broadcast %cst_187 : f32 to vector<32x1xf32>
    %441 = vector.broadcast %cst_188 : f32 to vector<32x1xf32>
    %442 = arith.select %439, %440, %441 : vector<32x1xi1>, vector<32x1xf32>
    %443 = vector.broadcast %442 : vector<32x1xf32> to vector<32x4xf32>
    %444 = arith.mulf %427, %443 : vector<32x4xf32>
    %c30_i32 = arith.constant 30 : i32
    %445 = tpu.dynamic_rotate %388 by %c30_i32 dim 0 : vector<32x4xf32>, i32 -> vector<32x4xf32>
    %446 = tpu.iota {dimensions = array<i32: 0>} : vector<32x1xi32>
    %c15_i32_189 = arith.constant 15 : i32
    %447 = vector.broadcast %c15_i32_189 : i32 to vector<32x1xi32>
    %448 = arith.andi %446, %447 : vector<32x1xi32>
    %c2_i32_190 = arith.constant 2 : i32
    %449 = vector.broadcast %c2_i32_190 : i32 to vector<32x1xi32>
    %450 = arith.addi %448, %449 : vector<32x1xi32>
    %c0_i32_191 = arith.constant 0 : i32
    %451 = vector.broadcast %c0_i32_191 : i32 to vector<32x1xi32>
    %452 = arith.cmpi sge, %450, %451 : vector<32x1xi32>
    %c2_i32_192 = arith.constant 2 : i32
    %453 = vector.broadcast %c2_i32_192 : i32 to vector<32x1xi32>
    %454 = arith.addi %448, %453 : vector<32x1xi32>
    %c16_i32_193 = arith.constant 16 : i32
    %455 = vector.broadcast %c16_i32_193 : i32 to vector<32x1xi32>
    %456 = arith.cmpi slt, %454, %455 : vector<32x1xi32>
    %457 = arith.andi %452, %456 : vector<32x1xi1>
    %cst_194 = arith.constant 1.000000e+00 : f32
    %cst_195 = arith.constant 0.000000e+00 : f32
    %458 = vector.broadcast %cst_194 : f32 to vector<32x1xf32>
    %459 = vector.broadcast %cst_195 : f32 to vector<32x1xf32>
    %460 = arith.select %457, %458, %459 : vector<32x1xi1>, vector<32x1xf32>
    %461 = vector.broadcast %460 : vector<32x1xf32> to vector<32x4xf32>
    %462 = arith.mulf %445, %461 : vector<32x4xf32>
    %463 = tpu.concatenate %408, %426, %388, %444, %462 in 1 : vector<32x4xf32>, vector<32x4xf32>, vector<32x4xf32>, vector<32x4xf32>, vector<32x4xf32> -> vector<32x20xf32>
    %cst_196 = arith.constant dense<0.000000e+00> : vector<32x4xf32>
    %464 = tpu.matmul %463, %390, %cst_196 {dimension_numbers = #tpu.dot_dimension_numbers<[1], [0], [0], [1], [0, 0, 1, 1], [], []>} : vector<32x20xf32>, vector<20x4xf32>, vector<32x4xf32> -> vector<32x4xf32>
    %465 = vector.broadcast %329 : vector<1x4xf32> to vector<32x4xf32>
    %466 = arith.addf %464, %465 : vector<32x4xf32>
    %cst_197 = arith.constant dense<0.000000e+00> : vector<4xf32>
    %467 = vector.multi_reduction <add>, %466, %cst_197 [0] : vector<32x4xf32> to vector<4xf32>
    %468 = vector.shape_cast %467 : vector<4xf32> to vector<1x4xf32>
    %cst_198 = arith.constant 3.125000e-02 : f32
    %469 = vector.broadcast %cst_198 : f32 to vector<1x4xf32>
    %470 = arith.mulf %468, %469 : vector<1x4xf32>
    %471 = arith.mulf %466, %466 : vector<32x4xf32>
    %cst_199 = arith.constant dense<0.000000e+00> : vector<4xf32>
    %472 = vector.multi_reduction <add>, %471, %cst_199 [0] : vector<32x4xf32> to vector<4xf32>
    %473 = vector.shape_cast %472 : vector<4xf32> to vector<1x4xf32>
    %cst_200 = arith.constant 3.125000e-02 : f32
    %474 = vector.broadcast %cst_200 : f32 to vector<1x4xf32>
    %475 = arith.mulf %473, %474 : vector<1x4xf32>
    %476 = arith.mulf %470, %470 : vector<1x4xf32>
    %477 = arith.subf %475, %476 : vector<1x4xf32>
    %cst_201 = arith.constant 9.99999974E-6 : f32
    %478 = vector.broadcast %cst_201 : f32 to vector<1x4xf32>
    %479 = arith.addf %477, %478 : vector<1x4xf32>
    %480 = math.rsqrt %479 : vector<1x4xf32>
    %481 = arith.mulf %331, %480 : vector<1x4xf32>
    %482 = arith.mulf %470, %481 : vector<1x4xf32>
    %483 = arith.subf %333, %482 : vector<1x4xf32>
    %484 = tpu.iota {dimensions = array<i32: 0>} : vector<16x32xi32>
    %485 = tpu.iota {dimensions = array<i32: 1>} : vector<16x32xi32>
    %c2_i32_202 = arith.constant 2 : i32
    %486 = vector.broadcast %c2_i32_202 : i32 to vector<16x32xi32>
    %487 = arith.muli %486, %484 : vector<16x32xi32>
    %488 = arith.cmpi eq, %485, %487 : vector<16x32xi32>
    %cst_203 = arith.constant 1.000000e+00 : f32
    %cst_204 = arith.constant 0.000000e+00 : f32
    %489 = vector.broadcast %cst_203 : f32 to vector<16x32xf32>
    %490 = vector.broadcast %cst_204 : f32 to vector<16x32xf32>
    %491 = arith.select %488, %489, %490 : vector<16x32xi1>, vector<16x32xf32>
    %492 = tpu.concatenate %466, %317 in 1 : vector<32x4xf32>, vector<32x16xf32> -> vector<32x20xf32>
    %cst_205 = arith.constant dense<0.000000e+00> : vector<16x20xf32>
    %493 = tpu.matmul %491, %492, %cst_205 {dimension_numbers = #tpu.dot_dimension_numbers<[1], [0], [0], [1], [0, 0, 1, 1], [], []>} : vector<16x32xf32>, vector<32x20xf32>, vector<16x20xf32> -> vector<16x20xf32>
    %494 = vector.extract_strided_slice %493 {offsets = [0, 0], sizes = [16, 4], strides = [1, 1]} : vector<16x20xf32> to vector<16x4xf32>
    %495 = vector.broadcast %481 : vector<1x4xf32> to vector<16x4xf32>
    %496 = arith.mulf %494, %495 : vector<16x4xf32>
    %497 = vector.broadcast %483 : vector<1x4xf32> to vector<16x4xf32>
    %498 = arith.addf %496, %497 : vector<16x4xf32>
    %cst_206 = arith.constant 0.000000e+00 : f32
    %499 = vector.broadcast %cst_206 : f32 to vector<16x4xf32>
    %500 = arith.maximumf %498, %499 : vector<16x4xf32>
    %c0_207 = arith.constant 0 : index
    %c160 = arith.constant 160 : index
    %c0_208 = arith.constant 0 : index
    %501 = vector.load %arg4[%c0_207, %c160, %c0_208] : memref<1x520x64xf32, #tpu.memory_space<vmem>>, vector<1x4x16xf32>
    %502 = vector.shape_cast %501 : vector<1x4x16xf32> to vector<4x16xf32>
    %cst_209 = arith.constant dense<0.000000e+00> : vector<16x16xf32>
    %503 = tpu.matmul %500, %502, %cst_209 {dimension_numbers = #tpu.dot_dimension_numbers<[1], [0], [0], [1], [0, 0, 1, 1], [], []>} : vector<16x4xf32>, vector<4x16xf32>, vector<16x16xf32> -> vector<16x16xf32>
    %504 = vector.broadcast %335 : vector<1x16xf32> to vector<16x16xf32>
    %505 = arith.addf %503, %504 : vector<16x16xf32>
    %506 = vector.extract_strided_slice %493 {offsets = [0, 4], sizes = [16, 16], strides = [1, 1]} : vector<16x20xf32> to vector<16x16xf32>
    %507 = arith.addf %505, %506 : vector<16x16xf32>
    %c0_210 = arith.constant 0 : index
    %c168 = arith.constant 168 : index
    %c0_211 = arith.constant 0 : index
    %508 = vector.load %arg4[%c0_210, %c168, %c0_211] : memref<1x520x64xf32, #tpu.memory_space<vmem>>, vector<1x16x32xf32>
    %509 = vector.shape_cast %508 : vector<1x16x32xf32> to vector<16x32xf32>
    %cst_212 = arith.constant dense<0.000000e+00> : vector<16x32xf32>
    %510 = tpu.matmul %507, %509, %cst_212 {dimension_numbers = #tpu.dot_dimension_numbers<[1], [0], [0], [1], [0, 0, 1, 1], [], []>} : vector<16x16xf32>, vector<16x32xf32>, vector<16x32xf32> -> vector<16x32xf32>
    %511 = vector.broadcast %337 : vector<1x32xf32> to vector<16x32xf32>
    %512 = arith.addf %510, %511 : vector<16x32xf32>
    %c0_213 = arith.constant 0 : index
    %c23 = arith.constant 23 : index
    %c0_214 = arith.constant 0 : index
    %513 = vector.load %arg3[%c0_213, %c23, %c0_214] : memref<1x43x64xf32, #tpu.memory_space<vmem>>, vector<1x1x32xf32>
    %514 = vector.shape_cast %513 : vector<1x1x32xf32> to vector<1x32xf32>
    %c0_215 = arith.constant 0 : index
    %c24 = arith.constant 24 : index
    %c0_216 = arith.constant 0 : index
    %515 = vector.load %arg3[%c0_215, %c24, %c0_216] : memref<1x43x64xf32, #tpu.memory_space<vmem>>, vector<1x1x32xf32>
    %516 = vector.shape_cast %515 : vector<1x1x32xf32> to vector<1x32xf32>
    %c0_217 = arith.constant 0 : index
    %c25 = arith.constant 25 : index
    %c0_218 = arith.constant 0 : index
    %517 = vector.load %arg3[%c0_217, %c25, %c0_218] : memref<1x43x64xf32, #tpu.memory_space<vmem>>, vector<1x1x8xf32>
    %518 = vector.shape_cast %517 : vector<1x1x8xf32> to vector<1x8xf32>
    %c0_219 = arith.constant 0 : index
    %c26 = arith.constant 26 : index
    %c0_220 = arith.constant 0 : index
    %519 = vector.load %arg3[%c0_219, %c26, %c0_220] : memref<1x43x64xf32, #tpu.memory_space<vmem>>, vector<1x1x8xf32>
    %520 = vector.shape_cast %519 : vector<1x1x8xf32> to vector<1x8xf32>
    %c0_221 = arith.constant 0 : index
    %c27 = arith.constant 27 : index
    %c0_222 = arith.constant 0 : index
    %521 = vector.load %arg3[%c0_221, %c27, %c0_222] : memref<1x43x64xf32, #tpu.memory_space<vmem>>, vector<1x1x8xf32>
    %522 = vector.shape_cast %521 : vector<1x1x8xf32> to vector<1x8xf32>
    %c0_223 = arith.constant 0 : index
    %c28 = arith.constant 28 : index
    %c0_224 = arith.constant 0 : index
    %523 = vector.load %arg3[%c0_223, %c28, %c0_224] : memref<1x43x64xf32, #tpu.memory_space<vmem>>, vector<1x1x8xf32>
    %524 = vector.shape_cast %523 : vector<1x1x8xf32> to vector<1x8xf32>
    %c0_225 = arith.constant 0 : index
    %c29 = arith.constant 29 : index
    %c0_226 = arith.constant 0 : index
    %525 = vector.load %arg3[%c0_225, %c29, %c0_226] : memref<1x43x64xf32, #tpu.memory_space<vmem>>, vector<1x1x8xf32>
    %526 = vector.shape_cast %525 : vector<1x1x8xf32> to vector<1x8xf32>
    %c0_227 = arith.constant 0 : index
    %c30 = arith.constant 30 : index
    %c0_228 = arith.constant 0 : index
    %527 = vector.load %arg3[%c0_227, %c30, %c0_228] : memref<1x43x64xf32, #tpu.memory_space<vmem>>, vector<1x1x8xf32>
    %528 = vector.shape_cast %527 : vector<1x1x8xf32> to vector<1x8xf32>
    %c0_229 = arith.constant 0 : index
    %c31 = arith.constant 31 : index
    %c0_230 = arith.constant 0 : index
    %529 = vector.load %arg3[%c0_229, %c31, %c0_230] : memref<1x43x64xf32, #tpu.memory_space<vmem>>, vector<1x1x32xf32>
    %530 = vector.shape_cast %529 : vector<1x1x32xf32> to vector<1x32xf32>
    %c0_231 = arith.constant 0 : index
    %c32 = arith.constant 32 : index
    %c0_232 = arith.constant 0 : index
    %531 = vector.load %arg3[%c0_231, %c32, %c0_232] : memref<1x43x64xf32, #tpu.memory_space<vmem>>, vector<1x1x64xf32>
    %532 = vector.shape_cast %531 : vector<1x1x64xf32> to vector<1x64xf32>
    %cst_233 = arith.constant dense<0.000000e+00> : vector<32xf32>
    %533 = vector.multi_reduction <add>, %512, %cst_233 [0] : vector<16x32xf32> to vector<32xf32>
    %534 = vector.shape_cast %533 : vector<32xf32> to vector<1x32xf32>
    %cst_234 = arith.constant 6.250000e-02 : f32
    %535 = vector.broadcast %cst_234 : f32 to vector<1x32xf32>
    %536 = arith.mulf %534, %535 : vector<1x32xf32>
    %537 = arith.mulf %512, %512 : vector<16x32xf32>
    %cst_235 = arith.constant dense<0.000000e+00> : vector<32xf32>
    %538 = vector.multi_reduction <add>, %537, %cst_235 [0] : vector<16x32xf32> to vector<32xf32>
    %539 = vector.shape_cast %538 : vector<32xf32> to vector<1x32xf32>
    %cst_236 = arith.constant 6.250000e-02 : f32
    %540 = vector.broadcast %cst_236 : f32 to vector<1x32xf32>
    %541 = arith.mulf %539, %540 : vector<1x32xf32>
    %542 = arith.mulf %536, %536 : vector<1x32xf32>
    %543 = arith.subf %541, %542 : vector<1x32xf32>
    %cst_237 = arith.constant 9.99999974E-6 : f32
    %544 = vector.broadcast %cst_237 : f32 to vector<1x32xf32>
    %545 = arith.addf %543, %544 : vector<1x32xf32>
    %546 = math.rsqrt %545 : vector<1x32xf32>
    %547 = arith.mulf %514, %546 : vector<1x32xf32>
    %548 = arith.mulf %536, %547 : vector<1x32xf32>
    %549 = arith.subf %516, %548 : vector<1x32xf32>
    %550 = vector.broadcast %547 : vector<1x32xf32> to vector<16x32xf32>
    %551 = arith.mulf %512, %550 : vector<16x32xf32>
    %552 = vector.broadcast %549 : vector<1x32xf32> to vector<16x32xf32>
    %553 = arith.addf %551, %552 : vector<16x32xf32>
    %cst_238 = arith.constant 0.000000e+00 : f32
    %554 = vector.broadcast %cst_238 : f32 to vector<16x32xf32>
    %555 = arith.maximumf %553, %554 : vector<16x32xf32>
    %c0_239 = arith.constant 0 : index
    %c184 = arith.constant 184 : index
    %c0_240 = arith.constant 0 : index
    %556 = vector.load %arg4[%c0_239, %c184, %c0_240] : memref<1x520x64xf32, #tpu.memory_space<vmem>>, vector<1x32x8xf32>
    %557 = vector.shape_cast %556 : vector<1x32x8xf32> to vector<32x8xf32>
    %cst_241 = arith.constant dense<0.000000e+00> : vector<16x8xf32>
    %558 = tpu.matmul %555, %557, %cst_241 {dimension_numbers = #tpu.dot_dimension_numbers<[1], [0], [0], [1], [0, 0, 1, 1], [], []>} : vector<16x32xf32>, vector<32x8xf32>, vector<16x8xf32> -> vector<16x8xf32>
    %559 = vector.broadcast %518 : vector<1x8xf32> to vector<16x8xf32>
    %560 = arith.addf %558, %559 : vector<16x8xf32>
    %cst_242 = arith.constant dense<0.000000e+00> : vector<8xf32>
    %561 = vector.multi_reduction <add>, %560, %cst_242 [0] : vector<16x8xf32> to vector<8xf32>
    %562 = vector.shape_cast %561 : vector<8xf32> to vector<1x8xf32>
    %cst_243 = arith.constant 6.250000e-02 : f32
    %563 = vector.broadcast %cst_243 : f32 to vector<1x8xf32>
    %564 = arith.mulf %562, %563 : vector<1x8xf32>
    %565 = arith.mulf %560, %560 : vector<16x8xf32>
    %cst_244 = arith.constant dense<0.000000e+00> : vector<8xf32>
    %566 = vector.multi_reduction <add>, %565, %cst_244 [0] : vector<16x8xf32> to vector<8xf32>
    %567 = vector.shape_cast %566 : vector<8xf32> to vector<1x8xf32>
    %cst_245 = arith.constant 6.250000e-02 : f32
    %568 = vector.broadcast %cst_245 : f32 to vector<1x8xf32>
    %569 = arith.mulf %567, %568 : vector<1x8xf32>
    %570 = arith.mulf %564, %564 : vector<1x8xf32>
    %571 = arith.subf %569, %570 : vector<1x8xf32>
    %cst_246 = arith.constant 9.99999974E-6 : f32
    %572 = vector.broadcast %cst_246 : f32 to vector<1x8xf32>
    %573 = arith.addf %571, %572 : vector<1x8xf32>
    %574 = math.rsqrt %573 : vector<1x8xf32>
    %575 = arith.mulf %520, %574 : vector<1x8xf32>
    %576 = arith.mulf %564, %575 : vector<1x8xf32>
    %577 = arith.subf %522, %576 : vector<1x8xf32>
    %578 = vector.broadcast %575 : vector<1x8xf32> to vector<16x8xf32>
    %579 = arith.mulf %560, %578 : vector<16x8xf32>
    %580 = vector.broadcast %577 : vector<1x8xf32> to vector<16x8xf32>
    %581 = arith.addf %579, %580 : vector<16x8xf32>
    %cst_247 = arith.constant 0.000000e+00 : f32
    %582 = vector.broadcast %cst_247 : f32 to vector<16x8xf32>
    %583 = arith.maximumf %581, %582 : vector<16x8xf32>
    %c0_248 = arith.constant 0 : index
    %c216 = arith.constant 216 : index
    %c0_249 = arith.constant 0 : index
    %584 = vector.load %arg4[%c0_248, %c216, %c0_249] : memref<1x520x64xf32, #tpu.memory_space<vmem>>, vector<1x40x8xf32>
    %585 = vector.shape_cast %584 : vector<1x40x8xf32> to vector<40x8xf32>
    %c2_i32_250 = arith.constant 2 : i32
    %586 = tpu.dynamic_rotate %583 by %c2_i32_250 dim 0 : vector<16x8xf32>, i32 -> vector<16x8xf32>
    %587 = tpu.iota {dimensions = array<i32: 0>} : vector<16x1xi32>
    %c7_i32 = arith.constant 7 : i32
    %588 = vector.broadcast %c7_i32 : i32 to vector<16x1xi32>
    %589 = arith.andi %587, %588 : vector<16x1xi32>
    %c-2_i32_251 = arith.constant -2 : i32
    %590 = vector.broadcast %c-2_i32_251 : i32 to vector<16x1xi32>
    %591 = arith.addi %589, %590 : vector<16x1xi32>
    %c0_i32_252 = arith.constant 0 : i32
    %592 = vector.broadcast %c0_i32_252 : i32 to vector<16x1xi32>
    %593 = arith.cmpi sge, %591, %592 : vector<16x1xi32>
    %c-2_i32_253 = arith.constant -2 : i32
    %594 = vector.broadcast %c-2_i32_253 : i32 to vector<16x1xi32>
    %595 = arith.addi %589, %594 : vector<16x1xi32>
    %c8_i32 = arith.constant 8 : i32
    %596 = vector.broadcast %c8_i32 : i32 to vector<16x1xi32>
    %597 = arith.cmpi slt, %595, %596 : vector<16x1xi32>
    %598 = arith.andi %593, %597 : vector<16x1xi1>
    %cst_254 = arith.constant 1.000000e+00 : f32
    %cst_255 = arith.constant 0.000000e+00 : f32
    %599 = vector.broadcast %cst_254 : f32 to vector<16x1xf32>
    %600 = vector.broadcast %cst_255 : f32 to vector<16x1xf32>
    %601 = arith.select %598, %599, %600 : vector<16x1xi1>, vector<16x1xf32>
    %602 = vector.broadcast %601 : vector<16x1xf32> to vector<16x8xf32>
    %603 = arith.mulf %586, %602 : vector<16x8xf32>
    %c1_i32_256 = arith.constant 1 : i32
    %604 = tpu.dynamic_rotate %583 by %c1_i32_256 dim 0 : vector<16x8xf32>, i32 -> vector<16x8xf32>
    %605 = tpu.iota {dimensions = array<i32: 0>} : vector<16x1xi32>
    %c7_i32_257 = arith.constant 7 : i32
    %606 = vector.broadcast %c7_i32_257 : i32 to vector<16x1xi32>
    %607 = arith.andi %605, %606 : vector<16x1xi32>
    %c-1_i32_258 = arith.constant -1 : i32
    %608 = vector.broadcast %c-1_i32_258 : i32 to vector<16x1xi32>
    %609 = arith.addi %607, %608 : vector<16x1xi32>
    %c0_i32_259 = arith.constant 0 : i32
    %610 = vector.broadcast %c0_i32_259 : i32 to vector<16x1xi32>
    %611 = arith.cmpi sge, %609, %610 : vector<16x1xi32>
    %c-1_i32_260 = arith.constant -1 : i32
    %612 = vector.broadcast %c-1_i32_260 : i32 to vector<16x1xi32>
    %613 = arith.addi %607, %612 : vector<16x1xi32>
    %c8_i32_261 = arith.constant 8 : i32
    %614 = vector.broadcast %c8_i32_261 : i32 to vector<16x1xi32>
    %615 = arith.cmpi slt, %613, %614 : vector<16x1xi32>
    %616 = arith.andi %611, %615 : vector<16x1xi1>
    %cst_262 = arith.constant 1.000000e+00 : f32
    %cst_263 = arith.constant 0.000000e+00 : f32
    %617 = vector.broadcast %cst_262 : f32 to vector<16x1xf32>
    %618 = vector.broadcast %cst_263 : f32 to vector<16x1xf32>
    %619 = arith.select %616, %617, %618 : vector<16x1xi1>, vector<16x1xf32>
    %620 = vector.broadcast %619 : vector<16x1xf32> to vector<16x8xf32>
    %621 = arith.mulf %604, %620 : vector<16x8xf32>
    %c15_i32_264 = arith.constant 15 : i32
    %622 = tpu.dynamic_rotate %583 by %c15_i32_264 dim 0 : vector<16x8xf32>, i32 -> vector<16x8xf32>
    %623 = tpu.iota {dimensions = array<i32: 0>} : vector<16x1xi32>
    %c7_i32_265 = arith.constant 7 : i32
    %624 = vector.broadcast %c7_i32_265 : i32 to vector<16x1xi32>
    %625 = arith.andi %623, %624 : vector<16x1xi32>
    %c1_i32_266 = arith.constant 1 : i32
    %626 = vector.broadcast %c1_i32_266 : i32 to vector<16x1xi32>
    %627 = arith.addi %625, %626 : vector<16x1xi32>
    %c0_i32_267 = arith.constant 0 : i32
    %628 = vector.broadcast %c0_i32_267 : i32 to vector<16x1xi32>
    %629 = arith.cmpi sge, %627, %628 : vector<16x1xi32>
    %c1_i32_268 = arith.constant 1 : i32
    %630 = vector.broadcast %c1_i32_268 : i32 to vector<16x1xi32>
    %631 = arith.addi %625, %630 : vector<16x1xi32>
    %c8_i32_269 = arith.constant 8 : i32
    %632 = vector.broadcast %c8_i32_269 : i32 to vector<16x1xi32>
    %633 = arith.cmpi slt, %631, %632 : vector<16x1xi32>
    %634 = arith.andi %629, %633 : vector<16x1xi1>
    %cst_270 = arith.constant 1.000000e+00 : f32
    %cst_271 = arith.constant 0.000000e+00 : f32
    %635 = vector.broadcast %cst_270 : f32 to vector<16x1xf32>
    %636 = vector.broadcast %cst_271 : f32 to vector<16x1xf32>
    %637 = arith.select %634, %635, %636 : vector<16x1xi1>, vector<16x1xf32>
    %638 = vector.broadcast %637 : vector<16x1xf32> to vector<16x8xf32>
    %639 = arith.mulf %622, %638 : vector<16x8xf32>
    %c14_i32 = arith.constant 14 : i32
    %640 = tpu.dynamic_rotate %583 by %c14_i32 dim 0 : vector<16x8xf32>, i32 -> vector<16x8xf32>
    %641 = tpu.iota {dimensions = array<i32: 0>} : vector<16x1xi32>
    %c7_i32_272 = arith.constant 7 : i32
    %642 = vector.broadcast %c7_i32_272 : i32 to vector<16x1xi32>
    %643 = arith.andi %641, %642 : vector<16x1xi32>
    %c2_i32_273 = arith.constant 2 : i32
    %644 = vector.broadcast %c2_i32_273 : i32 to vector<16x1xi32>
    %645 = arith.addi %643, %644 : vector<16x1xi32>
    %c0_i32_274 = arith.constant 0 : i32
    %646 = vector.broadcast %c0_i32_274 : i32 to vector<16x1xi32>
    %647 = arith.cmpi sge, %645, %646 : vector<16x1xi32>
    %c2_i32_275 = arith.constant 2 : i32
    %648 = vector.broadcast %c2_i32_275 : i32 to vector<16x1xi32>
    %649 = arith.addi %643, %648 : vector<16x1xi32>
    %c8_i32_276 = arith.constant 8 : i32
    %650 = vector.broadcast %c8_i32_276 : i32 to vector<16x1xi32>
    %651 = arith.cmpi slt, %649, %650 : vector<16x1xi32>
    %652 = arith.andi %647, %651 : vector<16x1xi1>
    %cst_277 = arith.constant 1.000000e+00 : f32
    %cst_278 = arith.constant 0.000000e+00 : f32
    %653 = vector.broadcast %cst_277 : f32 to vector<16x1xf32>
    %654 = vector.broadcast %cst_278 : f32 to vector<16x1xf32>
    %655 = arith.select %652, %653, %654 : vector<16x1xi1>, vector<16x1xf32>
    %656 = vector.broadcast %655 : vector<16x1xf32> to vector<16x8xf32>
    %657 = arith.mulf %640, %656 : vector<16x8xf32>
    %658 = tpu.concatenate %603, %621, %583, %639, %657 in 1 : vector<16x8xf32>, vector<16x8xf32>, vector<16x8xf32>, vector<16x8xf32>, vector<16x8xf32> -> vector<16x40xf32>
    %cst_279 = arith.constant dense<0.000000e+00> : vector<16x8xf32>
    %659 = tpu.matmul %658, %585, %cst_279 {dimension_numbers = #tpu.dot_dimension_numbers<[1], [0], [0], [1], [0, 0, 1, 1], [], []>} : vector<16x40xf32>, vector<40x8xf32>, vector<16x8xf32> -> vector<16x8xf32>
    %660 = vector.broadcast %524 : vector<1x8xf32> to vector<16x8xf32>
    %661 = arith.addf %659, %660 : vector<16x8xf32>
    %cst_280 = arith.constant dense<0.000000e+00> : vector<8xf32>
    %662 = vector.multi_reduction <add>, %661, %cst_280 [0] : vector<16x8xf32> to vector<8xf32>
    %663 = vector.shape_cast %662 : vector<8xf32> to vector<1x8xf32>
    %cst_281 = arith.constant 6.250000e-02 : f32
    %664 = vector.broadcast %cst_281 : f32 to vector<1x8xf32>
    %665 = arith.mulf %663, %664 : vector<1x8xf32>
    %666 = arith.mulf %661, %661 : vector<16x8xf32>
    %cst_282 = arith.constant dense<0.000000e+00> : vector<8xf32>
    %667 = vector.multi_reduction <add>, %666, %cst_282 [0] : vector<16x8xf32> to vector<8xf32>
    %668 = vector.shape_cast %667 : vector<8xf32> to vector<1x8xf32>
    %cst_283 = arith.constant 6.250000e-02 : f32
    %669 = vector.broadcast %cst_283 : f32 to vector<1x8xf32>
    %670 = arith.mulf %668, %669 : vector<1x8xf32>
    %671 = arith.mulf %665, %665 : vector<1x8xf32>
    %672 = arith.subf %670, %671 : vector<1x8xf32>
    %cst_284 = arith.constant 9.99999974E-6 : f32
    %673 = vector.broadcast %cst_284 : f32 to vector<1x8xf32>
    %674 = arith.addf %672, %673 : vector<1x8xf32>
    %675 = math.rsqrt %674 : vector<1x8xf32>
    %676 = arith.mulf %526, %675 : vector<1x8xf32>
    %677 = arith.mulf %665, %676 : vector<1x8xf32>
    %678 = arith.subf %528, %677 : vector<1x8xf32>
    %679 = tpu.iota {dimensions = array<i32: 0>} : vector<8x16xi32>
    %680 = tpu.iota {dimensions = array<i32: 1>} : vector<8x16xi32>
    %c2_i32_285 = arith.constant 2 : i32
    %681 = vector.broadcast %c2_i32_285 : i32 to vector<8x16xi32>
    %682 = arith.muli %681, %679 : vector<8x16xi32>
    %683 = arith.cmpi eq, %680, %682 : vector<8x16xi32>
    %cst_286 = arith.constant 1.000000e+00 : f32
    %cst_287 = arith.constant 0.000000e+00 : f32
    %684 = vector.broadcast %cst_286 : f32 to vector<8x16xf32>
    %685 = vector.broadcast %cst_287 : f32 to vector<8x16xf32>
    %686 = arith.select %683, %684, %685 : vector<8x16xi1>, vector<8x16xf32>
    %687 = tpu.concatenate %661, %512 in 1 : vector<16x8xf32>, vector<16x32xf32> -> vector<16x40xf32>
    %cst_288 = arith.constant dense<0.000000e+00> : vector<8x40xf32>
    %688 = tpu.matmul %686, %687, %cst_288 {dimension_numbers = #tpu.dot_dimension_numbers<[1], [0], [0], [1], [0, 0, 1, 1], [], []>} : vector<8x16xf32>, vector<16x40xf32>, vector<8x40xf32> -> vector<8x40xf32>
    %689 = vector.extract_strided_slice %688 {offsets = [0, 0], sizes = [8, 8], strides = [1, 1]} : vector<8x40xf32> to vector<8x8xf32>
    %690 = vector.broadcast %676 : vector<1x8xf32> to vector<8x8xf32>
    %691 = arith.mulf %689, %690 : vector<8x8xf32>
    %692 = vector.broadcast %678 : vector<1x8xf32> to vector<8x8xf32>
    %693 = arith.addf %691, %692 : vector<8x8xf32>
    %cst_289 = arith.constant 0.000000e+00 : f32
    %694 = vector.broadcast %cst_289 : f32 to vector<8x8xf32>
    %695 = arith.maximumf %693, %694 : vector<8x8xf32>
    %c0_290 = arith.constant 0 : index
    %c256 = arith.constant 256 : index
    %c0_291 = arith.constant 0 : index
    %696 = vector.load %arg4[%c0_290, %c256, %c0_291] : memref<1x520x64xf32, #tpu.memory_space<vmem>>, vector<1x8x32xf32>
    %697 = vector.shape_cast %696 : vector<1x8x32xf32> to vector<8x32xf32>
    %cst_292 = arith.constant dense<0.000000e+00> : vector<8x32xf32>
    %698 = tpu.matmul %695, %697, %cst_292 {dimension_numbers = #tpu.dot_dimension_numbers<[1], [0], [0], [1], [0, 0, 1, 1], [], []>} : vector<8x8xf32>, vector<8x32xf32>, vector<8x32xf32> -> vector<8x32xf32>
    %699 = vector.broadcast %530 : vector<1x32xf32> to vector<8x32xf32>
    %700 = arith.addf %698, %699 : vector<8x32xf32>
    %701 = vector.extract_strided_slice %688 {offsets = [0, 8], sizes = [8, 32], strides = [1, 1]} : vector<8x40xf32> to vector<8x32xf32>
    %702 = arith.addf %700, %701 : vector<8x32xf32>
    %c0_293 = arith.constant 0 : index
    %c264 = arith.constant 264 : index
    %c0_294 = arith.constant 0 : index
    %703 = vector.load %arg4[%c0_293, %c264, %c0_294] : memref<1x520x64xf32, #tpu.memory_space<vmem>>, vector<1x32x64xf32>
    %704 = vector.shape_cast %703 : vector<1x32x64xf32> to vector<32x64xf32>
    %cst_295 = arith.constant dense<0.000000e+00> : vector<8x64xf32>
    %705 = tpu.matmul %702, %704, %cst_295 {dimension_numbers = #tpu.dot_dimension_numbers<[1], [0], [0], [1], [0, 0, 1, 1], [], []>} : vector<8x32xf32>, vector<32x64xf32>, vector<8x64xf32> -> vector<8x64xf32>
    %706 = vector.broadcast %532 : vector<1x64xf32> to vector<8x64xf32>
    %707 = arith.addf %705, %706 : vector<8x64xf32>
    %c0_296 = arith.constant 0 : index
    %c33 = arith.constant 33 : index
    %c0_297 = arith.constant 0 : index
    %708 = vector.load %arg3[%c0_296, %c33, %c0_297] : memref<1x43x64xf32, #tpu.memory_space<vmem>>, vector<1x1x64xf32>
    %709 = vector.shape_cast %708 : vector<1x1x64xf32> to vector<1x64xf32>
    %c0_298 = arith.constant 0 : index
    %c34 = arith.constant 34 : index
    %c0_299 = arith.constant 0 : index
    %710 = vector.load %arg3[%c0_298, %c34, %c0_299] : memref<1x43x64xf32, #tpu.memory_space<vmem>>, vector<1x1x64xf32>
    %711 = vector.shape_cast %710 : vector<1x1x64xf32> to vector<1x64xf32>
    %c0_300 = arith.constant 0 : index
    %c35 = arith.constant 35 : index
    %c0_301 = arith.constant 0 : index
    %712 = vector.load %arg3[%c0_300, %c35, %c0_301] : memref<1x43x64xf32, #tpu.memory_space<vmem>>, vector<1x1x16xf32>
    %713 = vector.shape_cast %712 : vector<1x1x16xf32> to vector<1x16xf32>
    %c0_302 = arith.constant 0 : index
    %c36 = arith.constant 36 : index
    %c0_303 = arith.constant 0 : index
    %714 = vector.load %arg3[%c0_302, %c36, %c0_303] : memref<1x43x64xf32, #tpu.memory_space<vmem>>, vector<1x1x16xf32>
    %715 = vector.shape_cast %714 : vector<1x1x16xf32> to vector<1x16xf32>
    %c0_304 = arith.constant 0 : index
    %c37 = arith.constant 37 : index
    %c0_305 = arith.constant 0 : index
    %716 = vector.load %arg3[%c0_304, %c37, %c0_305] : memref<1x43x64xf32, #tpu.memory_space<vmem>>, vector<1x1x16xf32>
    %717 = vector.shape_cast %716 : vector<1x1x16xf32> to vector<1x16xf32>
    %c0_306 = arith.constant 0 : index
    %c38 = arith.constant 38 : index
    %c0_307 = arith.constant 0 : index
    %718 = vector.load %arg3[%c0_306, %c38, %c0_307] : memref<1x43x64xf32, #tpu.memory_space<vmem>>, vector<1x1x16xf32>
    %719 = vector.shape_cast %718 : vector<1x1x16xf32> to vector<1x16xf32>
    %c0_308 = arith.constant 0 : index
    %c39 = arith.constant 39 : index
    %c0_309 = arith.constant 0 : index
    %720 = vector.load %arg3[%c0_308, %c39, %c0_309] : memref<1x43x64xf32, #tpu.memory_space<vmem>>, vector<1x1x16xf32>
    %721 = vector.shape_cast %720 : vector<1x1x16xf32> to vector<1x16xf32>
    %c0_310 = arith.constant 0 : index
    %c40 = arith.constant 40 : index
    %c0_311 = arith.constant 0 : index
    %722 = vector.load %arg3[%c0_310, %c40, %c0_311] : memref<1x43x64xf32, #tpu.memory_space<vmem>>, vector<1x1x16xf32>
    %723 = vector.shape_cast %722 : vector<1x1x16xf32> to vector<1x16xf32>
    %c0_312 = arith.constant 0 : index
    %c41 = arith.constant 41 : index
    %c0_313 = arith.constant 0 : index
    %724 = vector.load %arg3[%c0_312, %c41, %c0_313] : memref<1x43x64xf32, #tpu.memory_space<vmem>>, vector<1x1x64xf32>
    %725 = vector.shape_cast %724 : vector<1x1x64xf32> to vector<1x64xf32>
    %c0_314 = arith.constant 0 : index
    %c42 = arith.constant 42 : index
    %c0_315 = arith.constant 0 : index
    %726 = vector.load %arg3[%c0_314, %c42, %c0_315] : memref<1x43x64xf32, #tpu.memory_space<vmem>>, vector<1x1x64xf32>
    %727 = vector.shape_cast %726 : vector<1x1x64xf32> to vector<1x64xf32>
    %cst_316 = arith.constant dense<0.000000e+00> : vector<64xf32>
    %728 = vector.multi_reduction <add>, %707, %cst_316 [0] : vector<8x64xf32> to vector<64xf32>
    %729 = vector.shape_cast %728 : vector<64xf32> to vector<1x64xf32>
    %cst_317 = arith.constant 1.250000e-01 : f32
    %730 = vector.broadcast %cst_317 : f32 to vector<1x64xf32>
    %731 = arith.mulf %729, %730 : vector<1x64xf32>
    %732 = arith.mulf %707, %707 : vector<8x64xf32>
    %cst_318 = arith.constant dense<0.000000e+00> : vector<64xf32>
    %733 = vector.multi_reduction <add>, %732, %cst_318 [0] : vector<8x64xf32> to vector<64xf32>
    %734 = vector.shape_cast %733 : vector<64xf32> to vector<1x64xf32>
    %cst_319 = arith.constant 1.250000e-01 : f32
    %735 = vector.broadcast %cst_319 : f32 to vector<1x64xf32>
    %736 = arith.mulf %734, %735 : vector<1x64xf32>
    %737 = arith.mulf %731, %731 : vector<1x64xf32>
    %738 = arith.subf %736, %737 : vector<1x64xf32>
    %cst_320 = arith.constant 9.99999974E-6 : f32
    %739 = vector.broadcast %cst_320 : f32 to vector<1x64xf32>
    %740 = arith.addf %738, %739 : vector<1x64xf32>
    %741 = math.rsqrt %740 : vector<1x64xf32>
    %742 = arith.mulf %709, %741 : vector<1x64xf32>
    %743 = arith.mulf %731, %742 : vector<1x64xf32>
    %744 = arith.subf %711, %743 : vector<1x64xf32>
    %745 = vector.broadcast %742 : vector<1x64xf32> to vector<8x64xf32>
    %746 = arith.mulf %707, %745 : vector<8x64xf32>
    %747 = vector.broadcast %744 : vector<1x64xf32> to vector<8x64xf32>
    %748 = arith.addf %746, %747 : vector<8x64xf32>
    %cst_321 = arith.constant 0.000000e+00 : f32
    %749 = vector.broadcast %cst_321 : f32 to vector<8x64xf32>
    %750 = arith.maximumf %748, %749 : vector<8x64xf32>
    %c0_322 = arith.constant 0 : index
    %c296 = arith.constant 296 : index
    %c0_323 = arith.constant 0 : index
    %751 = vector.load %arg4[%c0_322, %c296, %c0_323] : memref<1x520x64xf32, #tpu.memory_space<vmem>>, vector<1x64x16xf32>
    %752 = vector.shape_cast %751 : vector<1x64x16xf32> to vector<64x16xf32>
    %cst_324 = arith.constant dense<0.000000e+00> : vector<8x16xf32>
    %753 = tpu.matmul %750, %752, %cst_324 {dimension_numbers = #tpu.dot_dimension_numbers<[1], [0], [0], [1], [0, 0, 1, 1], [], []>} : vector<8x64xf32>, vector<64x16xf32>, vector<8x16xf32> -> vector<8x16xf32>
    %754 = vector.broadcast %713 : vector<1x16xf32> to vector<8x16xf32>
    %755 = arith.addf %753, %754 : vector<8x16xf32>
    %cst_325 = arith.constant dense<0.000000e+00> : vector<16xf32>
    %756 = vector.multi_reduction <add>, %755, %cst_325 [0] : vector<8x16xf32> to vector<16xf32>
    %757 = vector.shape_cast %756 : vector<16xf32> to vector<1x16xf32>
    %cst_326 = arith.constant 1.250000e-01 : f32
    %758 = vector.broadcast %cst_326 : f32 to vector<1x16xf32>
    %759 = arith.mulf %757, %758 : vector<1x16xf32>
    %760 = arith.mulf %755, %755 : vector<8x16xf32>
    %cst_327 = arith.constant dense<0.000000e+00> : vector<16xf32>
    %761 = vector.multi_reduction <add>, %760, %cst_327 [0] : vector<8x16xf32> to vector<16xf32>
    %762 = vector.shape_cast %761 : vector<16xf32> to vector<1x16xf32>
    %cst_328 = arith.constant 1.250000e-01 : f32
    %763 = vector.broadcast %cst_328 : f32 to vector<1x16xf32>
    %764 = arith.mulf %762, %763 : vector<1x16xf32>
    %765 = arith.mulf %759, %759 : vector<1x16xf32>
    %766 = arith.subf %764, %765 : vector<1x16xf32>
    %cst_329 = arith.constant 9.99999974E-6 : f32
    %767 = vector.broadcast %cst_329 : f32 to vector<1x16xf32>
    %768 = arith.addf %766, %767 : vector<1x16xf32>
    %769 = math.rsqrt %768 : vector<1x16xf32>
    %770 = arith.mulf %715, %769 : vector<1x16xf32>
    %771 = arith.mulf %759, %770 : vector<1x16xf32>
    %772 = arith.subf %717, %771 : vector<1x16xf32>
    %773 = vector.broadcast %770 : vector<1x16xf32> to vector<8x16xf32>
    %774 = arith.mulf %755, %773 : vector<8x16xf32>
    %775 = vector.broadcast %772 : vector<1x16xf32> to vector<8x16xf32>
    %776 = arith.addf %774, %775 : vector<8x16xf32>
    %cst_330 = arith.constant 0.000000e+00 : f32
    %777 = vector.broadcast %cst_330 : f32 to vector<8x16xf32>
    %778 = arith.maximumf %776, %777 : vector<8x16xf32>
    %c0_331 = arith.constant 0 : index
    %c360 = arith.constant 360 : index
    %c0_332 = arith.constant 0 : index
    %779 = vector.load %arg4[%c0_331, %c360, %c0_332] : memref<1x520x64xf32, #tpu.memory_space<vmem>>, vector<1x80x16xf32>
    %780 = vector.shape_cast %779 : vector<1x80x16xf32> to vector<80x16xf32>
    %c2_i32_333 = arith.constant 2 : i32
    %781 = tpu.dynamic_rotate %778 by %c2_i32_333 dim 0 : vector<8x16xf32>, i32 -> vector<8x16xf32>
    %782 = tpu.iota {dimensions = array<i32: 0>} : vector<8x1xi32>
    %c3_i32 = arith.constant 3 : i32
    %783 = vector.broadcast %c3_i32 : i32 to vector<8x1xi32>
    %784 = arith.andi %782, %783 : vector<8x1xi32>
    %c-2_i32_334 = arith.constant -2 : i32
    %785 = vector.broadcast %c-2_i32_334 : i32 to vector<8x1xi32>
    %786 = arith.addi %784, %785 : vector<8x1xi32>
    %c0_i32_335 = arith.constant 0 : i32
    %787 = vector.broadcast %c0_i32_335 : i32 to vector<8x1xi32>
    %788 = arith.cmpi sge, %786, %787 : vector<8x1xi32>
    %c-2_i32_336 = arith.constant -2 : i32
    %789 = vector.broadcast %c-2_i32_336 : i32 to vector<8x1xi32>
    %790 = arith.addi %784, %789 : vector<8x1xi32>
    %c4_i32 = arith.constant 4 : i32
    %791 = vector.broadcast %c4_i32 : i32 to vector<8x1xi32>
    %792 = arith.cmpi slt, %790, %791 : vector<8x1xi32>
    %793 = arith.andi %788, %792 : vector<8x1xi1>
    %cst_337 = arith.constant 1.000000e+00 : f32
    %cst_338 = arith.constant 0.000000e+00 : f32
    %794 = vector.broadcast %cst_337 : f32 to vector<8x1xf32>
    %795 = vector.broadcast %cst_338 : f32 to vector<8x1xf32>
    %796 = arith.select %793, %794, %795 : vector<8x1xi1>, vector<8x1xf32>
    %797 = vector.broadcast %796 : vector<8x1xf32> to vector<8x16xf32>
    %798 = arith.mulf %781, %797 : vector<8x16xf32>
    %c1_i32_339 = arith.constant 1 : i32
    %799 = tpu.dynamic_rotate %778 by %c1_i32_339 dim 0 : vector<8x16xf32>, i32 -> vector<8x16xf32>
    %800 = tpu.iota {dimensions = array<i32: 0>} : vector<8x1xi32>
    %c3_i32_340 = arith.constant 3 : i32
    %801 = vector.broadcast %c3_i32_340 : i32 to vector<8x1xi32>
    %802 = arith.andi %800, %801 : vector<8x1xi32>
    %c-1_i32_341 = arith.constant -1 : i32
    %803 = vector.broadcast %c-1_i32_341 : i32 to vector<8x1xi32>
    %804 = arith.addi %802, %803 : vector<8x1xi32>
    %c0_i32_342 = arith.constant 0 : i32
    %805 = vector.broadcast %c0_i32_342 : i32 to vector<8x1xi32>
    %806 = arith.cmpi sge, %804, %805 : vector<8x1xi32>
    %c-1_i32_343 = arith.constant -1 : i32
    %807 = vector.broadcast %c-1_i32_343 : i32 to vector<8x1xi32>
    %808 = arith.addi %802, %807 : vector<8x1xi32>
    %c4_i32_344 = arith.constant 4 : i32
    %809 = vector.broadcast %c4_i32_344 : i32 to vector<8x1xi32>
    %810 = arith.cmpi slt, %808, %809 : vector<8x1xi32>
    %811 = arith.andi %806, %810 : vector<8x1xi1>
    %cst_345 = arith.constant 1.000000e+00 : f32
    %cst_346 = arith.constant 0.000000e+00 : f32
    %812 = vector.broadcast %cst_345 : f32 to vector<8x1xf32>
    %813 = vector.broadcast %cst_346 : f32 to vector<8x1xf32>
    %814 = arith.select %811, %812, %813 : vector<8x1xi1>, vector<8x1xf32>
    %815 = vector.broadcast %814 : vector<8x1xf32> to vector<8x16xf32>
    %816 = arith.mulf %799, %815 : vector<8x16xf32>
    %c7_i32_347 = arith.constant 7 : i32
    %817 = tpu.dynamic_rotate %778 by %c7_i32_347 dim 0 : vector<8x16xf32>, i32 -> vector<8x16xf32>
    %818 = tpu.iota {dimensions = array<i32: 0>} : vector<8x1xi32>
    %c3_i32_348 = arith.constant 3 : i32
    %819 = vector.broadcast %c3_i32_348 : i32 to vector<8x1xi32>
    %820 = arith.andi %818, %819 : vector<8x1xi32>
    %c1_i32_349 = arith.constant 1 : i32
    %821 = vector.broadcast %c1_i32_349 : i32 to vector<8x1xi32>
    %822 = arith.addi %820, %821 : vector<8x1xi32>
    %c0_i32_350 = arith.constant 0 : i32
    %823 = vector.broadcast %c0_i32_350 : i32 to vector<8x1xi32>
    %824 = arith.cmpi sge, %822, %823 : vector<8x1xi32>
    %c1_i32_351 = arith.constant 1 : i32
    %825 = vector.broadcast %c1_i32_351 : i32 to vector<8x1xi32>
    %826 = arith.addi %820, %825 : vector<8x1xi32>
    %c4_i32_352 = arith.constant 4 : i32
    %827 = vector.broadcast %c4_i32_352 : i32 to vector<8x1xi32>
    %828 = arith.cmpi slt, %826, %827 : vector<8x1xi32>
    %829 = arith.andi %824, %828 : vector<8x1xi1>
    %cst_353 = arith.constant 1.000000e+00 : f32
    %cst_354 = arith.constant 0.000000e+00 : f32
    %830 = vector.broadcast %cst_353 : f32 to vector<8x1xf32>
    %831 = vector.broadcast %cst_354 : f32 to vector<8x1xf32>
    %832 = arith.select %829, %830, %831 : vector<8x1xi1>, vector<8x1xf32>
    %833 = vector.broadcast %832 : vector<8x1xf32> to vector<8x16xf32>
    %834 = arith.mulf %817, %833 : vector<8x16xf32>
    %c6_i32 = arith.constant 6 : i32
    %835 = tpu.dynamic_rotate %778 by %c6_i32 dim 0 : vector<8x16xf32>, i32 -> vector<8x16xf32>
    %836 = tpu.iota {dimensions = array<i32: 0>} : vector<8x1xi32>
    %c3_i32_355 = arith.constant 3 : i32
    %837 = vector.broadcast %c3_i32_355 : i32 to vector<8x1xi32>
    %838 = arith.andi %836, %837 : vector<8x1xi32>
    %c2_i32_356 = arith.constant 2 : i32
    %839 = vector.broadcast %c2_i32_356 : i32 to vector<8x1xi32>
    %840 = arith.addi %838, %839 : vector<8x1xi32>
    %c0_i32_357 = arith.constant 0 : i32
    %841 = vector.broadcast %c0_i32_357 : i32 to vector<8x1xi32>
    %842 = arith.cmpi sge, %840, %841 : vector<8x1xi32>
    %c2_i32_358 = arith.constant 2 : i32
    %843 = vector.broadcast %c2_i32_358 : i32 to vector<8x1xi32>
    %844 = arith.addi %838, %843 : vector<8x1xi32>
    %c4_i32_359 = arith.constant 4 : i32
    %845 = vector.broadcast %c4_i32_359 : i32 to vector<8x1xi32>
    %846 = arith.cmpi slt, %844, %845 : vector<8x1xi32>
    %847 = arith.andi %842, %846 : vector<8x1xi1>
    %cst_360 = arith.constant 1.000000e+00 : f32
    %cst_361 = arith.constant 0.000000e+00 : f32
    %848 = vector.broadcast %cst_360 : f32 to vector<8x1xf32>
    %849 = vector.broadcast %cst_361 : f32 to vector<8x1xf32>
    %850 = arith.select %847, %848, %849 : vector<8x1xi1>, vector<8x1xf32>
    %851 = vector.broadcast %850 : vector<8x1xf32> to vector<8x16xf32>
    %852 = arith.mulf %835, %851 : vector<8x16xf32>
    %853 = tpu.concatenate %798, %816, %778, %834, %852 in 1 : vector<8x16xf32>, vector<8x16xf32>, vector<8x16xf32>, vector<8x16xf32>, vector<8x16xf32> -> vector<8x80xf32>
    %cst_362 = arith.constant dense<0.000000e+00> : vector<8x16xf32>
    %854 = tpu.matmul %853, %780, %cst_362 {dimension_numbers = #tpu.dot_dimension_numbers<[1], [0], [0], [1], [0, 0, 1, 1], [], []>} : vector<8x80xf32>, vector<80x16xf32>, vector<8x16xf32> -> vector<8x16xf32>
    %855 = vector.broadcast %719 : vector<1x16xf32> to vector<8x16xf32>
    %856 = arith.addf %854, %855 : vector<8x16xf32>
    %cst_363 = arith.constant dense<0.000000e+00> : vector<16xf32>
    %857 = vector.multi_reduction <add>, %856, %cst_363 [0] : vector<8x16xf32> to vector<16xf32>
    %858 = vector.shape_cast %857 : vector<16xf32> to vector<1x16xf32>
    %cst_364 = arith.constant 1.250000e-01 : f32
    %859 = vector.broadcast %cst_364 : f32 to vector<1x16xf32>
    %860 = arith.mulf %858, %859 : vector<1x16xf32>
    %861 = arith.mulf %856, %856 : vector<8x16xf32>
    %cst_365 = arith.constant dense<0.000000e+00> : vector<16xf32>
    %862 = vector.multi_reduction <add>, %861, %cst_365 [0] : vector<8x16xf32> to vector<16xf32>
    %863 = vector.shape_cast %862 : vector<16xf32> to vector<1x16xf32>
    %cst_366 = arith.constant 1.250000e-01 : f32
    %864 = vector.broadcast %cst_366 : f32 to vector<1x16xf32>
    %865 = arith.mulf %863, %864 : vector<1x16xf32>
    %866 = arith.mulf %860, %860 : vector<1x16xf32>
    %867 = arith.subf %865, %866 : vector<1x16xf32>
    %cst_367 = arith.constant 9.99999974E-6 : f32
    %868 = vector.broadcast %cst_367 : f32 to vector<1x16xf32>
    %869 = arith.addf %867, %868 : vector<1x16xf32>
    %870 = math.rsqrt %869 : vector<1x16xf32>
    %871 = arith.mulf %721, %870 : vector<1x16xf32>
    %872 = arith.mulf %860, %871 : vector<1x16xf32>
    %873 = arith.subf %723, %872 : vector<1x16xf32>
    %874 = tpu.iota {dimensions = array<i32: 0>} : vector<4x8xi32>
    %875 = tpu.iota {dimensions = array<i32: 1>} : vector<4x8xi32>
    %c2_i32_368 = arith.constant 2 : i32
    %876 = vector.broadcast %c2_i32_368 : i32 to vector<4x8xi32>
    %877 = arith.muli %876, %874 : vector<4x8xi32>
    %878 = arith.cmpi eq, %875, %877 : vector<4x8xi32>
    %cst_369 = arith.constant 1.000000e+00 : f32
    %cst_370 = arith.constant 0.000000e+00 : f32
    %879 = vector.broadcast %cst_369 : f32 to vector<4x8xf32>
    %880 = vector.broadcast %cst_370 : f32 to vector<4x8xf32>
    %881 = arith.select %878, %879, %880 : vector<4x8xi1>, vector<4x8xf32>
    %882 = tpu.concatenate %856, %707 in 1 : vector<8x16xf32>, vector<8x64xf32> -> vector<8x80xf32>
    %cst_371 = arith.constant dense<0.000000e+00> : vector<4x80xf32>
    %883 = tpu.matmul %881, %882, %cst_371 {dimension_numbers = #tpu.dot_dimension_numbers<[1], [0], [0], [1], [0, 0, 1, 1], [], []>} : vector<4x8xf32>, vector<8x80xf32>, vector<4x80xf32> -> vector<4x80xf32>
    %884 = vector.extract_strided_slice %883 {offsets = [0, 0], sizes = [4, 16], strides = [1, 1]} : vector<4x80xf32> to vector<4x16xf32>
    %885 = vector.broadcast %871 : vector<1x16xf32> to vector<4x16xf32>
    %886 = arith.mulf %884, %885 : vector<4x16xf32>
    %887 = vector.broadcast %873 : vector<1x16xf32> to vector<4x16xf32>
    %888 = arith.addf %886, %887 : vector<4x16xf32>
    %cst_372 = arith.constant 0.000000e+00 : f32
    %889 = vector.broadcast %cst_372 : f32 to vector<4x16xf32>
    %890 = arith.maximumf %888, %889 : vector<4x16xf32>
    %c0_373 = arith.constant 0 : index
    %c440 = arith.constant 440 : index
    %c0_374 = arith.constant 0 : index
    %891 = vector.load %arg4[%c0_373, %c440, %c0_374] : memref<1x520x64xf32, #tpu.memory_space<vmem>>, vector<1x16x64xf32>
    %892 = vector.shape_cast %891 : vector<1x16x64xf32> to vector<16x64xf32>
    %cst_375 = arith.constant dense<0.000000e+00> : vector<4x64xf32>
    %893 = tpu.matmul %890, %892, %cst_375 {dimension_numbers = #tpu.dot_dimension_numbers<[1], [0], [0], [1], [0, 0, 1, 1], [], []>} : vector<4x16xf32>, vector<16x64xf32>, vector<4x64xf32> -> vector<4x64xf32>
    %894 = vector.broadcast %725 : vector<1x64xf32> to vector<4x64xf32>
    %895 = arith.addf %893, %894 : vector<4x64xf32>
    %896 = vector.extract_strided_slice %883 {offsets = [0, 16], sizes = [4, 64], strides = [1, 1]} : vector<4x80xf32> to vector<4x64xf32>
    %897 = arith.addf %895, %896 : vector<4x64xf32>
    %c0_376 = arith.constant 0 : index
    %c456 = arith.constant 456 : index
    %c0_377 = arith.constant 0 : index
    %898 = vector.load %arg4[%c0_376, %c456, %c0_377] : memref<1x520x64xf32, #tpu.memory_space<vmem>>, vector<1x64x64xf32>
    %899 = vector.shape_cast %898 : vector<1x64x64xf32> to vector<64x64xf32>
    %cst_378 = arith.constant dense<0.000000e+00> : vector<4x64xf32>
    %900 = tpu.matmul %897, %899, %cst_378 {dimension_numbers = #tpu.dot_dimension_numbers<[1], [0], [0], [1], [0, 0, 1, 1], [], []>} : vector<4x64xf32>, vector<64x64xf32>, vector<4x64xf32> -> vector<4x64xf32>
    %901 = vector.broadcast %727 : vector<1x64xf32> to vector<4x64xf32>
    %902 = arith.addf %900, %901 : vector<4x64xf32>
    %903 = tpu.iota {dimensions = array<i32: 0>} : vector<2x4xi32>
    %904 = tpu.iota {dimensions = array<i32: 1>} : vector<2x4xi32>
    %c2_i32_379 = arith.constant 2 : i32
    %905 = vector.broadcast %c2_i32_379 : i32 to vector<2x4xi32>
    %906 = arith.muli %903, %905 : vector<2x4xi32>
    %c0_i32_380 = arith.constant 0 : i32
    %907 = vector.broadcast %c0_i32_380 : i32 to vector<2x4xi32>
    %908 = arith.addi %906, %907 : vector<2x4xi32>
    %909 = arith.cmpi eq, %904, %908 : vector<2x4xi32>
    %cst_381 = arith.constant 1.000000e+00 : f32
    %cst_382 = arith.constant 0.000000e+00 : f32
    %910 = vector.broadcast %cst_381 : f32 to vector<2x4xf32>
    %911 = vector.broadcast %cst_382 : f32 to vector<2x4xf32>
    %912 = arith.select %909, %910, %911 : vector<2x4xi1>, vector<2x4xf32>
    %cst_383 = arith.constant dense<0.000000e+00> : vector<2x64xf32>
    %913 = tpu.matmul %912, %902, %cst_383 {dimension_numbers = #tpu.dot_dimension_numbers<[1], [0], [0], [1], [0, 0, 1, 1], [], []>} : vector<2x4xf32>, vector<4x64xf32>, vector<2x64xf32> -> vector<2x64xf32>
    %914 = tpu.iota {dimensions = array<i32: 0>} : vector<2x4xi32>
    %915 = tpu.iota {dimensions = array<i32: 1>} : vector<2x4xi32>
    %c2_i32_384 = arith.constant 2 : i32
    %916 = vector.broadcast %c2_i32_384 : i32 to vector<2x4xi32>
    %917 = arith.muli %914, %916 : vector<2x4xi32>
    %c1_i32_385 = arith.constant 1 : i32
    %918 = vector.broadcast %c1_i32_385 : i32 to vector<2x4xi32>
    %919 = arith.addi %917, %918 : vector<2x4xi32>
    %920 = arith.cmpi eq, %915, %919 : vector<2x4xi32>
    %cst_386 = arith.constant 1.000000e+00 : f32
    %cst_387 = arith.constant 0.000000e+00 : f32
    %921 = vector.broadcast %cst_386 : f32 to vector<2x4xf32>
    %922 = vector.broadcast %cst_387 : f32 to vector<2x4xf32>
    %923 = arith.select %920, %921, %922 : vector<2x4xi1>, vector<2x4xf32>
    %cst_388 = arith.constant dense<0.000000e+00> : vector<2x64xf32>
    %924 = tpu.matmul %923, %902, %cst_388 {dimension_numbers = #tpu.dot_dimension_numbers<[1], [0], [0], [1], [0, 0, 1, 1], [], []>} : vector<2x4xf32>, vector<4x64xf32>, vector<2x64xf32> -> vector<2x64xf32>
    %925 = arith.maximumf %913, %924 : vector<2x64xf32>
    %c0_389 = arith.constant 0 : index
    %c0_390 = arith.constant 0 : index
    %c0_391 = arith.constant 0 : index
    %926 = vector.load %arg2[%c0_389, %c0_390, %c0_391] : memref<1x64x32xf32, #tpu.memory_space<vmem>>, vector<1x64x32xf32>
    %927 = vector.shape_cast %926 : vector<1x64x32xf32> to vector<64x32xf32>
    %cst_392 = arith.constant dense<0.000000e+00> : vector<2x32xf32>
    %928 = tpu.matmul %925, %927, %cst_392 {dimension_numbers = #tpu.dot_dimension_numbers<[1], [0], [0], [1], [0, 0, 1, 1], [], []>} : vector<2x64xf32>, vector<64x32xf32>, vector<2x32xf32> -> vector<2x32xf32>
    %c0_393 = arith.constant 0 : index
    %c0_394 = arith.constant 0 : index
    %c0_395 = arith.constant 0 : index
    %929 = vector.load %arg5[%c0_393, %c0_394, %c0_395] : memref<1x2x32xf32, #tpu.memory_space<vmem>>, vector<1x2x32xf32>
    %930 = vector.shape_cast %929 : vector<1x2x32xf32> to vector<2x32xf32>
    %931 = vector.shape_cast %928 : vector<2x32xf32> to vector<1x2x32xf32>
    tpu.vector_store %arg5[%c0_393, %c0_394, %c0_395], %931 {strides = array<i32>} : memref<1x2x32xf32, #tpu.memory_space<vmem>>, vector<1x2x32xf32>,
    return
  }
  func.func @transform_0(%arg0: i32) -> (i32, i32) {
    %c0_i32 = arith.constant 0 : i32
    %c0_i32_0 = arith.constant 0 : i32
    %c0_i32_1 = arith.constant 0 : i32
    return %c0_i32, %c0_i32_0 : i32, i32
  }
  func.func @transform_1(%arg0: i32) -> (i32, i32, i32) {
    %c0_i32 = arith.constant 0 : i32
    %c0_i32_0 = arith.constant 0 : i32
    %c0_i32_1 = arith.constant 0 : i32
    return %arg0, %c0_i32, %c0_i32_0 : i32, i32, i32
  }
  func.func @transform_2(%arg0: i32) -> (i32, i32, i32) {
    %c0_i32 = arith.constant 0 : i32
    %c0_i32_0 = arith.constant 0 : i32
    %c0_i32_1 = arith.constant 0 : i32
    return %arg0, %c0_i32, %c0_i32_0 : i32, i32, i32
  }
  func.func @transform_3(%arg0: i32) -> (i32, i32, i32) {
    %c0_i32 = arith.constant 0 : i32
    %c0_i32_0 = arith.constant 0 : i32
    %c0_i32_1 = arith.constant 0 : i32
    return %arg0, %c0_i32, %c0_i32_0 : i32, i32, i32
  }
  func.func @transform_4(%arg0: i32) -> (i32, i32, i32) {
    %c0_i32 = arith.constant 0 : i32
    %c0_i32_0 = arith.constant 0 : i32
    %c0_i32_1 = arith.constant 0 : i32
    return %arg0, %c0_i32, %c0_i32_0 : i32, i32, i32
  }
}

</mosaic_0001>

<bundles_post_ra>
// kernel: forward.1
= control target key start
LH: loop header
LB: loop body
LE: loop exit
PB: predicated region body
PF: predicated region fallthrough
CT: control target
= control target key end

     0   :  { %s6500_s15 = smov 0   ;;  %s8399_s0 = inlined_call_operand.vmem [shape: f32[128,16], index: 0, kind: input, shape index: {}]   ;;  %s8400_s1 = inlined_call_operand.vmem [shape: f32[2,64,32], index: 1, kind: input, shape index: {}]   ;;  %s8401_s2 = inlined_call_operand.vmem [shape: f32[2,43,64], index: 2, kind: input, shape index: {}]   ;;  %s8402_s3 = inlined_call_operand.vmem [shape: f32[2,520,64], index: 3, kind: input, shape index: {}]   ;;  %s8403_s4 = inlined_call_operand.vmem [shape: f32[2,2,32], index: 4, kind: output, shape index: {}]  }
   0x1 LB: > { %s5525_s16 = sadd.s32 4294967295, %s6454_s15   ;;  %p5529_p0 = scmp.ge.s32.totalorder %s6454_s15, 1  ;;  %s6454_s15 = sphi %s6500_s15, %s14_s15  }
   0x2   : > { %p182_p1 = scmp.lt.s32.totalorder %s6454_s15, 3 }
   0x4   : > { %p183_p2 = pnand %p5529_p0, %p182_p1 }
   0x6   : > { %186 = sbr.rel (%p183_p2) target bundleno = 6756 (0x1a64), region = 36 }
   0xd   : > { %v6511_v0 = vld [vmem:[%s8399_s0 + $0x10] sm:$0xff]  ;;  %vm252_vm0 = vcmask 130048   ;;  %v6516_v1 = vld [vmem:[%s8399_s0] sm:$0xff]  ;;  %v6521_v2 = vld [vmem:[%s8399_s0 + $0x8] sm:$0xff]  ;;  %p217_p3 = scmp.lt.s32.totalorder %s5525_s16, 1  ;;  %s6456_s5 = smov 32  }
   0xe   : > { %v259_v3 = vsel %vm252_vm0, %v6511_v0, 0.0  ;;  %v253_v4 = vsel %vm252_vm0, %v6516_v1, 0.0  ;;  %v322_v5 = vmul.f32 %v6516_v1, %v6516_v1  ;;  %v256_v7 = vsel %vm252_vm0, %v6521_v2, 0.0  ;;  %v6537_v9 = vld [vmem:[%s8399_s0 + $0x18] sm:$0xff]  ;;  %v6547_v13 = vld [vmem:[%s8399_s0 + $0x20] sm:$0xff]  ;;  %v6557_v17 = vld [vmem:[%s8399_s0 + $0x28] sm:$0xff] }
   0xf   : > { %260 = vadd.xlane.f32.xlu1 %v259_v3  ;;  %254 = vadd.xlane.f32.xlu0 %v253_v4  ;;  %v323_v8 = vmul.f32 %v6521_v2, %v6521_v2  ;;  %v262_v10 = vsel %vm252_vm0, %v6537_v9, 0.0  ;;  %v324_v12 = vmul.f32 %v6511_v0, %v6511_v0  ;;  %v265_v14 = vsel %vm252_vm0, %v6547_v13, 0.0  ;;  %v6567_v21 = vld [vmem:[%s8399_s0 + $0x30] sm:$0xff]  ;;  %v6577_v25 = vld [vmem:[%s8399_s0 + $0x38] sm:$0xff]  ;;  %v6587_v29 = vld [vmem:[%s8399_s0 + $0x40] sm:$0xff]  ;;  %s8462_s16 = smov (!%p217_p3, %s5525_s16), 1 }
  0x10   : > { %v338_v6 = vsel %vm252_vm0, %v322_v5, 0.0  ;;  %v325_v16 = vmul.f32 %v6537_v9, %v6537_v9  ;;  %v268_v18 = vsel %vm252_vm0, %v6557_v17, 0.0  ;;  %v326_v20 = vmul.f32 %v6547_v13, %v6547_v13  ;;  %v6597_v33 = vld [vmem:[%s8399_s0 + $0x48] sm:$0xff]  ;;  %v6607_v37 = vld [vmem:[%s8399_s0 + $0x50] sm:$0xff]  ;;  %v6617_v41 = vld [vmem:[%s8399_s0 + $0x58] sm:$0xff]  ;;  %s6354_s25 = smul.u32 48, %s8462_s16 }
  0x11   : > { %v341_v11 = vsel %vm252_vm0, %v323_v8, 0.0  ;;  %v344_v15 = vsel %vm252_vm0, %v324_v12, 0.0  ;;  %v271_v22 = vsel %vm252_vm0, %v6567_v21, 0.0  ;;  %v327_v24 = vmul.f32 %v6557_v17, %v6557_v17  ;;  %v6627_v45 = vld [vmem:[%s8399_s0 + $0x60] sm:$0xff]  ;;  %v6637_v49 = vld [vmem:[%s8399_s0 + $0x68] sm:$0xff]  ;;  %v6647_v53 = vld [vmem:[%s8399_s0 + $0x70] sm:$0xff] }
  0x12   : > { %v347_v19 = vsel %vm252_vm0, %v325_v16, 0.0  ;;  %v350_v23 = vsel %vm252_vm0, %v326_v20, 0.0  ;;  %v274_v26 = vsel %vm252_vm0, %v6577_v25, 0.0  ;;  %v328_v28 = vmul.f32 %v6567_v21, %v6567_v21  ;;  %v6657_v57 = vld [vmem:[%s8399_s0 + $0x78] sm:$0xff]  ;;  %s6678_s28 = scalar_lea.vmem %s8401_s2, %s6354_s25  ;;  %s6457_s6 = smov 48  }
  0x13   : > { %339 = vadd.xlane.f32.xlu1 %v338_v6  ;;  %257 = vadd.xlane.f32.xlu0 %v256_v7  ;;  %v353_v27 = vsel %vm252_vm0, %v327_v24, 0.0  ;;  %v277_v30 = vsel %vm252_vm0, %v6587_v29, 0.0  ;;  %v329_v32 = vmul.f32 %v6577_v25, %v6577_v25  ;;  %v280_v34 = vsel %vm252_vm0, %v6597_v33, 0.0  ;;  %s6458_s7 = smov 64   ;;  %s6460_s8 = smov 16  }
  0x14   : > { %v356_v31 = vsel %vm252_vm0, %v328_v28, 0.0  ;;  %v330_v36 = vmul.f32 %v6587_v29, %v6587_v29  ;;  %v283_v38 = vsel %vm252_vm0, %v6607_v37, 0.0  ;;  %v331_v40 = vmul.f32 %v6597_v33, %v6597_v33  ;;  %s6355_s9 = smul.u32 520, %s8462_s16  ;;  %s6462_s13 = smov 4  }
  0x15   : > { %v359_v35 = vsel %vm252_vm0, %v329_v32, 0.0  ;;  %v286_v42 = vsel %vm252_vm0, %v6617_v41, 0.0  ;;  %v332_v44 = vmul.f32 %v6607_v37, %v6607_v37  ;;  %v289_v46 = vsel %vm252_vm0, %v6627_v45, 0.0  ;;  %s6463_s14 = smov 6   ;;  %s6464_s17 = smov 2  }
  0x16   : > { %v362_v39 = vsel %vm252_vm0, %v330_v36, 0.0  ;;  %v365_v43 = vsel %vm252_vm0, %v331_v40, 0.0  ;;  %v333_v48 = vmul.f32 %v6617_v41, %v6617_v41  ;;  %v292_v50 = vsel %vm252_vm0, %v6637_v49, 0.0  ;;  %s6925_s12 = scalar_lea.vmem %s8402_s3, %s6355_s9  ;;  %s6465_s18 = smov 8  }
  0x17   : > { %263 = vadd.xlane.f32.xlu1 %v262_v10  ;;  %342 = vadd.xlane.f32.xlu0 %v341_v11  ;;  %v368_v47 = vsel %vm252_vm0, %v332_v44, 0.0  ;;  %v334_v52 = vmul.f32 %v6627_v45, %v6627_v45  ;;  %v295_v54 = vsel %vm252_vm0, %v6647_v53, 0.0  ;;  %v335_v56 = vmul.f32 %v6637_v49, %v6637_v49  ;;  %s6467_s19 = smov 126   ;;  %s6468_s20 = smov 12  }
  0x18   : > { %v371_v51 = vsel %vm252_vm0, %v333_v48, 0.0  ;;  %v298_v58 = vsel %vm252_vm0, %v6657_v57, 0.0  ;;  %v336_v60 = vmul.f32 %v6647_v53, %v6647_v53  ;;  %v337_v61 = vmul.f32 %v6657_v57, %v6657_v57  ;;  %s6469_s21 = smov 124   ;;  %s6470_s22 = smov 24  }
  0x19   : > { %v374_v55 = vsel %vm252_vm0, %v334_v52, 0.0  ;;  %v377_v59 = vsel %vm252_vm0, %v335_v56, 0.0  ;;  %vm1290_vm13 = vcmask 261120   ;;  %vm8417_vm14 = vcmask 392192   ;;  %s6473_s23 = smov 120   ;;  %s6474_s24 = smov 112  }
  0x1a   : > { %v380_v62 = vsel %vm252_vm0, %v336_v60, 0.0  ;;  %v383_v63 = vsel %vm252_vm0, %v337_v61, 0.0  ;;  %vm1324_vm15 = vcmask 523264   ;;  %s5641_s25 = sshll.u32 %s8462_s16, 6 }
  0x1b   : > { %266 = vadd.xlane.f32.xlu1 %v265_v14  ;;  %345 = vadd.xlane.f32.xlu0 %v344_v15 }
  0x1f   : > { %269 = vadd.xlane.f32.xlu1 %v268_v18  ;;  %348 = vadd.xlane.f32.xlu0 %v347_v19 }
  0x23   : > { %272 = vadd.xlane.f32.xlu1 %v271_v22  ;;  %351 = vadd.xlane.f32.xlu0 %v350_v23 }
  0x27   : > { %275 = vadd.xlane.f32.xlu1 %v274_v26  ;;  %354 = vadd.xlane.f32.xlu0 %v353_v27 }
  0x2b   : > { %278 = vadd.xlane.f32.xlu1 %v277_v30  ;;  %357 = vadd.xlane.f32.xlu0 %v356_v31 }
  0x2f   : > { %281 = vadd.xlane.f32.xlu1 %v280_v34  ;;  %360 = vadd.xlane.f32.xlu0 %v359_v35 }
  0x33   : > { %284 = vadd.xlane.f32.xlu1 %v283_v38  ;;  %363 = vadd.xlane.f32.xlu0 %v362_v39 }
  0x37   : > { %287 = vadd.xlane.f32.xlu1 %v286_v42  ;;  %366 = vadd.xlane.f32.xlu0 %v365_v43 }
  0x3b   : > { %290 = vadd.xlane.f32.xlu1 %v289_v46  ;;  %369 = vadd.xlane.f32.xlu0 %v368_v47 }
  0x3f   : > { %293 = vadd.xlane.f32.xlu1 %v292_v50  ;;  %372 = vadd.xlane.f32.xlu0 %v371_v51 }
  0x43   : > { %296 = vadd.xlane.f32.xlu1 %v295_v54  ;;  %375 = vadd.xlane.f32.xlu0 %v374_v55 }
  0x47   : > { %299 = vadd.xlane.f32.xlu1 %v298_v58  ;;  %378 = vadd.xlane.f32.xlu0 %v377_v59 }
  0x4b   : > { %381 = vadd.xlane.f32.xlu0 %v380_v62  ;;  %384 = vadd.xlane.f32.xlu1 %v383_v63 }
  0x9c   : > { %v261_v3 = vpop.xlane.xlu1 %260  ;;  %v255_v4 = vpop.xlane.xlu0 %254 }
  0xa0   : > { %v340_v5 = vpop.xlane.xlu1 %339  ;;  %v258_v6 = vpop.xlane.xlu0 %257 }
  0xa1   : > { %v301_v20 = vadd.f32 %v258_v6, %v255_v4 }
  0xa3   : > { %v302_v24 = vadd.f32 %v301_v20, %v261_v3 }
  0xa4   : > { %v264_v7 = vpop.xlane.xlu1 %263  ;;  %v343_v8 = vpop.xlane.xlu0 %342 }
  0xa5   : > { %v303_v28 = vadd.f32 %v302_v24, %v264_v7  ;;  %v386_v30 = vadd.f32 %v343_v8, %v340_v5 }
  0xa8   : > { %v267_v10 = vpop.xlane.xlu1 %266  ;;  %v346_v11 = vpop.xlane.xlu0 %345 }
  0xa9   : > { %v304_v31 = vadd.f32 %v303_v28, %v267_v10  ;;  %v387_v35 = vadd.f32 %v386_v30, %v346_v11 }
  0xac   : > { %v270_v12 = vpop.xlane.xlu1 %269  ;;  %v349_v14 = vpop.xlane.xlu0 %348 }
  0xad   : > { %v305_v36 = vadd.f32 %v304_v31, %v270_v12  ;;  %v388_v38 = vadd.f32 %v387_v35, %v349_v14 }
  0xb0   : > { %v273_v15 = vpop.xlane.xlu1 %272  ;;  %v352_v16 = vpop.xlane.xlu0 %351 }
  0xb1   : > { %v306_v39 = vadd.f32 %v305_v36, %v273_v15  ;;  %v389_v43 = vadd.f32 %v388_v38, %v352_v16 }
  0xb4   : > { %v276_v18 = vpop.xlane.xlu1 %275  ;;  %v355_v19 = vpop.xlane.xlu0 %354 }
  0xb5   : > { %v307_v44 = vadd.f32 %v306_v39, %v276_v18  ;;  %v390_v46 = vadd.f32 %v389_v43, %v355_v19  ;;  %v408_v43 = vld [vmem:[%s6678_s28] sm:$0x1] }
  0xb8   : > { %v279_v22 = vpop.xlane.xlu1 %278  ;;  %v358_v23 = vpop.xlane.xlu0 %357 }
  0xb9   : > { %v308_v47 = vadd.f32 %v307_v44, %v279_v22  ;;  %v391_v51 = vadd.f32 %v390_v46, %v358_v23 }
  0xbc   : > { %v282_v26 = vpop.xlane.xlu1 %281  ;;  %v361_v27 = vpop.xlane.xlu0 %360 }
  0xbd   : > { %v309_v52 = vadd.f32 %v308_v47, %v282_v26  ;;  %v392_v54 = vadd.f32 %v391_v51, %v361_v27  ;;  %v435_v47 = vld [vmem:[%s6678_s28 + $0x1] sm:$0x1] }
  0xc0   : > { %v285_v32 = vpop.xlane.xlu1 %284  ;;  %v364_v34 = vpop.xlane.xlu0 %363 }
  0xc1   : > { %v310_v55 = vadd.f32 %v309_v52, %v285_v32  ;;  %v393_v59 = vadd.f32 %v392_v54, %v364_v34 }
  0xc4   : > { %v288_v40 = vpop.xlane.xlu1 %287  ;;  %v367_v42 = vpop.xlane.xlu0 %366 }
  0xc5   : > { %v311_v60 = vadd.f32 %v310_v55, %v288_v40  ;;  %v394_v61 = vadd.f32 %v393_v59, %v367_v42 }
  0xc8   : > { %v291_v48 = vpop.xlane.xlu1 %290  ;;  %v370_v50 = vpop.xlane.xlu0 %369 }
  0xc9   : > { %v312_v62 = vadd.f32 %v311_v60, %v291_v48  ;;  %v395_v4 = vadd.f32 %v394_v61, %v370_v50 }
  0xcc   : > { %v294_v56 = vpop.xlane.xlu1 %293  ;;  %v373_v58 = vpop.xlane.xlu0 %372 }
  0xcd   : > { %v313_v5 = vadd.f32 %v312_v62, %v294_v56  ;;  %v396_v6 = vadd.f32 %v395_v4, %v373_v58 }
  0xd0   : > { %v297_v63 = vpop.xlane.xlu1 %296  ;;  %v376_v3 = vpop.xlane.xlu0 %375 }
  0xd1   : > { %v314_v7 = vadd.f32 %v313_v5, %v297_v63  ;;  %v397_v11 = vadd.f32 %v396_v6, %v376_v3 }
  0xd4   : > { %v300_v8 = vpop.xlane.xlu1 %299  ;;  %v379_v10 = vpop.xlane.xlu0 %378 }
  0xd5   : > { %v315_v12 = vadd.f32 %v314_v7, %v300_v8  ;;  %v398_v15 = vadd.f32 %v397_v11, %v379_v10 }
  0xd7   : > { %v316_v14 = vrot.slane %v315_v12, 4 }
  0xd8   : > { %v382_v16 = vpop.xlane.xlu0 %381  ;;  %v385_v18 = vpop.xlane.xlu1 %384 }
  0xd9   : > { %v317_v19 = vadd.f32 %v316_v14, %v315_v12  ;;  %v399_v20 = vadd.f32 %v398_v15, %v382_v16 }
  0xdb   : > { %v318_v22 = vrot.slane %v317_v19, 2  ;;  %v400_v23 = vadd.f32 %v399_v20, %v385_v18 }
  0xdd   : > { %v319_v24 = vadd.f32 %v318_v22, %v317_v19  ;;  %v401_v26 = vrot.slane %v400_v23, 4 }
  0xdf   : > { %v320_v27 = vrot.slane %v319_v24, 1  ;;  %v402_v28 = vadd.f32 %v401_v26, %v400_v23 }
  0xe1   : > { %v321_v30 = vadd.f32 %v320_v27, %v319_v24  ;;  %v403_v31 = vrot.slane %v402_v28, 2 }
  0xe3   : > { %v404_v32 = vadd.f32 %v403_v31, %v402_v28  ;;  %v407_v34 = vmul.f32 0.00048828125, %v321_v30 }
  0xe5   : > { %v405_v35 = vrot.slane %v404_v32, 1  ;;  %v410_v38 = vmul.f32 %v407_v34, %v407_v34 }
  0xe7   : > { %v406_v36 = vadd.f32 %v405_v35, %v404_v32 }
  0xe9   : > { %v409_v39 = vmul.f32 0.00048828125, %v406_v36  ;;  %v8404_v36 = vmov 0.0  }
  0xeb   : > { %v411_v40 = vsub.f32 %v409_v39, %v410_v38 }
  0xed   : > { %v412_v42 = vadd.f32 1e-05, %v411_v40 }
  0xef   : > { %6422 = vrsqrt.f32 %v412_v42 }
  0xf9   : > { %v6423_v44 = vpop.eup %6422 }
  0xfa   : > { %v414_v46 = vmul.f32 %v6423_v44, %v408_v43 }
  0xfc   : > { %6356 = vpush %v414_v46  ;;  %v436_v48 = vmul.f32 %v414_v46, %v407_v34 }
  0xfe   : > { %v437_v50 = vsub.f32 %v435_v47, %v436_v48 }
 0x100   : > { %6358 = vpush %v437_v50 }
 0x12d   : > { %s6357_s29 = spop %6356 }
 0x12e   : > { %v417_v51 = vstv %s6357_s29  ;;  %s221_s29 = scalar_lea.vmem %s8400_s1, %s5641_s25 }
 0x12f   : > { %v421_v52 = vmul.f32 %v417_v51, %v6511_v0  ;;  %v419_v54 = vmul.f32 %v417_v51, %v6516_v1  ;;  %v423_v59 = vmul.f32 %v417_v51, %v6547_v13  ;;  %v420_v60 = vmul.f32 %v417_v51, %v6521_v2 }
 0x130   : > { %v8406_v1 = vlaneseq  ;;  %v425_v62 = vmul.f32 %v417_v51, %v6567_v21  ;;  %v422_v63 = vmul.f32 %v417_v51, %v6537_v9  ;;  %v427_v4 = vmul.f32 %v417_v51, %v6587_v29 }
 0x131   : > { %s6359_s30 = spop %6358  ;;  %v424_v5 = vmul.f32 %v417_v51, %v6557_v17  ;;  %v429_v7 = vmul.f32 %v417_v51, %v6607_v37  ;;  %v426_v8 = vmul.f32 %v417_v51, %v6577_v25  ;;  %v431_v14 = vmul.f32 %v417_v51, %v6627_v45 }
 0x132   : > { %v440_v55 = vstv %s6359_s30  ;;  %v6709_v2 = vshrl.u32 %v8406_v1, 7  ;;  %v428_v25 = vmul.f32 %v417_v51, %v6597_v33  ;;  %v434_v37 = vmul.f32 %v417_v51, %v6657_v57 }
 0x133   : > { %v6684_v56 = vadd.f32 %v440_v55, %v421_v52  ;;  %v6686_v58 = vadd.f32 %v440_v55, %v419_v54  ;;  %v6694_v61 = vadd.f32 %v440_v55, %v423_v59  ;;  %v6696_v0 = vadd.f32 %v440_v55, %v420_v60 }
 0x134   : > { %v6704_v3 = vadd.f32 %v440_v55, %v425_v62  ;;  %v6706_v13 = vadd.f32 %v440_v55, %v422_v63  ;;  %8420 = vst [vmem:[#allocation2_spill] sm:$0xff] %v6709_v2  ;;  %v6717_v21 = vadd.f32 %v440_v55, %v427_v4  ;;  %v6719_v9 = vadd.f32 %v440_v55, %v424_v5 }
 0x135   : > { %1102 = vrot.lane.b32.xlu0 %v6684_v56, %s6456_s5  ;;  %1098 = vrot.lane.b32.xlu1 %v6686_v58, %s6456_s5  ;;  %v6722_v6 = vadd.s32 64, %v6709_v2  ;;  %v6730_v29 = vadd.f32 %v440_v55, %v429_v7  ;;  %v6732_v17 = vadd.f32 %v440_v55, %v426_v8  ;;  %v760_v11 = vrot.slane %v6686_v58, 1 }
 0x136   : > { %v761_v12 = vrot.slane %v6696_v0, 1  ;;  %vm776_vm1 = vcmp.lt.s32.totalorder %v6709_v2, 7  ;;  %v432_v15 = vmul.f32 %v417_v51, %v6637_v49  ;;  %v6746_v16 = vadd.f32 %v440_v55, %v431_v14 }
 0x137   : > { %v527_v10 = vand.u32 63, %v6722_v6  ;;  %v519_v18 = vand.u32 63, %v6709_v2  ;;  %v6749_v19 = vadd.f32 %v440_v55, %v428_v25  ;;  %v6751_v45 = vadd.f32 %v440_v55, %v434_v37 }
 0x138   : > { %v6753_v20 = vadd.f32 %v440_v55, %v432_v15  ;;  %v791_v33 = vsel %vm776_vm1, %v760_v11, %v761_v12  ;;  %v889_v49 = vrot.slane %v6686_v58, 2  ;;  %v890_v57 = vrot.slane %v6696_v0, 2 }
 0x139   : > { %1106 = vrot.lane.b32.xlu0 %v6694_v61, %s6456_s5  ;;  %1100 = vrot.lane.b32.xlu1 %v6696_v0, %s6456_s5  ;;  %8421 = vst [vmem:[#allocation3_spill] sm:$0xff] %v6751_v45  ;;  %v543_v22 = vadd.s32 4294967294, %v527_v10  ;;  %v433_v23 = vmul.f32 %v417_v51, %v6647_v53  ;;  %v430_v24 = vmul.f32 %v417_v51, %v6617_v41  ;;  %vm8419_vm2 = vcmp.lt.s32.totalorder %v6709_v2, 6 }
 0x13a   : > { %v535_v28 = vadd.s32 4294967294, %v519_v18  ;;  %v920_v53 = vsel %vm8419_vm2, %v889_v49, %v890_v57  ;;  %v891_v30 = vrot.slane %v6684_v56, 2  ;;  %v631_v31 = vrot.slane %v6686_v58, 7 }
 0x13b   : > { %v6769_v26 = vadd.f32 %v440_v55, %v433_v23  ;;  %v6771_v27 = vadd.f32 %v440_v55, %v430_v24  ;;  %vm559_vm3 = vcmp.ge.s32.totalorder %v543_v22, 0  ;;  %v632_v41 = vrot.slane %v6696_v0, 7 }
 0x13c   : > { %vm647_vm4 = vcmp.lt.s32.totalorder %v6709_v2, 1  ;;  %v762_v32 = vrot.slane %v6684_v56, 1  ;;  %v763_v34 = vrot.slane %v6706_v13, 1  ;;  %v470_v35 = vrot.slane %v6696_v0, 6 }
 0x13d   : > { %1110 = vrot.lane.b32.xlu0 %v6704_v3, %s6456_s5  ;;  %1104 = vrot.lane.b32.xlu1 %v6706_v13, %s6456_s5  ;;  %8422 = vst [vmem:[#allocation4_spill] sm:$0xff] %v6769_v26  ;;  %8423 = vst [vmem:[#allocation5_spill] sm:$0xff] %v6771_v27  ;;  %vm487_vm5 = vcmp.lt.s32.totalorder %v6709_v2, 2  ;;  %vm551_vm6 = vcmp.ge.s32.totalorder %v535_v28, 0  ;;  %v607_v38 = vsel %vm559_vm3, 1.0, %v8404_v36  ;;  %v919_v39 = vsel %vm8419_vm2, %v890_v57, %v891_v30 }
 0x13e   : > { %v662_v40 = vsel %vm647_vm4, %v631_v31, %v632_v41  ;;  %v892_v42 = vrot.slane %v6706_v13, 2  ;;  %v469_v43 = vrot.slane %v6686_v58, 6  ;;  %v789_v44 = vsel %vm776_vm1, %v762_v32, %v763_v34 }
 0x13f   : > { %v790_v46 = vsel %vm776_vm1, %v761_v12, %v762_v32  ;;  %v633_v47 = vrot.slane %v6684_v56, 7  ;;  %v471_v48 = vrot.slane %v6684_v56, 6  ;;  %v472_v51 = vrot.slane %v6706_v13, 6 }
 0x140   : > { %v6809_v50 = vsel %vm487_vm5, %v469_v43, %v470_v35  ;;  %v473_v52 = vrot.slane %v6694_v61, 6  ;;  %v474_v54 = vrot.slane %v6719_v9, 6  ;;  %v475_v59 = vrot.slane %v6704_v3, 6 }
 0x141   : > { %1114 = vrot.lane.b32.xlu0 %v6717_v21, %s6456_s5  ;;  %1108 = vrot.lane.b32.xlu1 %v6719_v9, %s6456_s5  ;;  %v6816_v55 = vsel %vm487_vm5, %v470_v35, %v471_v48  ;;  %v476_v60 = vrot.slane %v6732_v17, 6  ;;  %v477_v56 = vrot.slane %v6717_v21, 6  ;;  %v6823_v0 = vsel %vm487_vm5, %v471_v48, %v472_v51 }
 0x142   : > { %v6827_v62 = vsel %vm487_vm5, %v472_v51, %v473_v52  ;;  %v6831_v63 = vsel %vm487_vm5, %v473_v52, %v474_v54  ;;  %v478_v4 = vrot.slane %v6749_v19, 6  ;;  %v6838_v5 = vsel %vm487_vm5, %v474_v54, %v475_v59 }
 0x143   : > { %v6842_v7 = vsel %vm487_vm5, %v475_v59, %v476_v60  ;;  %v479_v8 = vrot.slane %v6730_v29, 6  ;;  %v8408_v12 = vrot.slane %v6771_v27, 6  ;;  %v918_v14 = vsel %vm8419_vm2, %v891_v30, %v892_v42 }
 0x144   : > { %v6850_v25 = vsel %vm487_vm5, %v477_v56, %v478_v4  ;;  %v8407_v37 = vrot.slane %v6751_v45, 6  ;;  %v599_v15 = vsel %vm551_vm6, 1.0, %v8404_v36  ;;  %v893_v22 = vrot.slane %v6694_v61, 2 }
 0x145   : > { %1118 = vrot.lane.b32.xlu0 %v6730_v29, %s6456_s5  ;;  %1112 = vrot.lane.b32.xlu1 %v6732_v17, %s6456_s5  ;;  %v6864_v57 = vsel %vm487_vm5, %v479_v8, %v8408_v12  ;;  %v495_v23 = vsel %vm487_vm5, %v476_v60, %v477_v56  ;;  %v661_v24 = vsel %vm647_vm4, %v632_v41, %v633_v47  ;;  %v634_v28 = vrot.slane %v6706_v13, 7 }
 0x146   : > { %v6875_v30 = vmul.f32 %v607_v38, %v495_v23  ;;  %v917_v35 = vsel %vm8419_vm2, %v892_v42, %v893_v22  ;;  %v764_v13 = vrot.slane %v6694_v61, 1  ;;  %v894_v42 = vrot.slane %v6719_v9, 2 }
 0x147   : > { %v660_v41 = vsel %vm647_vm4, %v633_v47, %v634_v28  ;;  %v895_v47 = vrot.slane %v6704_v3, 2  ;;  %v636_v48 = vrot.slane %v6719_v9, 7  ;;  %v766_v51 = vrot.slane %v6704_v3, 1 }
 0x148   : > { %v767_v52 = vrot.slane %v6732_v17, 1  ;;  %v896_v59 = vrot.slane %v6732_v17, 2  ;;  %v637_v60 = vrot.slane %v6704_v3, 7  ;;  %v768_v56 = vrot.slane %v6717_v21, 1 }
 0x149   : > { %1116 = vrot.lane.b32.xlu1 %v6749_v19, %s6456_s5  ;;  %1162 = vrot.lane.b32.xlu0 %v791_v33, %s6457_s6  ;;  %v6858_v33 = vsel %vm487_vm5, %v478_v4, %v479_v8  ;;  %v769_v8 = vrot.slane %v6749_v19, 1  ;;  %v518_v6 = vadd.s32 120, %v6709_v2  ;;  %vm8416_vm3 = vcmask 654336  }
 0x14a   : > { %v914_v4 = vsel %vm8419_vm2, %v895_v47, %v896_v59  ;;  %v657_v3 = vsel %vm647_vm4, %v636_v48, %v637_v60 }
 0x14d   : > { %1120 = vrot.lane.b32.xlu1 %v6771_v27, %s6456_s5  ;;  %1226 = vrot.lane.b32.xlu0 %v920_v53, %s6458_s7  ;;  %v503_v53 = vsel %vm487_vm5, %v8407_v37, %v469_v43  ;;  %v635_v43 = vrot.slane %v6694_v61, 7  ;;  %v915_v61 = vsel %vm8419_vm2, %v894_v42, %v895_v47  ;;  %v463_v47 = vld [vmem:[%s6925_s12 + $0x28] sm:$0xff] }
 0x14e   : > { %v6879_v32 = vmul.f32 %v599_v15, %v503_v53  ;;  %v458_v15 = vld [vmem:[%s6925_s12] sm:$0xff]  ;;  %v783_v53 = vsel %vm776_vm1, %v768_v56, %v769_v8 }
 0x151   : > { %1228 = vrot.lane.b32.xlu0 %v919_v39, %s6458_s7  ;;  %1036 = vrot.lane.b32.xlu1 %v662_v40, %s6460_s8  ;;  %v765_v39 = vrot.slane %v6719_v9, 1  ;;  %v788_v40 = vsel %vm776_vm1, %v763_v34, %v764_v13  ;;  %v658_v34 = vsel %vm647_vm4, %v635_v43, %v636_v48  ;;  %v785_v9 = vsel %vm776_vm1, %v766_v51, %v767_v52 }
 0x153   : > { %v787_v38 = vsel %vm776_vm1, %v764_v13, %v765_v39  ;;  %v786_v54 = vsel %vm776_vm1, %v765_v39, %v766_v51  ;;  %v640_v13 = vrot.slane %v6749_v19, 7  ;;  %v460_v39 = vld [vmem:[%s6925_s12 + $0x10] sm:$0xff]  ;;  %v771_v51 = vrot.slane %v6771_v27, 1 }
 0x155   : > { %1166 = vrot.lane.b32.xlu0 %v789_v44, %s6457_s6  ;;  %1164 = vrot.lane.b32.xlu1 %v790_v46, %s6457_s6  ;;  %v916_v44 = vsel %vm8419_vm2, %v893_v22, %v894_v42  ;;  %v659_v46 = vsel %vm647_vm4, %v634_v28, %v635_v43  ;;  %v459_v22 = vld [vmem:[%s6925_s12 + $0x8] sm:$0xff]  ;;  %v898_v28 = vrot.slane %v6749_v19, 2  ;;  %v899_v19 = vrot.slane %v6730_v29, 2 }
 0x156   : > { %v6179_v23 = vpack.c.bf16 %v459_v22, %v458_v15  ;;  %v664_v15 = vadd.s32 4294967295, %v519_v18  ;;  %v642_v22 = vrot.slane %v6771_v27, 7 }
 0x158   : > { %6180 = vmatprep.subr.bf16.mxu0 %v6179_v23  ;;  %vm680_vm7 = vcmp.ge.s32.totalorder %v664_v15, 0 }
 0x159   : > { %1230 = vrot.lane.b32.xlu0 %v918_v14, %s6458_s7  ;;  %1038 = vrot.lane.b32.xlu1 %v661_v24, %s6460_s8  ;;  %v638_v14 = vrot.slane %v6732_v17, 7  ;;  %v897_v24 = vrot.slane %v6717_v21, 2 }
 0x15a   : > { %6182 = vmatpush3.bf16.msra.mxu0 %v6179_v23  ;;  %v466_v23 = vld [vmem:[%s6925_s12 + $0x40] sm:$0xff] }
 0x15b   : > { %v912_v42 = vsel %vm8419_vm2, %v897_v24, %v898_v28 }
 0x15d   : > { %1232 = vrot.lane.b32.xlu0 %v917_v35, %s6458_s7  ;;  %1040 = vrot.lane.b32.xlu1 %v660_v41, %s6460_s8  ;;  %v656_v35 = vsel %vm647_vm4, %v637_v60, %v638_v14  ;;  %v639_v41 = vrot.slane %v6717_v21, 7  ;;  %v465_v60 = vld [vmem:[%s6925_s12 + $0x38] sm:$0xff] }
 0x15f   : > { %v654_v43 = vsel %vm647_vm4, %v639_v41, %v640_v13 }
 0x161   : > { %1170 = vrot.lane.b32.xlu0 %v787_v38, %s6457_s6  ;;  %1168 = vrot.lane.b32.xlu1 %v788_v40, %s6457_s6  ;;  %v461_v38 = vld [vmem:[%s6925_s12 + $0x18] sm:$0xff] }
 0x162   : > { %v6183_v40 = vpack.c.bf16 %v461_v38, %v460_v39  ;;  %v901_v39 = vrot.slane %v6746_v16, 2  ;;  %v646_v38 = vrot.slane %v6751_v45, 7 }
 0x164   : > { %6184 = vmatprep.subr.bf16.mxu0 %v6183_v40 }
 0x165   : > { %1234 = vrot.lane.b32.xlu0 %v916_v44, %s6458_s7  ;;  %1042 = vrot.lane.b32.xlu1 %v659_v46, %s6460_s8  ;;  %v770_v44 = vrot.slane %v6730_v29, 1  ;;  %v462_v46 = vld [vmem:[%s6925_s12 + $0x20] sm:$0xff] }
 0x166   : > { %v6187_v48 = vpack.c.bf16 %v463_v47, %v462_v46  ;;  %6186 = vmatpush3.bf16.msra.mxu0 %v6183_v40  ;;  %v728_v40 = vsel %vm680_vm7, 1.0, %v8404_v36  ;;  %v643_v46 = vrot.slane %v6746_v16, 7 }
 0x168   : > { %6188 = vmatprep.subr.bf16.mxu0 %v6187_v48 }
 0x169   : > { %1236 = vrot.lane.b32.xlu0 %v915_v61, %s6458_s7  ;;  %1044 = vrot.lane.b32.xlu1 %v658_v34, %s6460_s8  ;;  %v911_v61 = vsel %vm8419_vm2, %v898_v28, %v899_v19  ;;  %v782_v34 = vsel %vm776_vm1, %v769_v8, %v770_v44  ;;  %v781_v8 = vsel %vm776_vm1, %v770_v44, %v771_v51  ;;  %v467_v28 = vld [vmem:[%s6925_s12 + $0x48] sm:$0xff] }
 0x16a   : > { %6190 = vmatpush3.bf16.msra.mxu0 %v6187_v48  ;;  %v663_v44 = vsel %vm647_vm4, %v646_v38, %v631_v31  ;;  %v651_v48 = vsel %vm647_vm4, %v642_v22, %v643_v46 }
 0x16b   : > { %v744_v47 = vmul.f32 %v728_v40, %v663_v44  ;;  %v904_v44 = vrot.slane %v6751_v45, 2 }
 0x16d   : > { %1174 = vrot.lane.b32.xlu0 %v785_v9, %s6457_s6  ;;  %1172 = vrot.lane.b32.xlu1 %v786_v54, %s6457_s6  ;;  %v641_v9 = vrot.slane %v6730_v29, 7  ;;  %v464_v54 = vld [vmem:[%s6925_s12 + $0x30] sm:$0xff] }
 0x16f   : > { %v653_v29 = vsel %vm647_vm4, %v640_v13, %v641_v9  ;;  %v772_v13 = vrot.slane %v6746_v16, 1 }
 0x171   : > { %1238 = vrot.lane.b32.xlu0 %v914_v4, %s6458_s7  ;;  %1046 = vrot.lane.b32.xlu1 %v657_v3, %s6460_s8  ;;  %v6191_v4 = vpack.c.bf16 %v465_v60, %v464_v54  ;;  %v900_v3 = vrot.slane %v6771_v27, 2  ;;  %v902_v60 = vrot.slane %v6753_v20, 2 }
 0x173   : > { %6192 = vmatprep.subr.bf16.mxu0 %v6191_v4  ;;  %v910_v18 = vsel %vm8419_vm2, %v899_v19, %v900_v3  ;;  %v780_v19 = vsel %vm776_vm1, %v771_v51, %v772_v13  ;;  %v773_v51 = vrot.slane %v6753_v20, 1 }
 0x174   : > { %6194 = vmatpush3.bf16.msra.mxu0 %v6191_v4  ;;  %v774_v4 = vrot.slane %v6769_v26, 1 }
 0x175   : > { %1178 = vrot.lane.b32.xlu0 %v783_v53, %s6457_s6  ;;  %1048 = vrot.lane.b32.xlu1 %v656_v35, %s6460_s8  ;;  %v6195_v53 = vpack.c.bf16 %v467_v28, %v466_v23  ;;  %v652_v35 = vsel %vm647_vm4, %v641_v9, %v642_v22  ;;  %v779_v54 = vsel %vm776_vm1, %v772_v13, %v773_v51  ;;  %v645_v23 = vrot.slane %v6769_v26, 7 }
 0x176   : > { %v913_v22 = vsel %vm8419_vm2, %v896_v59, %v897_v24  ;;  %v672_v28 = vadd.s32 4294967295, %v527_v10  ;;  %v784_v59 = vsel %vm776_vm1, %v767_v52, %v768_v56  ;;  %v655_v52 = vsel %vm647_vm4, %v638_v14, %v639_v41 }
 0x177   : > { %6196 = vmatprep.subr.bf16.mxu0 %v6195_v53  ;;  %v534_v13 = vand.u32 63, %v518_v6  ;;  %v648_v41 = vsel %vm647_vm4, %v645_v23, %v646_v38 }
 0x178   : > { %6198 = vmatpush3.bf16.msra.mxu0 %v6195_v53  ;;  %vm688_vm10 = vcmp.ge.s32.totalorder %v672_v28, 0 }
 0x179   : > { %1242 = vrot.lane.b32.xlu0 %v912_v42, %s6458_s7  ;;  %1052 = vrot.lane.b32.xlu1 %v654_v43, %s6460_s8  ;;  %v7005_v42 = vadd.s32 56, %v6709_v2  ;;  %v909_v43 = vsel %vm8419_vm2, %v900_v3, %v901_v39  ;;  %v736_v56 = vsel %vm688_vm10, 1.0, %v8404_v36  ;;  %v808_v21 = vadd.s32 1, %v534_v13 }
 0x17a   : > { %v752_v40 = vmul.f32 %v736_v56, %v655_v52 }
 0x17b   : > { %8424 = vst [vmem:[#allocation6_spill] sm:$0xff] %v7005_v42  ;;  %vm840_vm11 = vcmp.lt.s32.totalorder %v808_v21, 64 }
 0x17c   : > { %v872_v38 = vsel %vm840_vm11, 1.0, %v8404_v36 }
 0x17d   : > { %1244 = vrot.lane.b32.xlu0 %v911_v61, %s6458_s7  ;;  %1180 = vrot.lane.b32.xlu1 %v782_v34, %s6457_s6  ;;  %v644_v61 = vrot.slane %v6753_v20, 7  ;;  %v526_v34 = vand.u32 63, %v7005_v42 }
 0x17f   : > { %v650_v31 = vsel %vm647_vm4, %v643_v46, %v644_v61  ;;  %v929_v9 = vadd.s32 2, %v526_v34  ;;  %v800_v3 = vadd.s32 1, %v526_v34  ;;  %v937_v46 = vadd.s32 2, %v534_v13 }
 0x181   : > { %1182 = vrot.lane.b32.xlu0 %v781_v8, %s6457_s6  ;;  %1054 = vrot.lane.b32.xlu1 %v653_v29, %s6460_s8  ;;  %vm961_vm8 = vcmp.lt.s32.totalorder %v929_v9, 64  ;;  %v908_v8 = vsel %vm8419_vm2, %v901_v39, %v902_v60  ;;  %v778_v29 = vsel %vm776_vm1, %v773_v51, %v774_v4  ;;  %vm832_vm9 = vcmp.lt.s32.totalorder %v800_v3, 64 }
 0x182   : > { %v993_v15 = vsel %vm961_vm8, 1.0, %v8404_v36  ;;  %v864_v24 = vsel %vm832_vm9, 1.0, %v8404_v36  ;;  %vm969_vm12 = vcmp.lt.s32.totalorder %v937_v46, 64 }
 0x183   : > { %v1009_v53 = vmul.f32 %v993_v15, %v913_v22  ;;  %v880_v10 = vmul.f32 %v864_v24, %v784_v59 }
 0x185   : > { %1246 = vrot.lane.b32.xlu0 %v910_v18, %s6458_s7  ;;  %1056 = vrot.lane.b32.xlu1 %v652_v35, %s6460_s8  ;;  %v649_v18 = vsel %vm647_vm4, %v644_v61, %v645_v23  ;;  %v903_v35 = vrot.slane %v6769_v26, 2 }
 0x187   : > { %v907_v39 = vsel %vm8419_vm2, %v902_v60, %v903_v35  ;;  %v906_v61 = vsel %vm8419_vm2, %v903_v35, %v904_v44 }
 0x189   : > { %1248 = vrot.lane.b32.xlu0 %v909_v43, %s6458_s7  ;;  %1184 = vrot.lane.b32.xlu1 %v780_v19, %s6457_s6  ;;  %v775_v43 = vrot.slane %v6751_v45, 1 }
 0x18b   : > { %v777_v14 = vsel %vm776_vm1, %v774_v4, %v775_v43  ;;  %v792_v34 = vsel %vm776_vm1, %v775_v43, %v760_v11  ;;  %v1001_v11 = vsel %vm969_vm12, 1.0, %v8404_v36 }
 0x18c   : > { %v888_v9 = vmul.f32 %v872_v38, %v792_v34 }
 0x18d   : > { %1034 = vrot.lane.b32.xlu0 %v744_v47, %s6460_s8  ;;  %1058 = vrot.lane.b32.xlu1 %v651_v48, %s6460_s8 }
 0x191   : > { %1122 = vrot.lane.b32.xlu0 %v6746_v16, %s6456_s5  ;;  %1060 = vrot.lane.b32.xlu1 %v650_v31, %s6460_s8 }
 0x195   : > { %1186 = vrot.lane.b32.xlu0 %v779_v54, %s6457_s6  ;;  %1124 = vrot.lane.b32.xlu1 %v6753_v20, %s6456_s5  ;;  %v921_v54 = vsel %vm8419_vm2, %v904_v44, %v889_v49 }
 0x196   : > { %v1017_v3 = vmul.f32 %v1001_v11, %v921_v54 }
 0x199   : > { %1250 = vrot.lane.b32.xlu0 %v908_v8, %s6458_s7  ;;  %1188 = vrot.lane.b32.xlu1 %v778_v29, %s6457_s6 }
 0x19d   : > { %1240 = vrot.lane.b32.xlu0 %v1009_v53, %s6458_s7  ;;  %1062 = vrot.lane.b32.xlu1 %v649_v18, %s6460_s8 }
 0x1a1   : > { %1252 = vrot.lane.b32.xlu0 %v907_v39, %s6458_s7  ;;  %1176 = vrot.lane.b32.xlu1 %v880_v10, %s6457_s6 }
 0x1a5   : > { %1126 = vrot.lane.b32.xlu0 %v6769_v26, %s6456_s5  ;;  %1050 = vrot.lane.b32.xlu1 %v752_v40, %s6460_s8 }
 0x1a7   : > { %v7083_v17 = vpop.permute.xlu0 %1102  ;;  %v7085_v19 = vpop.permute.xlu1 %1098 }
 0x1a9   : > { %1190 = vrot.lane.b32.xlu0 %v777_v14, %s6457_s6  ;;  %1064 = vrot.lane.b32.xlu1 %v648_v41, %s6460_s8 }
 0x1ab   : > { %v7096_v47 = vpop.permute.xlu0 %1106  ;;  %v1101_v48 = vpop.permute.xlu1 %1100 }
 0x1ad   : > { %1254 = vrot.lane.b32.xlu0 %v906_v61, %s6458_s7  ;;  %1128 = vrot.lane.b32.xlu1 %v6751_v45, %s6456_s5 }
 0x1af   : > { %v7108_v31 = vpop.permute.xlu0 %1110  ;;  %v7110_v51 = vpop.permute.xlu1 %1104 }
 0x1b1   : > { %1192 = vrot.lane.b32.xlu1 %v888_v9, %s6457_s6 }
 0x1b3   : > { %v7118_v60 = vpop.permute.xlu0 %1114  ;;  %v7120_v4 = vpop.permute.xlu1 %1108 }
 0x1b5   : > { %1256 = vrot.lane.b32.xlu1 %v1017_v3, %s6458_s7 }
 0x1b7   : > { %v7123_v15 = vpop.permute.xlu0 %1118  ;;  %v7125_v8 = vpop.permute.xlu1 %1112 }
 0x1bb   : > { %v7127_v29 = vpop.permute.xlu1 %1116  ;;  %v1163_v58 = vpop.permute.xlu0 %1162 }
 0x1bf   : > { %v7129_v22 = vpop.permute.xlu1 %1120  ;;  %v1227_v49 = vpop.permute.xlu0 %1226 }
 0x1c3   : > { %v1229_v23 = vpop.permute.xlu0 %1228  ;;  %v1037_v28 = vpop.permute.xlu1 %1036 }
 0x1c4   : > { %v1275_v42 = vsel %vm252_vm0, %v6809_v50, %v1037_v28 }
 0x1c5   : > { %v1292_v27 = vsel %vm1290_vm13, %v1275_v42, %v1101_v48 }
 0x1c7   : > { %v1167_v53 = vpop.permute.xlu0 %1166  ;;  %v1165_v18 = vpop.permute.xlu1 %1164 }
 0x1cb   : > { %v1231_v35 = vpop.permute.xlu0 %1230  ;;  %v1039_v59 = vpop.permute.xlu1 %1038 }
 0x1cc   : > { %v1276_v12 = vsel %vm252_vm0, %v6816_v55, %v1039_v59  ;;  %v1309_v59 = vsel %vm8417_vm14, %v1292_v27, %v1165_v18 }
 0x1cd   : > { %v1293_v45 = vsel %vm1290_vm13, %v1276_v12, %v7083_v17 }
 0x1ce   : > { %v1310_v42 = vsel %vm8417_vm14, %v1293_v45, %v1167_v53 }
 0x1cf   : > { %v1233_v24 = vpop.permute.xlu0 %1232  ;;  %v1041_v6 = vpop.permute.xlu1 %1040 }
 0x1d0   : > { %v1277_v50 = vsel %vm252_vm0, %v6823_v0, %v1041_v6 }
 0x1d1   : > { %v1294_v27 = vsel %vm1290_vm13, %v1277_v50, %v7110_v51 }
 0x1d3   : > { %v1171_v10 = vpop.permute.xlu0 %1170  ;;  %v1169_v39 = vpop.permute.xlu1 %1168 }
 0x1d4   : > { %v1311_v45 = vsel %vm8417_vm14, %v1294_v27, %v1169_v39 }
 0x1d7   : > { %v1235_v52 = vpop.permute.xlu0 %1234  ;;  %v1043_v56 = vpop.permute.xlu1 %1042 }
 0x1db   : > { %v1237_v13 = vpop.permute.xlu0 %1236  ;;  %v1045_v40 = vpop.permute.xlu1 %1044 }
 0x1df   : > { %v1175_v43 = vpop.permute.xlu0 %1174  ;;  %v1173_v21 = vpop.permute.xlu1 %1172 }
 0x1e3   : > { %v1239_v14 = vpop.permute.xlu0 %1238  ;;  %v1047_v41 = vpop.permute.xlu1 %1046 }
 0x1e4   : > { %v1280_v0 = vsel %vm252_vm0, %v6838_v5, %v1047_v41 }
 0x1e5   : > { %v1297_v5 = vsel %vm1290_vm13, %v1280_v0, %v7108_v31 }
 0x1e6   : > { %v1314_v18 = vsel %vm8417_vm14, %v1297_v5, %v1175_v43 }
 0x1e7   : > { %v7131_v44 = vpop.permute.xlu0 %1178  ;;  %v1049_v46 = vpop.permute.xlu1 %1048 }
 0x1e8   : > { %v1281_v39 = vsel %vm252_vm0, %v6842_v7, %v1049_v46 }
 0x1eb   : > { %v7133_v61 = vpop.permute.xlu0 %1242  ;;  %v7135_v34 = vpop.permute.xlu1 %1052 }
 0x1ef   : > { %v7137_v38 = vpop.permute.xlu0 %1244  ;;  %v7139_v9 = vpop.permute.xlu1 %1180 }
 0x1f3   : > { %v7141_v54 = vpop.permute.xlu0 %1182  ;;  %v1055_v11 = vpop.permute.xlu1 %1054 }
 0x1f4   : > { %v1284_v43 = vsel %vm252_vm0, %v6858_v33, %v1055_v11 }
 0x1f5   : > { %v1301_v7 = vsel %vm1290_vm13, %v1284_v43, %v7123_v15 }
 0x1f7   : > { %v7143_v3 = vpop.permute.xlu0 %1246  ;;  %v7145_v36 = vpop.permute.xlu1 %1056 }
 0x1fb   : > { %v7147_v1 = vpop.permute.xlu0 %1248  ;;  %v7149_v37 = vpop.permute.xlu1 %1184 }
 0x1fc   : > { %8425 = vst [vmem:[#allocation7_spill] sm:$0xff] %v7147_v1  ;;  %v1278_v1 = vsel %vm252_vm0, %v6827_v62, %v1043_v56  ;;  %v1298_v56 = vsel %vm1290_vm13, %v1281_v39, %v7125_v8 }
 0x1fd   : > { %v1295_v62 = vsel %vm1290_vm13, %v1278_v1, %v7096_v47  ;;  %v1279_v1 = vsel %vm252_vm0, %v6831_v63, %v1045_v40 }
 0x1fe   : > { %v1312_v47 = vsel %vm8417_vm14, %v1295_v62, %v1171_v10 }
 0x1ff   : > { %v1035_v26 = vpop.permute.xlu0 %1034  ;;  %v7157_v2 = vpop.permute.xlu1 %1058  ;;  %v1329_v53 = vsel %vm1324_vm15, %v1312_v47, %v1235_v52 }
 0x200   : > { %v1274_v55 = vsel %vm252_vm0, %v6879_v32, %v1035_v26  ;;  %v1326_v32 = vsel %vm1324_vm15, %v1309_v59, %v1229_v23  ;;  %v1328_v23 = vsel %vm1324_vm15, %v1311_v45, %v1233_v24 }
 0x201   : > { %v1291_v12 = vsel %vm1290_vm13, %v1274_v55, %v7085_v19  ;;  %v1327_v19 = vsel %vm1324_vm15, %v1310_v42, %v1231_v35  ;;  %v1318_v55 = vsel %vm8417_vm14, %v1301_v7, %v7141_v54  ;;  %v8426_v54 = vld [vmem:[#allocation5_spill] sm:$0xff] }
 0x202   : > { %v1308_v17 = vsel %vm8417_vm14, %v1291_v12, %v1163_v58  ;;  %v8427_v50 = vrot.slane %v8426_v54, 6 }
 0x203   : > { %v7173_v48 = vpop.permute.xlu0 %1122  ;;  %v7175_v28 = vpop.permute.xlu1 %1060  ;;  %v1325_v26 = vsel %vm1324_vm15, %v1308_v17, %v1227_v49  ;;  %v1296_v49 = vsel %vm1290_vm13, %v1279_v1, %v7120_v4  ;;  %v1331_v4 = vsel %vm1324_vm15, %v1314_v18, %v1239_v14  ;;  %v8430_v62 = vld [vmem:[#allocation7_spill] sm:$0xff] }
 0x204   : > { %5849 = vmatprep.mubr.msk.f32.mxu0 %vm8416_vm3, %v1325_v26  ;;  %v1313_v63 = vsel %vm8417_vm14, %v1296_v49, %v1173_v21  ;;  %v1283_v21 = vsel %vm252_vm0, %v6850_v25, %v7135_v34  ;;  %v1285_v25 = vsel %vm252_vm0, %v6864_v57, %v7145_v36  ;;  %v481_v34 = vrot.slane %v6746_v16, 6 }
 0x205   : > { %5850 = vmatmul.mubr.msk.f32.vlgmr.msra.gmra.mrb[0].mxu0 %vm8416_vm3, %v1326_v32  ;;  %v1330_v31 = vsel %vm1324_vm15, %v1313_v63, %v1237_v13  ;;  %v1300_v8 = vsel %vm1290_vm13, %v1283_v21, %v7127_v29  ;;  %v482_v36 = vrot.slane %v6753_v20, 6 }
 0x206   : > { %5852 = vmatprep.mubr.msk.f32.mxu0 %vm8416_vm3, %v1327_v19  ;;  %v1317_v11 = vsel %vm8417_vm14, %v1300_v8, %v7139_v9  ;;  %v1302_v9 = vsel %vm1290_vm13, %v1285_v25, %v7129_v22  ;;  %v491_v12 = vsel %vm487_vm5, %v8427_v50, %v481_v34  ;;  %v8429_v22 = vld [vmem:[#allocation4_spill] sm:$0xff] }
 0x207   : > { %v1187_v51 = vpop.permute.xlu0 %1186  ;;  %v1125_v58 = vpop.permute.xlu1 %1124  ;;  %v1334_v16 = vsel %vm1324_vm15, %v1317_v11, %v7137_v38  ;;  %v483_v17 = vrot.slane %v8429_v22, 6  ;;  %v1286_v20 = vsel %vm252_vm0, %v491_v12, %v7157_v2 }
 0x208   : > { %v1303_v38 = vsel %vm1290_vm13, %v1286_v20, %v7173_v48 }
 0x209   : > { %5853 = vmatmul.mubr.msk.f32.gmra.mrb[2].mxu0 %vm8416_vm3, %v1328_v23  ;;  %v1320_v42 = vsel %vm8417_vm14, %v1303_v38, %v1187_v51  ;;  %v489_v2 = vsel %vm487_vm5, %v482_v36, %v483_v17  ;;  %v8431_v51 = vld [vmem:[#allocation3_spill] sm:$0xff] }
 0x20a   : > { %5855 = vmatprep.mubr.msk.f32.mxu0 %vm8416_vm3, %v1329_v53  ;;  %v8432_v49 = vrot.slane %v8431_v51, 6 }
 0x20b   : > { %v1251_v35 = vpop.permute.xlu0 %1250  ;;  %v1189_v6 = vpop.permute.xlu1 %1188 }
 0x20c   : > { %v1337_v0 = vsel %vm1324_vm15, %v1320_v42, %v1251_v35  ;;  %v488_v23 = vsel %vm487_vm5, %v483_v17, %v8432_v49 }
 0x20d   : > { %5856 = vmatmul.mubr.msk.f32.gmra.mrb[4].mxu0 %vm8416_vm3, %v1330_v31  ;;  %v8433_v31 = vlaneseq }
 0x20e   : > { %5858 = vmatprep.mubr.msk.f32.mxu0 %vm8416_vm3, %v1331_v4 }
 0x20f   : > { %v1241_v24 = vpop.permute.xlu0 %1240  ;;  %v1063_v10 = vpop.permute.xlu1 %1062  ;;  %v7289_v4 = vand.u32 127, %v8433_v31 }
 0x210   : > { %v1288_v32 = vsel %vm252_vm0, %v489_v2, %v1063_v10 }
 0x213   : > { %v1253_v52 = vpop.permute.xlu0 %1252  ;;  %v1177_v40 = vpop.permute.xlu1 %1176 }
 0x214   : > { %v1315_v13 = vsel %vm8417_vm14, %v1298_v56, %v1177_v40  ;;  %v7305_v56 = vld [vmem:[%s6678_s28 + $0x2] ss:$0 sm:$0xff] }
 0x215   : > { %v1332_v14 = vsel %vm1324_vm15, %v1315_v13, %v1241_v24 }
 0x216   : > { %5859 = vmatmul.mubr.msk.f32.gmra.mrb[6].mxu0 %vm8416_vm3, %v1332_v14 }
 0x217   : > { %v1127_v41 = vpop.permute.xlu0 %1126  ;;  %v1051_v46 = vpop.permute.xlu1 %1050 }
 0x218   : > { %v1282_v33 = vsel %vm252_vm0, %v6875_v30, %v1051_v46  ;;  %v1305_v19 = vsel %vm1290_vm13, %v1288_v32, %v1127_v41 }
 0x219   : > { %v1299_v15 = vsel %vm1290_vm13, %v1282_v33, %v7118_v60  ;;  %v1335_v60 = vsel %vm1324_vm15, %v1318_v55, %v7143_v3 }
 0x21a   : > { %v1316_v29 = vsel %vm8417_vm14, %v1299_v15, %v7131_v44  ;;  %v1319_v44 = vsel %vm8417_vm14, %v1302_v9, %v7149_v37  ;;  %v490_v37 = vsel %vm487_vm5, %v481_v34, %v482_v36 }
 0x21b   : > { %v1065_v59 = vpop.permute.xlu1 %1064  ;;  %v1333_v30 = vsel %vm1324_vm15, %v1316_v29, %v7133_v61  ;;  %v1191_v57 = vpop.permute.xlu0 %1190  ;;  %v8428_v61 = vld [vmem:[#allocation2_spill] sm:$0xff]  ;;  %v1336_v26 = vsel %vm1324_vm15, %v1319_v44, %v8430_v62  ;;  %v1287_v27 = vsel %vm252_vm0, %v490_v37, %v7175_v28 }
 0x21c   : > { %5861 = vmatprep.mubr.msk.f32.mxu0 %vm8416_vm3, %v1333_v30  ;;  %v1304_v48 = vsel %vm1290_vm13, %v1287_v27, %v1125_v58  ;;  %v1322_v5 = vsel %vm8417_vm14, %v1305_v19, %v1191_v57  ;;  %v1289_v58 = vsel %vm252_vm0, %v488_v23, %v1065_v59  ;;  %v1605_v24 = vmul.u32 2, %v8428_v61 }
 0x21d   : > { %5862 = vmatmul.mubr.msk.f32.gmra.mrb[8].mxu0 %vm8416_vm3, %v1334_v16  ;;  %v1321_v1 = vsel %vm8417_vm14, %v1304_v48, %v1189_v6 }
 0x21e   : > { %5864 = vmatprep.mubr.msk.f32.mxu0 %vm8416_vm3, %v1335_v60  ;;  %v1338_v28 = vsel %vm1324_vm15, %v1321_v1, %v1253_v52  ;;  %vm7293_vm6 = vcmp.eq.s32.totalorder %v7289_v4, %v1605_v24  ;;  %v7297_v39 = vadd.s32 1, %v1605_v24  ;;  %v6461_v52 = vmov 1.0  }
 0x21f   : > { %v1129_v3 = vpop.permute.xlu1 %1128  ;;  %v1255_v45 = vpop.permute.xlu0 %1254  ;;  %5905 = vmatprep.mubr.msk.f32.mxu1 %vm7293_vm6, %v6461_v52 }
 0x220   : > { %v1339_v63 = vsel %vm1324_vm15, %v1322_v5, %v1255_v45  ;;  %v1306_v53 = vsel %vm1290_vm13, %v1289_v58, %v1129_v3  ;;  %8436 = vst [vmem:[#allocation5_spill] sm:$0xff] %v7297_v39 }
 0x221   : > { %5865 = vmatmul.mubr.msk.f32.gmra.mrb[10].mxu0 %vm8416_vm3, %v1336_v26 }
 0x222   : > { %5867 = vmatprep.mubr.msk.f32.mxu0 %vm8416_vm3, %v1337_v0 }
 0x223   : > { %v1193_v47 = vpop.permute.xlu1 %1192 }
 0x224   : > { %v1323_v18 = vsel %vm8417_vm14, %v1306_v53, %v1193_v47  ;;  %vm1744_vm14 = vcmask 64512  }
 0x225   : > { %5868 = vmatmul.mubr.msk.f32.gmra.mrb[12].mxu0 %vm8416_vm3, %v1338_v28 }
 0x226   : > { %5870 = vmatprep.mubr.msk.f32.mxu0 %vm8416_vm3, %v1339_v63 }
 0x227   : > { %v1257_v35 = vpop.permute.xlu1 %1256 }
 0x228   : > { %v1340_v6 = vsel %vm1324_vm15, %v1323_v18, %v1257_v35 }
 0x229   : > { %5871 = vmatmul.mubr.msk.f32.gmra.mrb[14].mxu0 %vm8416_vm3, %v1340_v6 }
 0x2d8   : > { %v5851_v40 = vpop.f32.mrb[0].mxu0 }
 0x2d9   : > { %v1466_v43 = vadd.f32 %v5851_v40, %v7305_v56  ;;  %v1460_v13 = vpop.f32.mrb[1].mxu0 }
 0x2da   : > { %v1461_v21 = vadd.f32 %v7305_v56, %v1460_v13 }
 0x2db   : > { %v1540_v14 = vmax.f32 %v1466_v43, 0.0 }
 0x2dc   : > { %v1539_v7 = vmax.f32 %v1461_v21, 0.0  ;;  %v5854_v41 = vpop.f32.mrb[2].mxu0 }
 0x2dd   : > { %v1556_v46 = vrot.slane %v1540_v14, 1  ;;  %v1476_v8 = vadd.f32 %v5854_v41, %v7305_v56  ;;  %v1470_v33 = vpop.f32.mrb[3].mxu0 }
 0x2de   : > { %v7310_v11 = vrot.slane %v1539_v7, 1  ;;  %v1471_v25 = vadd.f32 %v7305_v56, %v1470_v33 }
 0x2df   : > { %v1542_v34 = vmax.f32 %v1476_v8, 0.0 }
 0x2e0   : > { %v1585_v15 = vsel %vm776_vm1, %v7310_v11, %v1556_v46  ;;  %v1541_v55 = vmax.f32 %v1471_v25, 0.0  ;;  %v5857_v29 = vpop.f32.mrb[4].mxu0 }
 0x2e1   : > { %v1587_v59 = vmax.f32 %v1539_v7, %v1585_v15  ;;  %v1558_v30 = vrot.slane %v1542_v34, 1  ;;  %v1486_v9 = vadd.f32 %v5857_v29, %v7305_v56  ;;  %v1480_v36 = vpop.f32.mrb[5].mxu0 }
 0x2e2   : > { %v1557_v57 = vrot.slane %v1541_v55, 1  ;;  %v1481_v16 = vadd.f32 %v7305_v56, %v1480_v36 }
 0x2e3   : > { %v1544_v60 = vmax.f32 %v1486_v9, 0.0 }
 0x2e4   : > { %v1583_v44 = vsel %vm776_vm1, %v1557_v57, %v1558_v30  ;;  %v1543_v54 = vmax.f32 %v1481_v16, 0.0  ;;  %v1584_v50 = vsel %vm776_vm1, %v1556_v46, %v1557_v57 }
 0x2e5   : > { %v1589_v12 = vmax.f32 %v1541_v55, %v1583_v44  ;;  %v1560_v22 = vrot.slane %v1544_v60, 1  ;;  %v1588_v17 = vmax.f32 %v1540_v14, %v1584_v50 }
 0x2e6   : > { %v1559_v20 = vrot.slane %v1543_v54, 1 }
 0x2e7   : > { %v6199_v38 = vpack.c.bf16 %v1588_v17, %v1587_v59 }
 0x2e8   : > { %v1581_v3 = vsel %vm776_vm1, %v1559_v20, %v1560_v22  ;;  %v1582_v37 = vsel %vm776_vm1, %v1558_v30, %v1559_v20 }
 0x2e9   : > { %v1591_v42 = vmax.f32 %v1543_v54, %v1581_v3  ;;  %v5860_v62 = vpop.f32.mrb[6].mxu0  ;;  %6200 = vmatprep.subr.bf16.mxu1 %v6199_v38  ;;  %v1590_v26 = vmax.f32 %v1542_v34, %v1582_v37 }
 0x2ea   : > { %v1496_v27 = vadd.f32 %v5860_v62, %v7305_v56  ;;  %v1490_v0 = vpop.f32.mrb[7].mxu0  ;;  %6202 = vmatpush3.bf16.msra.mxu1 %v6199_v38 }
 0x2eb   : > { %v1491_v2 = vadd.f32 %v7305_v56, %v1490_v0  ;;  %v6203_v48 = vpack.c.bf16 %v1590_v26, %v1589_v12 }
 0x2ec   : > { %v1546_v32 = vmax.f32 %v1496_v27, 0.0 }
 0x2ed   : > { %v1545_v45 = vmax.f32 %v1491_v2, 0.0  ;;  %6204 = vmatprep.subr.bf16.mxu1 %v6203_v48 }
 0x2ee   : > { %v1562_v1 = vrot.slane %v1546_v32, 1  ;;  %6206 = vmatpush3.bf16.msra.mxu1 %v6203_v48 }
 0x2ef   : > { %v1561_v19 = vrot.slane %v1545_v45, 1 }
 0x2f0   : > { %v5863_v47 = vpop.f32.mrb[8].mxu0 }
 0x2f1   : > { %v1579_v28 = vsel %vm776_vm1, %v1561_v19, %v1562_v1  ;;  %v1506_v5 = vadd.f32 %v5863_v47, %v7305_v56  ;;  %v1500_v51 = vpop.f32.mrb[9].mxu0  ;;  %v1580_v49 = vsel %vm776_vm1, %v1560_v22, %v1561_v19  ;;  %v7360_v47 = vadd.s32 8, %v8428_v61 }
 0x2f2   : > { %v1593_v23 = vmax.f32 %v1545_v45, %v1579_v28  ;;  %v1501_v58 = vadd.f32 %v7305_v56, %v1500_v51  ;;  %v1592_v63 = vmax.f32 %v1544_v60, %v1580_v49  ;;  %v7363_v51 = vadd.s32 16, %v8428_v61 }
 0x2f3   : > { %v1548_v53 = vmax.f32 %v1506_v5, 0.0  ;;  %v7367_v49 = vadd.s32 24, %v8428_v61 }
 0x2f4   : > { %v1547_v18 = vmax.f32 %v1501_v58, 0.0  ;;  %v5866_v35 = vpop.f32.mrb[10].mxu0  ;;  %v6207_v6 = vpack.c.bf16 %v1592_v63, %v1591_v42  ;;  %v7371_v58 = vadd.s32 32, %v8428_v61 }
 0x2f5   : > { %v1564_v31 = vrot.slane %v1548_v53, 1  ;;  %v1516_v24 = vadd.f32 %v5866_v35, %v7305_v56  ;;  %v1510_v40 = vpop.f32.mrb[11].mxu0 }
 0x2f6   : > { %v1563_v43 = vrot.slane %v1547_v18, 1  ;;  %v1511_v13 = vadd.f32 %v7305_v56, %v1510_v40  ;;  %6208 = vmatprep.subr.bf16.mxu1 %v6207_v6 }
 0x2f7   : > { %v1550_v21 = vmax.f32 %v1516_v24, 0.0  ;;  %6210 = vmatpush3.bf16.msra.mxu1 %v6207_v6  ;;  %v1609_v6 = vmul.u32 2, %v7371_v58 }
 0x2f8   : > { %v1577_v14 = vsel %vm776_vm1, %v1563_v43, %v1564_v31  ;;  %v1549_v7 = vmax.f32 %v1511_v13, 0.0  ;;  %v5869_v41 = vpop.f32.mrb[12].mxu0  ;;  %v1578_v46 = vsel %vm776_vm1, %v1562_v1, %v1563_v43  ;;  %v8443_v13 = vld [vmem:[#allocation6_spill] sm:$0xff] }
 0x2f9   : > { %v1595_v8 = vmax.f32 %v1547_v18, %v1577_v14  ;;  %v1566_v33 = vrot.slane %v1550_v21, 1  ;;  %v1526_v25 = vadd.f32 %v5869_v41, %v7305_v56  ;;  %v1520_v34 = vpop.f32.mrb[13].mxu0  ;;  %v1594_v15 = vmax.f32 %v1546_v32, %v1578_v46  ;;  %v1836_v14 = vld [vmem:[%s6925_s12 + $0x50] sm:$0xff] }
 0x2fa   : > { %v1565_v55 = vrot.slane %v1549_v7, 1  ;;  %v1521_v29 = vadd.f32 %v7305_v56, %v1520_v34  ;;  %v508_v18 = vadd.s32 40, %v8428_v61  ;;  %vm1617_vm11 = vcmp.eq.s32.totalorder %v7289_v4, %v1609_v6 }
 0x2fb   : > { %v1552_v59 = vmax.f32 %v1526_v25, 0.0  ;;  %v6211_v30 = vpack.c.bf16 %v1594_v15, %v1593_v23  ;;  %v1607_v23 = vmul.u32 2, %v7363_v51 }
 0x2fc   : > { %v1575_v9 = vsel %vm776_vm1, %v1565_v55, %v1566_v33  ;;  %v1551_v36 = vmax.f32 %v1521_v29, 0.0  ;;  %v5872_v57 = vpop.f32.mrb[14].mxu0  ;;  %v1576_v16 = vsel %vm776_vm1, %v1564_v31, %v1565_v55  ;;  %v509_v31 = vadd.s32 48, %v8428_v61 }
 0x2fd   : > { %v1597_v60 = vmax.f32 %v1549_v7, %v1575_v9  ;;  %v1568_v44 = vrot.slane %v1552_v59, 1  ;;  %v1536_v54 = vadd.f32 %v5872_v57, %v7305_v56  ;;  %v1530_v50 = vpop.f32.mrb[15].mxu0  ;;  %6212 = vmatprep.subr.bf16.mxu1 %v6211_v30  ;;  %v1596_v12 = vmax.f32 %v1548_v53, %v1576_v16 }
 0x2fe   : > { %v1567_v22 = vrot.slane %v1551_v36, 1  ;;  %v1531_v17 = vadd.f32 %v7305_v56, %v1530_v50  ;;  %6214 = vmatpush3.bf16.msra.mxu1 %v6211_v30  ;;  %v1608_v53 = vmul.u32 2, %v7367_v49  ;;  %vm7381_vm9 = vcmp.eq.s32.totalorder %v7289_v4, %v1607_v23 }
 0x2ff   : > { %v1554_v20 = vmax.f32 %v1536_v54, 0.0  ;;  %v6215_v38 = vpack.c.bf16 %v1596_v12, %v1595_v8  ;;  %v1610_v40 = vmul.u32 2, %v508_v18  ;;  %v1611_v43 = vmul.u32 2, %v509_v31 }
 0x300   : > { %v1573_v3 = vsel %vm776_vm1, %v1567_v22, %v1568_v44  ;;  %v1553_v37 = vmax.f32 %v1531_v17, 0.0  ;;  %v1574_v42 = vsel %vm776_vm1, %v1566_v33, %v1567_v22  ;;  %vm7394_vm10 = vcmp.eq.s32.totalorder %v7289_v4, %v1608_v53 }
 0x301   : > { %v1599_v62 = vmax.f32 %v1551_v36, %v1573_v3  ;;  %v1570_v26 = vrot.slane %v1554_v20, 1  ;;  %6216 = vmatprep.subr.bf16.mxu1 %v6215_v38  ;;  %v1598_v27 = vmax.f32 %v1550_v21, %v1574_v42  ;;  %vm1618_vm12 = vcmp.eq.s32.totalorder %v7289_v4, %v1610_v40 }
 0x302   : > { %v1569_v0 = vrot.slane %v1553_v37, 1  ;;  %6218 = vmatpush3.bf16.msra.mxu1 %v6215_v38  ;;  %v1612_v21 = vmul.u32 2, %v8443_v13  ;;  %vm1619_vm7 = vcmp.eq.s32.totalorder %v7289_v4, %v1611_v43 }
 0x303   : > { %v1586_v56 = vsel %vm776_vm1, %v1570_v26, %v7310_v11  ;;  %v6219_v2 = vpack.c.bf16 %v1598_v27, %v1597_v60  ;;  %v1606_v11 = vmul.u32 2, %v7360_v47 }
 0x304   : > { %v1602_v48 = vmax.f32 %v1554_v20, %v1586_v56  ;;  %v1571_v32 = vsel %vm776_vm1, %v1569_v0, %v1570_v26  ;;  %v1572_v45 = vsel %vm776_vm1, %v1568_v44, %v1569_v0  ;;  %vm1620_vm3 = vcmp.eq.s32.totalorder %v7289_v4, %v1612_v21 }
 0x305   : > { %v1601_v1 = vmax.f32 %v1553_v37, %v1571_v32  ;;  %6220 = vmatprep.subr.bf16.mxu1 %v6219_v2  ;;  %v1600_v19 = vmax.f32 %v1552_v59, %v1572_v45  ;;  %vm7374_vm8 = vcmp.eq.s32.totalorder %v7289_v4, %v1606_v11 }
 0x306   : > { %6222 = vmatpush3.bf16.msra.mxu1 %v6219_v2 }
 0x307   : > { %v6223_v28 = vpack.c.bf16 %v1600_v19, %v1599_v62  ;;  %v6227_v5 = vpack.c.bf16 %v1602_v48, %v1601_v1 }
 0x309   : > { %6224 = vmatprep.subr.bf16.mxu1 %v6223_v28 }
 0x30a   : > { %6226 = vmatpush3.bf16.msra.mxu1 %v6223_v28 }
 0x30b   : > { %6228 = vmatprep.subr.bf16.mxu1 %v6227_v5 }
 0x30e   : > { %6230 = vmatpush3.bf16.msra.mxu1 %v6227_v5 }
 0x30f   : > { %5917 = vmatprep.subr.mxu1 %v1836_v14 }
 0x311   : > { %5906 = vmatmul.mubr.msk.f32.vlgmr.msra.gmra.mrb[0].mxu1 %vm7374_vm8, %v6461_v52 }
 0x312   : > { %5908 = vmatprep.mubr.msk.f32.mxu1 %vm7381_vm9, %v6461_v52  ;;  %5918 = vmatpush3.msra.mxu1 %v1836_v14 }
 0x315   : > { %5909 = vmatmul.mubr.msk.f32.gmra.mrb[2].mxu1 %vm7394_vm10, %v6461_v52 }
 0x316   : > { %5911 = vmatprep.mubr.msk.f32.mxu1 %vm1617_vm11, %v6461_v52 }
 0x319   : > { %5912 = vmatmul.mubr.msk.f32.gmra.mrb[4].mxu1 %vm1618_vm12, %v6461_v52  ;;  %vm2519_vm12 = vcmask 1041408  }
 0x31a   : > { %5914 = vmatprep.mubr.msk.f32.mxu1 %vm1619_vm7, %v6461_v52 }
 0x31d   : > { %5915 = vmatmul.mubr.msk.f32.gmra.mrb[6].mxu1 %vm1620_vm3, %v6461_v52  ;;  %vm1970_vm3 = vcmask 15360  }
 0x3e4   : > { %v7411_v7 = vpop.f32.mrb[0].mxu1 }
 0x3e5   : > { %v1746_v41 = vsel %vm1744_vm14, %v7411_v7, 0.0  ;;  %v1768_v46 = vmul.f32 %v7411_v7, %v7411_v7  ;;  %v7417_v8 = vpop.f32.mrb[1].mxu1 }
 0x3e6   : > { %v1745_v52 = vsel %vm1744_vm14, %v7417_v8, 0.0  ;;  %v1767_v25 = vmul.f32 %v7417_v8, %v7417_v8 }
 0x3e7   : > { %v1776_v34 = vsel %vm1744_vm14, %v1768_v46, 0.0  ;;  %v1747_v15 = vadd.f32 %v1746_v41, %v1745_v52 }
 0x3e8   : > { %v1775_v55 = vsel %vm1744_vm14, %v1767_v25, 0.0  ;;  %v7427_v29 = vpop.f32.mrb[2].mxu1 }
 0x3e9   : > { %v1777_v59 = vadd.f32 %v1776_v34, %v1775_v55  ;;  %v7429_v30 = vpop.f32.mrb[3].mxu1  ;;  %v1770_v9 = vmul.f32 %v7427_v29, %v7427_v29  ;;  %v1750_v44 = vsel %vm1744_vm14, %v7427_v29, 0.0 }
 0x3ea   : > { %v1748_v57 = vsel %vm1744_vm14, %v7429_v30, 0.0  ;;  %v1769_v16 = vmul.f32 %v7429_v30, %v7429_v30 }
 0x3eb   : > { %v1749_v60 = vadd.f32 %v1748_v57, %v1747_v15  ;;  %v1780_v38 = vsel %vm1744_vm14, %v1770_v9, 0.0 }
 0x3ec   : > { %v1778_v54 = vsel %vm1744_vm14, %v1769_v16, 0.0  ;;  %v7442_v50 = vpop.f32.mrb[4].mxu1 }
 0x3ed   : > { %v1779_v12 = vadd.f32 %v1778_v54, %v1777_v59  ;;  %v1772_v22 = vmul.f32 %v7442_v50, %v7442_v50  ;;  %v7446_v17 = vpop.f32.mrb[5].mxu1  ;;  %v1751_v20 = vadd.f32 %v1750_v44, %v1749_v60  ;;  %v1754_v27 = vsel %vm1744_vm14, %v7442_v50, 0.0 }
 0x3ee   : > { %v1752_v37 = vsel %vm1744_vm14, %v7446_v17, 0.0  ;;  %v1771_v42 = vmul.f32 %v7446_v17, %v7446_v17 }
 0x3ef   : > { %v1781_v62 = vadd.f32 %v1780_v38, %v1779_v12  ;;  %v1753_v26 = vadd.f32 %v1752_v37, %v1751_v20  ;;  %v1784_v2 = vsel %vm1744_vm14, %v1772_v22, 0.0  ;;  %v1734_v22 = vld [vmem:[%s6678_s28 + $0x3] sm:$0x1]  ;;  %v7477_v20 = vsub.s32 0, %v8428_v61 }
 0x3f0   : > { %v1782_v0 = vsel %vm1744_vm14, %v1771_v42, 0.0  ;;  %v7458_v56 = vpop.f32.mrb[6].mxu1  ;;  %v1735_v42 = vld [vmem:[%s6678_s28 + $0x4] sm:$0x1] }
 0x3f1   : > { %v1783_v48 = vadd.f32 %v1782_v0, %v1781_v62  ;;  %v7461_v32 = vpop.f32.mrb[7].mxu1  ;;  %v1755_v45 = vadd.f32 %v1754_v27, %v1753_v26  ;;  %v1774_v1 = vmul.f32 %v7458_v56, %v7458_v56  ;;  %v1758_v53 = vsel %vm1744_vm14, %v7458_v56, 0.0 }
 0x3f2   : > { %v1756_v28 = vsel %vm1744_vm14, %v7461_v32, 0.0  ;;  %v1773_v5 = vmul.f32 %v7461_v32, %v7461_v32 }
 0x3f3   : > { %v1785_v11 = vadd.f32 %v1784_v2, %v1783_v48  ;;  %v1757_v23 = vadd.f32 %v1756_v28, %v1755_v45  ;;  %v1788_v40 = vsel %vm1744_vm14, %v1774_v1, 0.0 }
 0x3f4   : > { %v1786_v18 = vsel %vm1744_vm14, %v1773_v5, 0.0 }
 0x3f5   : > { %v1759_v6 = vadd.f32 %v1758_v53, %v1757_v23  ;;  %v1787_v31 = vadd.f32 %v1786_v18, %v1785_v11 }
 0x3f7   : > { %v1760_v43 = vrot.slane %v1759_v6, 4  ;;  %v1789_v21 = vadd.f32 %v1788_v40, %v1787_v31 }
 0x3f9   : > { %v1761_v14 = vadd.f32 %v1760_v43, %v1759_v6  ;;  %v1790_v41 = vrot.slane %v1789_v21, 4 }
 0x3fb   : > { %v1762_v46 = vrot.slane %v1761_v14, 2  ;;  %v1791_v52 = vadd.f32 %v1790_v41, %v1789_v21 }
 0x3fd   : > { %v1763_v25 = vadd.f32 %v1762_v46, %v1761_v14  ;;  %v1792_v34 = vrot.slane %v1791_v52, 2 }
 0x3ff   : > { %v1764_v15 = vrot.slane %v1763_v25, 1  ;;  %v1793_v55 = vadd.f32 %v1792_v34, %v1791_v52 }
 0x401   : > { %v1765_v59 = vadd.f32 %v1764_v15, %v1763_v25  ;;  %v1794_v9 = vrot.slane %v1793_v55, 1 }
 0x403   : > { %v1766_v57 = vmul.f32 0.015625, %v1765_v59  ;;  %v1795_v16 = vadd.f32 %v1794_v9, %v1793_v55  ;;  %v8444_v59 = vmov 0.0  }
 0x404   : > { %v7500_v9 = vsel %vm7293_vm6, 1.0, %v8444_v59  ;;  %v1624_v63 = vsel %vm7394_vm10, 1.0, %v8444_v59 }
 0x405   : > { %v1796_v60 = vmul.f32 0.015625, %v1795_v16  ;;  %v1797_v44 = vmul.f32 %v1766_v57, %v1766_v57  ;;  %v5560_v16 = vld [vmem:[%s6678_s28 + $0x5] ss:$0 sm:$0xff] }
 0x407   : > { %v1798_v54 = vsub.f32 %v1796_v60, %v1797_v44 }
 0x409   : > { %v1799_v12 = vadd.f32 1e-05, %v1798_v54 }
 0x40b   : > { %6424 = vrsqrt.f32 %v1799_v12 }
 0x415   : > { %v6425_v38 = vpop.eup %6424 }
 0x416   : > { %v1801_v37 = vmul.f32 %v6425_v38, %v1734_v22 }
 0x418   : > { %v1802_v62 = vmul.f32 %v1801_v37, %v1766_v57  ;;  %v1807_v26 = vrot.slane %v1801_v37, %v7477_v20 }
 0x41a   : > { %v1803_v27 = vsub.f32 %v1735_v42, %v1802_v62  ;;  %v1814_v0 = vmul.f32 %v1807_v26, %v7461_v32  ;;  %v1808_v2 = vmul.f32 %v1807_v26, %v7417_v8  ;;  %v1809_v48 = vmul.f32 %v7411_v7, %v1807_v26 }
 0x41b   : > { %v1810_v45 = vmul.f32 %v1807_v26, %v7429_v30  ;;  %v1811_v1 = vmul.f32 %v7427_v29, %v1807_v26  ;;  %v1812_v28 = vmul.f32 %v1807_v26, %v7446_v17  ;;  %v1813_v5 = vmul.f32 %v7442_v50, %v1807_v26 }
 0x41c   : > { %v1819_v11 = vrot.slane %v1803_v27, %v7477_v20  ;;  %v1815_v23 = vmul.f32 %v7458_v56, %v1807_v26 }
 0x41e   : > { %v1826_v53 = vadd.f32 %v1819_v11, %v1814_v0  ;;  %v1820_v18 = vadd.f32 %v1819_v11, %v1808_v2  ;;  %v1821_v6 = vadd.f32 %v1819_v11, %v1809_v48  ;;  %v1822_v31 = vadd.f32 %v1819_v11, %v1810_v45 }
 0x41f   : > { %v1823_v40 = vadd.f32 %v1819_v11, %v1811_v1  ;;  %v1824_v43 = vadd.f32 %v1819_v11, %v1812_v28  ;;  %v1825_v21 = vadd.f32 %v1819_v11, %v1813_v5  ;;  %v1827_v14 = vadd.f32 %v1819_v11, %v1815_v23 }
 0x420   : > { %v1828_v41 = vmax.f32 %v1820_v18, 0.0  ;;  %v1829_v46 = vmax.f32 %v1821_v6, 0.0  ;;  %v1830_v52 = vmax.f32 %v1822_v31, 0.0  ;;  %v1834_v55 = vmax.f32 %v1826_v53, 0.0 }
 0x421   : > { %v1831_v25 = vmax.f32 %v1823_v40, 0.0  ;;  %v1832_v34 = vmax.f32 %v1824_v43, 0.0  ;;  %v1833_v15 = vmax.f32 %v1825_v21, 0.0  ;;  %v1835_v57 = vmax.f32 %v1827_v14, 0.0 }
 0x422   : > { %5919 = vmatprep.mubr.msk.f32.mxu1 %vm1744_vm14, %v1828_v41 }
 0x423   : > { %5920 = vmatmul.mubr.msk.f32.vlgmr.msra.gmra.mrb[8].mxu1 %vm1744_vm14, %v1829_v46 }
 0x424   : > { %5922 = vmatprep.mubr.msk.f32.mxu1 %vm1744_vm14, %v1830_v52 }
 0x427   : > { %5923 = vmatmul.mubr.msk.f32.gmra.mrb[10].mxu1 %vm1744_vm14, %v1831_v25 }
 0x428   : > { %5925 = vmatprep.mubr.msk.f32.mxu1 %vm1744_vm14, %v1832_v34 }
 0x42b   : > { %5926 = vmatmul.mubr.msk.f32.gmra.mrb[12].mxu1 %vm1744_vm14, %v1833_v15 }
 0x42c   : > { %5928 = vmatprep.mubr.msk.f32.mxu1 %vm1744_vm14, %v1834_v55 }
 0x42f   : > { %5929 = vmatmul.mubr.msk.f32.gmra.mrb[14].mxu1 %vm1744_vm14, %v1835_v57 }
 0x430   : > { %5963 = vmatprep.mubr.msk.f32.mxu1 %vm1324_vm15, %v7500_v9 }
 0x4f6   : > { %v5921_v60 = vpop.f32.mrb[8].mxu1 }
 0x4f7   : > { %v7506_v44 = vadd.f32 %v5921_v60, %v5560_v16  ;;  %v1931_v54 = vpop.f32.mrb[9].mxu1 }
 0x4f8   : > { %v7508_v12 = vadd.f32 %v5560_v16, %v1931_v54 }
 0x4f9   : > { %v1972_v22 = vsel %vm1970_vm3, %v7506_v44, 0.0  ;;  %v1994_v10 = vmul.f32 %v7506_v44, %v7506_v44 }
 0x4fa   : > { %v1971_v38 = vsel %vm1970_vm3, %v7508_v12, 0.0  ;;  %v1993_v37 = vmul.f32 %v7508_v12, %v7508_v12  ;;  %v5924_v42 = vpop.f32.mrb[10].mxu1 }
 0x4fb   : > { %v2002_v62 = vsel %vm1970_vm3, %v1994_v10, 0.0  ;;  %v1973_v26 = vadd.f32 %v1972_v22, %v1971_v38  ;;  %v7519_v27 = vadd.f32 %v5924_v42, %v5560_v16  ;;  %v1941_v0 = vpop.f32.mrb[11].mxu1 }
 0x4fc   : > { %v2001_v2 = vsel %vm1970_vm3, %v1993_v37, 0.0  ;;  %v7522_v48 = vadd.f32 %v5560_v16, %v1941_v0 }
 0x4fd   : > { %v2003_v45 = vadd.f32 %v2002_v62, %v2001_v2  ;;  %v1996_v1 = vmul.f32 %v7519_v27, %v7519_v27  ;;  %v1976_v6 = vsel %vm1970_vm3, %v7519_v27, 0.0 }
 0x4fe   : > { %v1974_v28 = vsel %vm1970_vm3, %v7522_v48, 0.0  ;;  %v1995_v5 = vmul.f32 %v7522_v48, %v7522_v48  ;;  %v5927_v11 = vpop.f32.mrb[12].mxu1 }
 0x4ff   : > { %v1975_v23 = vadd.f32 %v1974_v28, %v1973_v26  ;;  %v7530_v53 = vadd.f32 %v5927_v11, %v5560_v16  ;;  %v1951_v18 = vpop.f32.mrb[13].mxu1  ;;  %v2006_v14 = vsel %vm1970_vm3, %v1996_v1, 0.0 }
 0x500   : > { %v2004_v31 = vsel %vm1970_vm3, %v1995_v5, 0.0  ;;  %v7535_v40 = vadd.f32 %v5560_v16, %v1951_v18 }
 0x501   : > { %v2005_v43 = vadd.f32 %v2004_v31, %v2003_v45  ;;  %v1977_v21 = vadd.f32 %v1976_v6, %v1975_v23  ;;  %v1998_v41 = vmul.f32 %v7530_v53, %v7530_v53  ;;  %v1980_v60 = vsel %vm1970_vm3, %v7530_v53, 0.0 }
 0x502   : > { %v1978_v46 = vsel %vm1970_vm3, %v7535_v40, 0.0  ;;  %v1997_v52 = vmul.f32 %v7535_v40, %v7535_v40  ;;  %v5930_v25 = vpop.f32.mrb[14].mxu1 }
 0x503   : > { %v1979_v34 = vadd.f32 %v1978_v46, %v1977_v21  ;;  %v2007_v15 = vadd.f32 %v2006_v14, %v2005_v43  ;;  %v1967_v55 = vadd.f32 %v5930_v25, %v5560_v16  ;;  %v1961_v57 = vpop.f32.mrb[15].mxu1  ;;  %v2010_v37 = vsel %vm1970_vm3, %v1998_v41, 0.0 }
 0x504   : > { %v2008_v54 = vsel %vm1970_vm3, %v1997_v52, 0.0  ;;  %v1962_v22 = vadd.f32 %v5560_v16, %v1961_v57 }
 0x505   : > { %v2009_v10 = vadd.f32 %v2008_v54, %v2007_v15  ;;  %v1981_v38 = vadd.f32 %v1980_v60, %v1979_v34  ;;  %v2000_v42 = vmul.f32 %v1967_v55, %v1967_v55  ;;  %v1984_v45 = vsel %vm1970_vm3, %v1967_v55, 0.0 }
 0x506   : > { %v1982_v62 = vsel %vm1970_vm3, %v1962_v22, 0.0  ;;  %v1999_v26 = vmul.f32 %v1962_v22, %v1962_v22 }
 0x507   : > { %v1983_v0 = vadd.f32 %v1982_v62, %v1981_v38  ;;  %v2011_v2 = vadd.f32 %v2010_v37, %v2009_v10  ;;  %v2014_v11 = vsel %vm1970_vm3, %v2000_v42, 0.0  ;;  %v2084_v38 = vand.u32 31, %v7371_v58  ;;  %v1737_v37 = vld [vmem:[%s6678_s28 + $0x6] sm:$0x1] }
 0x508   : > { %v2012_v1 = vsel %vm1970_vm3, %v1999_v26, 0.0 }
 0x509   : > { %v1985_v28 = vadd.f32 %v1984_v45, %v1983_v0  ;;  %v2013_v5 = vadd.f32 %v2012_v1, %v2011_v2  ;;  %v2156_v62 = vadd.s32 4294967295, %v2084_v38  ;;  %v1738_v0 = vld [vmem:[%s6678_s28 + $0x7] sm:$0x1] }
 0x50b   : > { %v1986_v23 = vrot.slane %v1985_v28, 4  ;;  %v2015_v16 = vadd.f32 %v2014_v11, %v2013_v5  ;;  %vm2164_vm6 = vcmp.ge.s32.totalorder %v2156_v62, 0 }
 0x50d   : > { %v1987_v18 = vadd.f32 %v1986_v23, %v1985_v28  ;;  %v2016_v6 = vrot.slane %v2015_v16, 4 }
 0x50f   : > { %v1988_v31 = vrot.slane %v1987_v18, 2  ;;  %v2017_v43 = vadd.f32 %v2016_v6, %v2015_v16 }
 0x511   : > { %v1989_v21 = vadd.f32 %v1988_v31, %v1987_v18  ;;  %v2018_v14 = vrot.slane %v2017_v43, 2 }
 0x513   : > { %v1990_v41 = vrot.slane %v1989_v21, 1  ;;  %v2019_v46 = vadd.f32 %v2018_v14, %v2017_v43 }
 0x515   : > { %v1991_v52 = vadd.f32 %v1990_v41, %v1989_v21  ;;  %v2020_v25 = vrot.slane %v2019_v46, 1  ;;  %v7565_v21 = vsel %vm2164_vm6, 1.0, %v8444_v59  ;;  %vm6466_vm6 = vmmov 1  }
 0x517   : > { %v1992_v34 = vmul.f32 0.015625, %v1991_v52  ;;  %v2021_v15 = vadd.f32 %v2020_v25, %v2019_v46 }
 0x519   : > { %v2022_v57 = vmul.f32 0.015625, %v2021_v15  ;;  %v2023_v60 = vmul.f32 %v1992_v34, %v1992_v34 }
 0x51b   : > { %v2024_v54 = vsub.f32 %v2022_v57, %v2023_v60 }
 0x51d   : > { %v2025_v10 = vadd.f32 1e-05, %v2024_v54 }
 0x51f   : > { %6426 = vrsqrt.f32 %v2025_v10 }
 0x529   : > { %v6427_v42 = vpop.eup %6426 }
 0x52a   : > { %v2027_v26 = vmul.f32 %v6427_v42, %v1737_v37 }
 0x52c   : > { %v2028_v2 = vmul.f32 %v2027_v26, %v1992_v34  ;;  %v2033_v45 = vrot.slane %v2027_v26, %v7477_v20 }
 0x52e   : > { %v2029_v1 = vsub.f32 %v1738_v0, %v2028_v2  ;;  %v2040_v28 = vmul.f32 %v2033_v45, %v1962_v22  ;;  %v2035_v5 = vmul.f32 %v2033_v45, %v7506_v44  ;;  %v2034_v11 = vmul.f32 %v2033_v45, %v7508_v12 }
 0x52f   : > { %v2037_v23 = vmul.f32 %v2033_v45, %v7519_v27  ;;  %v2036_v16 = vmul.f32 %v2033_v45, %v7522_v48  ;;  %v2039_v58 = vmul.f32 %v2033_v45, %v7530_v53  ;;  %v2038_v18 = vmul.f32 %v2033_v45, %v7535_v40 }
 0x530   : > { %v2045_v6 = vrot.slane %v2029_v1, %v7477_v20  ;;  %v2041_v31 = vmul.f32 %v2033_v45, %v1967_v55  ;;  %v7567_v22 = vadd.s32 4294967294, %v2084_v38 }
 0x532   : > { %v2052_v44 = vadd.f32 %v2045_v6, %v2040_v28  ;;  %v2047_v12 = vadd.f32 %v2045_v6, %v2035_v5  ;;  %v2046_v14 = vadd.f32 %v2045_v6, %v2034_v11  ;;  %v2049_v27 = vadd.f32 %v2045_v6, %v2037_v23 }
 0x533   : > { %v2048_v41 = vadd.f32 %v2045_v6, %v2036_v16  ;;  %v2051_v48 = vadd.f32 %v2045_v6, %v2039_v58  ;;  %v2050_v46 = vadd.f32 %v2045_v6, %v2038_v18  ;;  %v2053_v53 = vadd.f32 %v2045_v6, %v2041_v31 }
 0x534   : > { %v7569_v52 = vmax.f32 %v2052_v44, 0.0  ;;  %v7571_v40 = vmax.f32 %v2047_v12, 0.0  ;;  %v7573_v55 = vmax.f32 %v2046_v14, 0.0  ;;  %v7575_v25 = vmax.f32 %v2049_v27, 0.0 }
 0x535   : > { %v7577_v34 = vmax.f32 %v2048_v41, 0.0  ;;  %v7579_v15 = vmax.f32 %v2051_v48, 0.0  ;;  %v7581_v57 = vmax.f32 %v2050_v46, 0.0  ;;  %v7583_v60 = vmax.f32 %v2053_v53, 0.0 }
 0x536   : > { %2370 = vrot.lane.b32.xlu1 %v7571_v40, %s6462_s13  ;;  %2368 = vrot.lane.b32.xlu0 %v7573_v55, %s6462_s13  ;;  %v2200_v54 = vrot.slane %v7573_v55, 1  ;;  %v2201_v10 = vrot.slane %v7571_v40, 1  ;;  %v2136_v38 = vrot.slane %v7573_v55, 7  ;;  %v2137_v37 = vrot.slane %v7571_v40, 7 }
 0x537   : > { %v2264_v42 = vrot.slane %v7573_v55, 2  ;;  %v2265_v62 = vrot.slane %v7571_v40, 2  ;;  %v2202_v26 = vrot.slane %v7577_v34, 1  ;;  %v2266_v0 = vrot.slane %v7577_v34, 2 }
 0x538   : > { %v2214_v2 = vsel %vm776_vm1, %v2200_v54, %v2201_v10  ;;  %v2150_v45 = vsel %vm647_vm4, %v2136_v38, %v2137_v37  ;;  %v2138_v1 = vrot.slane %v7577_v34, 7  ;;  %v2203_v28 = vrot.slane %v7575_v25, 1 }
 0x539   : > { %v2278_v5 = vsel %vm8419_vm2, %v2264_v42, %v2265_v62  ;;  %v2213_v11 = vsel %vm776_vm1, %v2201_v10, %v2202_v26  ;;  %v7609_v23 = vsel %vm8419_vm2, %v2265_v62, %v2266_v0  ;;  %v2139_v16 = vrot.slane %v7575_v25, 7 }
 0x53a   : > { %2374 = vrot.lane.b32.xlu1 %v7575_v25, %s6462_s13  ;;  %2372 = vrot.lane.b32.xlu0 %v7577_v34, %s6462_s13  ;;  %v7618_v58 = vsel %vm647_vm4, %v2137_v37, %v2138_v1  ;;  %v7622_v18 = vsel %vm776_vm1, %v2202_v26, %v2203_v28  ;;  %v2267_v6 = vrot.slane %v7575_v25, 2  ;;  %v2140_v31 = vrot.slane %v7581_v57, 7 }
 0x53b   : > { %v7628_v44 = vsel %vm647_vm4, %v2138_v1, %v2139_v16  ;;  %v2141_v12 = vrot.slane %v7579_v15, 7  ;;  %v2204_v14 = vrot.slane %v7581_v57, 1  ;;  %v2205_v27 = vrot.slane %v7579_v15, 1 }
 0x53c   : > { %v7635_v41 = vsel %vm8419_vm2, %v2266_v0, %v2267_v6  ;;  %v2206_v48 = vrot.slane %v7569_v52, 1  ;;  %v2268_v46 = vrot.slane %v7581_v57, 2  ;;  %v2269_v53 = vrot.slane %v7579_v15, 2 }
 0x53d   : > { %v7642_v10 = vsel %vm647_vm4, %v2140_v31, %v2141_v12  ;;  %v7646_v37 = vsel %vm776_vm1, %v2204_v14, %v2205_v27  ;;  %v2142_v62 = vrot.slane %v7569_v52, 7  ;;  %v2270_v26 = vrot.slane %v7569_v52, 2 }
 0x53e   : > { %2378 = vrot.lane.b32.xlu1 %v7579_v15, %s6462_s13  ;;  %2376 = vrot.lane.b32.xlu0 %v7581_v57, %s6462_s13  ;;  %v2209_v0 = vsel %vm776_vm1, %v2205_v27, %v2206_v48  ;;  %v7658_v1 = vsel %vm8419_vm2, %v2268_v46, %v2269_v53  ;;  %v2143_v19 = vrot.slane %v7583_v60, 7  ;;  %v7663_v3 = vsel %vm776_vm1, %v2203_v28, %v2204_v14 }
 0x53f   : > { %v2145_v36 = vsel %vm647_vm4, %v2141_v12, %v2142_v62  ;;  %v7669_v33 = vsel %vm8419_vm2, %v2269_v53, %v2270_v26  ;;  %v7673_v27 = vsel %vm8419_vm2, %v2267_v6, %v2268_v46  ;;  %v2147_v12 = vsel %vm647_vm4, %v2139_v16, %v2140_v31  ;;  %v2062_v16 = vld [vmem:[%s6925_s12 + $0x58] sm:$0xff]  ;;  %v2063_v31 = vld [vmem:[%s6925_s12 + $0x60] sm:$0x3] }
 0x540   : > { %v7677_v43 = vsel %vm647_vm4, %v2142_v62, %v2143_v19  ;;  %v7681_v28 = vsel %vm647_vm4, %v2143_v19, %v2136_v38  ;;  %v8445_v14 = vand.u32 31, %v8428_v61  ;;  %v7688_v39 = vmul.f32 %v7565_v21, %v2147_v12 }
 0x541   : > { %v2207_v6 = vrot.slane %v7583_v60, 1  ;;  %v2271_v46 = vrot.slane %v7583_v60, 2  ;;  %vm2100_vm7 = vcmp.ge.s32.totalorder %v7567_v22, 0  ;;  %v2065_v19 = vrot.slane %v7571_v40, 6 }
 0x542   : > { %v2088_v53 = vadd.s32 4294967294, %v8445_v14  ;;  %2400 = vrot.lane.b32.xlu0 %v2214_v2, %s6463_s14  ;;  %2338 = vrot.lane.b32.xlu1 %v2150_v45, %s6464_s17  ;;  %v2064_v38 = vrot.slane %v7573_v55, 6  ;;  %v2066_v55 = vrot.slane %v7577_v34, 6  ;;  %v2068_v34 = vrot.slane %v7581_v57, 6 }
 0x543   : > { %v7701_v21 = vsel %vm776_vm1, %v2206_v48, %v2207_v6  ;;  %v7705_v62 = vsel %vm776_vm1, %v2207_v6, %v2200_v54  ;;  %v7709_v2 = vsel %vm8419_vm2, %v2270_v26, %v2271_v46  ;;  %v7713_v45 = vsel %vm8419_vm2, %v2271_v46, %v2264_v42  ;;  %vm6232_vm2 = vmpackc.low %vm2519_vm12, %vm6466_vm6 }
 0x544   : > { %v7717_v40 = vsel %vm487_vm5, %v2064_v38, %v2065_v19  ;;  %vm2096_vm11 = vcmp.ge.s32.totalorder %v2088_v53, 0  ;;  %v2124_v54 = vsel %vm2100_vm7, 1.0, %v8444_v59  ;;  %v6231_v48 = vpack.c.bf16 %v2063_v31, %v2062_v16 }
 0x545   : > { %v2067_v26 = vrot.slane %v7575_v25, 6  ;;  %v7728_v42 = vsel %vm487_vm5, %v2065_v19, %v2066_v55  ;;  %v2069_v22 = vrot.slane %v7579_v15, 6  ;;  %v2070_v12 = vrot.slane %v7569_v52, 6 }
 0x546   : > { %2432 = vrot.lane.b32.xlu0 %v2278_v5, %s6465_s18  ;;  %2402 = vrot.lane.b32.xlu1 %v2213_v11, %s6463_s14  ;;  %v2071_v5 = vrot.slane %v7583_v60, 6  ;;  %v2120_v11 = vsel %vm2096_vm11, 1.0, %v8444_v59  ;;  %v8449_v16 = vpack.i.bf16 %v7442_v50, %v7446_v17  ;;  %v8450_v31 = vpack.i.bf16 %v7458_v56, %v7461_v32 }
 0x547   : > { %6233 = vmatprep.subr.msk.bf16.mxu0 %vm6232_vm2, %v6231_v48  ;;  %v7736_v25 = vsel %vm487_vm5, %v2066_v55, %v2067_v26  ;;  %v7743_v14 = vsel %vm487_vm5, %v2068_v34, %v2069_v22  ;;  %v7747_v15 = vsel %vm487_vm5, %v2069_v22, %v2070_v12  ;;  %v2075_v57 = vsel %vm487_vm5, %v2067_v26, %v2068_v34 }
 0x548   : > { %6236 = vmatpush3.bf16.msk.msra.mxu0 %vm6232_vm2, %v6231_v48  ;;  %v7753_v6 = vsel %vm487_vm5, %v2070_v12, %v2071_v5  ;;  %v2079_v53 = vsel %vm487_vm5, %v2071_v5, %v2064_v38  ;;  %v7757_v46 = vmul.f32 %v2124_v54, %v2075_v57  ;;  %v2083_v38 = vand.u32 31, %v7367_v49 }
 0x549   : > { %v7763_v19 = vmul.f32 %v2120_v11, %v2079_v53 }
 0x54a   : > { %2434 = vrot.lane.b32.xlu0 %v7609_v23, %s6465_s18  ;;  %2340 = vrot.lane.b32.xlu1 %v7618_v58, %s6464_s17  ;;  %v8446_v23 = vand.u32 31, %v8428_v61 }
 0x54c   : > { %v2152_v58 = vadd.s32 4294967295, %v8446_v23 }
 0x54e   : > { %2404 = vrot.lane.b32.xlu0 %v7622_v18, %s6463_s14  ;;  %2342 = vrot.lane.b32.xlu1 %v7628_v44, %s6464_s17  ;;  %vm2160_vm2 = vcmp.ge.s32.totalorder %v2152_v58, 0  ;;  %v2219_v18 = vadd.s32 1, %v2083_v38 }
 0x54f   : > { %v2184_v44 = vsel %vm2160_vm2, 1.0, %v8444_v59 }
 0x550   : > { %vm2235_vm7 = vcmp.lt.s32.totalorder %v2219_v18, 32 }
 0x552   : > { %2436 = vrot.lane.b32.xlu0 %v7635_v41, %s6465_s18  ;;  %2346 = vrot.lane.b32.xlu1 %v7642_v10, %s6464_s17  ;;  %v2283_v41 = vadd.s32 2, %v2083_v38  ;;  %v2087_v10 = vand.u32 31, %v8443_v13 }
 0x554   : > { %vm2299_vm11 = vcmp.lt.s32.totalorder %v2283_v41, 32  ;;  %v2287_v13 = vadd.s32 2, %v2087_v10 }
 0x556   : > { %2408 = vrot.lane.b32.xlu0 %v7646_v37, %s6463_s14  ;;  %2410 = vrot.lane.b32.xlu1 %v2209_v0, %s6463_s14  ;;  %v2192_v37 = vmul.f32 %v2184_v44, %v7681_v28  ;;  %v2251_v0 = vsel %vm2235_vm7, 1.0, %v8444_v59  ;;  %vm2303_vm2 = vcmp.lt.s32.totalorder %v2287_v13, 32  ;;  %vm2464_vm7 = vcmask 31744  }
 0x55a   : > { %2440 = vrot.lane.b32.xlu0 %v7658_v1, %s6465_s18  ;;  %2348 = vrot.lane.b32.xlu1 %v2145_v36, %s6464_s17  ;;  %v2223_v36 = vadd.s32 1, %v2087_v10  ;;  %v2315_v1 = vsel %vm2299_vm11, 1.0, %v8444_v59  ;;  %vm2473_vm11 = vcmask 48128  }
 0x55c   : > { %vm2239_vm6 = vcmp.lt.s32.totalorder %v2223_v36, 32 }
 0x55d   : > { %v2255_v28 = vsel %vm2239_vm6, 1.0, %v8444_v59  ;;  %vm2494_vm6 = vcmask 80896  }
 0x55e   : > { %2442 = vrot.lane.b32.xlu0 %v7669_v33, %s6465_s18  ;;  %2350 = vrot.lane.b32.xlu1 %v7677_v43, %s6464_s17  ;;  %v2259_v33 = vmul.f32 %v2251_v0, %v7663_v3  ;;  %v2323_v43 = vmul.f32 %v2315_v1, %v7673_v27  ;;  %v2263_v3 = vmul.f32 %v2255_v28, %v7705_v62 }
 0x55f   : > { %v8448_v27 = vpack.i.bf16 %v7427_v29, %v7429_v30 }
 0x562   : > { %2336 = vrot.lane.b32.xlu0 %v2192_v37, %s6464_s17  ;;  %2382 = vrot.lane.b32.xlu1 %v7583_v60, %s6462_s13  ;;  %v2319_v60 = vsel %vm2303_vm2, 1.0, %v8444_v59 }
 0x566   : > { %2380 = vrot.lane.b32.xlu0 %v7569_v52, %s6462_s13  ;;  %2406 = vrot.lane.b32.xlu1 %v2259_v33, %s6463_s14  ;;  %v2327_v52 = vmul.f32 %v2319_v60, %v7713_v45 }
 0x56a   : > { %2438 = vrot.lane.b32.xlu0 %v2323_v43, %s6465_s18  ;;  %2344 = vrot.lane.b32.xlu1 %v7688_v39, %s6464_s17  ;;  %v8447_v39 = vpack.i.bf16 %v7411_v7, %v7417_v8 }
 0x56e   : > { %2412 = vrot.lane.b32.xlu0 %v7701_v21, %s6463_s14  ;;  %2414 = vrot.lane.b32.xlu1 %v2263_v3, %s6463_s14 }
 0x572   : > { %2444 = vrot.lane.b32.xlu0 %v7709_v2, %s6465_s18  ;;  %2446 = vrot.lane.b32.xlu1 %v2327_v52, %s6465_s18 }
 0x576   : > { %6388 = vrot.lane.b32.xlu0 %v8447_v39, %s6464_s17  ;;  %6393 = vrot.lane.b32.xlu1 %v8448_v27, %s6464_s17 }
 0x57a   : > { %6398 = vrot.lane.b32.xlu0 %v8449_v16, %s6464_s17  ;;  %6403 = vrot.lane.b32.xlu1 %v8450_v31, %s6464_s17 }
 0x5a8   : > { %v2371_v21 = vpop.permute.xlu1 %2370  ;;  %v2369_v62 = vpop.permute.xlu0 %2368 }
 0x5ac   : > { %v2375_v2 = vpop.permute.xlu1 %2374  ;;  %v2373_v7 = vpop.permute.xlu0 %2372 }
 0x5b0   : > { %v2379_v8 = vpop.permute.xlu1 %2378  ;;  %v2377_v45 = vpop.permute.xlu0 %2376 }
 0x5b4   : > { %v2401_v55 = vpop.permute.xlu0 %2400  ;;  %v2339_v54 = vpop.permute.xlu1 %2338 }
 0x5b5   : > { %v2457_v53 = vsel %vm1970_vm3, %v7717_v40, %v2339_v54 }
 0x5b6   : > { %v2466_v41 = vsel %vm2464_vm7, %v2457_v53, %v2371_v21 }
 0x5b8   : > { %v2433_v29 = vpop.permute.xlu0 %2432  ;;  %v2403_v30 = vpop.permute.xlu1 %2402 }
 0x5b9   : > { %v2475_v37 = vsel %vm2473_vm11, %v2466_v41, %v2403_v30 }
 0x5bc   : > { %v2435_v48 = vpop.permute.xlu0 %2434  ;;  %v2341_v26 = vpop.permute.xlu1 %2340 }
 0x5bd   : > { %v2458_v38 = vsel %vm1970_vm3, %v7728_v42, %v2341_v26 }
 0x5be   : > { %v2467_v40 = vsel %vm2464_vm7, %v2458_v38, %v2373_v7 }
 0x5c0   : > { %v2405_v34 = vpop.permute.xlu0 %2404  ;;  %v2343_v50 = vpop.permute.xlu1 %2342 }
 0x5c1   : > { %v2459_v0 = vsel %vm1970_vm3, %v7736_v25, %v2343_v50  ;;  %v2476_v1 = vsel %vm2473_vm11, %v2467_v40, %v2405_v34  ;;  %v7884_v50 = vld [vmem:[%s6678_s28 + $0x8] ss:$0 sm:$0xff] }
 0x5c2   : > { %v2468_v43 = vsel %vm2464_vm7, %v2459_v0, %v2375_v2 }
 0x5c4   : > { %v2437_v17 = vpop.permute.xlu0 %2436  ;;  %v2347_v22 = vpop.permute.xlu1 %2346 }
 0x5c5   : > { %v2484_v13 = vsel %vm1744_vm14, %v2476_v1, %v2437_v17  ;;  %v2461_v25 = vsel %vm1970_vm3, %v7743_v14, %v2347_v22 }
 0x5c6   : > { %v2470_v16 = vsel %vm2464_vm7, %v2461_v25, %v2379_v8 }
 0x5c8   : > { %v2409_v12 = vpop.permute.xlu0 %2408  ;;  %v2411_v5 = vpop.permute.xlu1 %2410 }
 0x5c9   : > { %v2479_v21 = vsel %vm2473_vm11, %v2470_v16, %v2411_v5 }
 0x5cc   : > { %v2441_v56 = vpop.permute.xlu0 %2440  ;;  %v2349_v32 = vpop.permute.xlu1 %2348 }
 0x5d0   : > { %v2443_v11 = vpop.permute.xlu0 %2442  ;;  %v2351_v57 = vpop.permute.xlu1 %2350 }
 0x5d1   : > { %v2487_v7 = vsel %vm1744_vm14, %v2479_v21, %v2443_v11 }
 0x5d4   : > { %v2337_v23 = vpop.permute.xlu0 %2336  ;;  %v2383_v58 = vpop.permute.xlu1 %2382 }
 0x5d5   : > { %v2456_v18 = vsel %vm1970_vm3, %v7763_v19, %v2337_v23  ;;  %v2483_v19 = vsel %vm1744_vm14, %v2475_v37, %v2435_v48 }
 0x5d6   : > { %v2465_v44 = vsel %vm2464_vm7, %v2456_v18, %v2369_v62 }
 0x5d7   : > { %v2474_v10 = vsel %vm2473_vm11, %v2465_v44, %v2401_v55 }
 0x5d8   : > { %v2381_v36 = vpop.permute.xlu0 %2380  ;;  %v2407_v33 = vpop.permute.xlu1 %2406  ;;  %v2482_v42 = vsel %vm1744_vm14, %v2474_v10, %v2433_v29 }
 0x5d9   : > { %5935 = vmatprep.mubr.msk.f32.mxu0 %vm2494_vm6, %v2482_v42  ;;  %v2477_v28 = vsel %vm2473_vm11, %v2468_v43, %v2407_v33 }
 0x5da   : > { %5936 = vmatmul.mubr.msk.f32.vlgmr.msra.gmra.mrb[16].mxu0 %vm2494_vm6, %v2483_v19 }
 0x5db   : > { %5938 = vmatprep.mubr.msk.f32.mxu0 %vm2494_vm6, %v2484_v13 }
 0x5dc   : > { %v2439_v3 = vpop.permute.xlu0 %2438  ;;  %v2345_v60 = vpop.permute.xlu1 %2344 }
 0x5dd   : > { %v2485_v52 = vsel %vm1744_vm14, %v2477_v28, %v2439_v3  ;;  %v2460_v39 = vsel %vm1970_vm3, %v7757_v46, %v2345_v60  ;;  %v2462_v46 = vsel %vm1970_vm3, %v7747_v15, %v2349_v32 }
 0x5de   : > { %v2469_v27 = vsel %vm2464_vm7, %v2460_v39, %v2377_v45  ;;  %5939 = vmatmul.mubr.msk.f32.gmra.mrb[18].mxu0 %vm2494_vm6, %v2485_v52  ;;  %v2463_v45 = vsel %vm1970_vm3, %v7753_v6, %v2351_v57  ;;  %v2471_v55 = vsel %vm2464_vm7, %v2462_v46, %v2381_v36  ;;  %v7877_v6 = vld [vmem:[%s6925_s12 + $0x68] sm:$0x3] }
 0x5df   : > { %v2478_v31 = vsel %vm2473_vm11, %v2469_v27, %v2409_v12  ;;  %v2472_v8 = vsel %vm2464_vm7, %v2463_v45, %v2383_v58  ;;  %5969 = vmatprep.subr.msk.mxu0 %vm2519_vm12, %v7877_v6 }
 0x5e0   : > { %v2413_v14 = vpop.permute.xlu0 %2412  ;;  %v2415_v62 = vpop.permute.xlu1 %2414  ;;  %v2486_v2 = vsel %vm1744_vm14, %v2478_v31, %v2441_v56  ;;  %5970 = vmatpush3.msk.msra.mxu0 %vm2519_vm12, %v7877_v6 }
 0x5e1   : > { %5941 = vmatprep.mubr.msk.f32.mxu0 %vm2494_vm6, %v2486_v2  ;;  %v2480_v54 = vsel %vm2473_vm11, %v2471_v55, %v2413_v14  ;;  %v2481_v29 = vsel %vm2473_vm11, %v2472_v8, %v2415_v62 }
 0x5e2   : > { %5942 = vmatmul.mubr.msk.f32.gmra.mrb[20].mxu0 %vm2494_vm6, %v2487_v7 }
 0x5e4   : > { %v2445_v30 = vpop.permute.xlu0 %2444  ;;  %v2447_v48 = vpop.permute.xlu1 %2446 }
 0x5e5   : > { %v2488_v26 = vsel %vm1744_vm14, %v2480_v54, %v2445_v30  ;;  %v2489_v15 = vsel %vm1744_vm14, %v2481_v29, %v2447_v48 }
 0x5e6   : > { %5944 = vmatprep.mubr.msk.f32.mxu0 %vm2494_vm6, %v2488_v26 }
 0x5e7   : > { %5945 = vmatmul.mubr.msk.f32.gmra.mrb[22].mxu0 %vm2494_vm6, %v2489_v15 }
 0x5e8   : > { %v6389_v34 = vpop.permute.xlu0 %6388  ;;  %v6394_v12 = vpop.permute.xlu1 %6393 }
 0x5e9   : > { %v6391_v22 = vunpack.i.h.bf16 %v6389_v34  ;;  %v6390_v32 = vunpack.i.l.bf16 %v6389_v34  ;;  %v6396_v58 = vunpack.i.h.bf16 %v6394_v12  ;;  %v6395_v33 = vunpack.i.l.bf16 %v6394_v12 }
 0x5ec   : > { %v6399_v42 = vpop.permute.xlu0 %6398  ;;  %v6404_v46 = vpop.permute.xlu1 %6403 }
 0x5ed   : > { %v6401_v39 = vunpack.i.h.bf16 %v6399_v42  ;;  %v6400_v14 = vunpack.i.l.bf16 %v6399_v42  ;;  %v6406_v12 = vunpack.i.h.bf16 %v6404_v46 }
 0x6ad   : > { %v5937_v17 = vpop.f32.mrb[16].mxu0 }
 0x6ae   : > { %v2595_v5 = vadd.f32 %v5937_v17, %v7884_v50  ;;  %v2589_v56 = vpop.f32.mrb[17].mxu0 }
 0x6af   : > { %v2590_v11 = vadd.f32 %v7884_v50, %v2589_v56 }
 0x6b0   : > { %v2629_v57 = vsel %vm1970_vm3, %v2595_v5, 0.0  ;;  %v2651_v53 = vmul.f32 %v2595_v5, %v2595_v5  ;;  %v2720_v23 = vsel %vm1970_vm3, %v2595_v5, %v6391_v22 }
 0x6b1   : > { %v2628_v38 = vsel %vm1970_vm3, %v2590_v11, 0.0  ;;  %v2650_v18 = vmul.f32 %v2590_v11, %v2590_v11  ;;  %v5940_v44 = vpop.f32.mrb[18].mxu0  ;;  %v2719_v41 = vsel %vm1970_vm3, %v2590_v11, %v6390_v32 }
 0x6b2   : > { %v2659_v10 = vsel %vm1970_vm3, %v2651_v53, 0.0  ;;  %v2630_v37 = vadd.f32 %v2629_v57, %v2628_v38  ;;  %v2605_v40 = vadd.f32 %v5940_v44, %v7884_v50  ;;  %v2599_v0 = vpop.f32.mrb[19].mxu0  ;;  %v6237_v36 = vpack.c.bf16 %v2720_v23, %v2719_v41 }
 0x6b3   : > { %v2658_v19 = vsel %vm1970_vm3, %v2650_v18, 0.0  ;;  %v2600_v1 = vadd.f32 %v7884_v50, %v2599_v0  ;;  %v6405_v57 = vunpack.i.l.bf16 %v6404_v46 }
 0x6b4   : > { %v2660_v13 = vadd.f32 %v2659_v10, %v2658_v19  ;;  %v2653_v43 = vmul.f32 %v2605_v40, %v2605_v40  ;;  %6238 = vmatprep.subr.bf16.mxu1 %v6237_v36  ;;  %v2722_v25 = vsel %vm1970_vm3, %v2605_v40, %v6396_v58  ;;  %v2633_v62 = vsel %vm1970_vm3, %v2605_v40, 0.0 }
 0x6b5   : > { %v2631_v28 = vsel %vm1970_vm3, %v2600_v1, 0.0  ;;  %v2652_v3 = vmul.f32 %v2600_v1, %v2600_v1  ;;  %v5943_v60 = vpop.f32.mrb[20].mxu0  ;;  %6240 = vmatpush3.bf16.msra.mxu1 %v6237_v36  ;;  %v2721_v52 = vsel %vm1970_vm3, %v2600_v1, %v6395_v33  ;;  %v7920_v1 = vsel %vm7374_vm8, 1.0, %v8444_v59 }
 0x6b6   : > { %v2632_v27 = vadd.f32 %v2631_v28, %v2630_v37  ;;  %v2615_v16 = vadd.f32 %v5943_v60, %v7884_v50  ;;  %v2609_v31 = vpop.f32.mrb[21].mxu0  ;;  %v6241_v21 = vpack.c.bf16 %v2722_v25, %v2721_v52  ;;  %v2663_v45 = vsel %vm1970_vm3, %v2653_v43, 0.0 }
 0x6b7   : > { %v2661_v2 = vsel %vm1970_vm3, %v2652_v3, 0.0  ;;  %v2610_v7 = vadd.f32 %v7884_v50, %v2609_v31  ;;  %v1623_v28 = vsel %vm7381_vm9, 1.0, %v8444_v59  ;;  %vm8451_vm9 = vcmp.lt.s32.totalorder %v8428_v61, 6 }
 0x6b8   : > { %v2662_v8 = vadd.f32 %v2661_v2, %v2660_v13  ;;  %v2655_v55 = vmul.f32 %v2615_v16, %v2615_v16  ;;  %v2634_v54 = vadd.f32 %v2633_v62, %v2632_v27  ;;  %6242 = vmatprep.subr.bf16.mxu1 %v6241_v21  ;;  %v2724_v26 = vsel %vm1970_vm3, %v2615_v16, %v6401_v39  ;;  %vm8452_vm2 = vmmov %vm8451_vm9 }
 0x6b9   : > { %v2635_v29 = vsel %vm1970_vm3, %v2610_v7, 0.0  ;;  %v2654_v30 = vmul.f32 %v2610_v7, %v2610_v7  ;;  %6244 = vmatpush3.bf16.msra.mxu1 %v6241_v21  ;;  %v2723_v48 = vsel %vm1970_vm3, %v2610_v7, %v6400_v14  ;;  %v2637_v5 = vsel %vm1970_vm3, %v2615_v16, 0.0  ;;  %vm8453_vm11 = vmmov %vm8452_vm2 }
 0x6ba   : > { %v2636_v15 = vadd.f32 %v2635_v29, %v2634_v54  ;;  %v2664_v34 = vadd.f32 %v2663_v45, %v2662_v8  ;;  %v5946_v17 = vpop.f32.mrb[22].mxu0  ;;  %v6245_v22 = vpack.c.bf16 %v2724_v26, %v2723_v48  ;;  %v2667_v38 = vsel %vm1970_vm3, %v2655_v55, 0.0  ;;  %v1741_v29 = vld [vmem:[%s6678_s28 + $0xa] sm:$0x1]  ;;  %vm8454_vm6 = vmmov %vm8452_vm2 }
 0x6bb   : > { %v2665_v56 = vsel %vm1970_vm3, %v2654_v30, 0.0  ;;  %v2625_v32 = vadd.f32 %v5946_v17, %v7884_v50  ;;  %v2619_v11 = vpop.f32.mrb[23].mxu0 }
 0x6bc   : > { %v2666_v53 = vadd.f32 %v2665_v56, %v2664_v34  ;;  %v2620_v23 = vadd.f32 %v7884_v50, %v2619_v11  ;;  %v2638_v58 = vadd.f32 %v2637_v5, %v2636_v15  ;;  %6246 = vmatprep.subr.bf16.mxu1 %v6245_v22 }
 0x6bd   : > { %v2657_v18 = vmul.f32 %v2625_v32, %v2625_v32  ;;  %6248 = vmatpush3.bf16.msra.mxu1 %v6245_v22  ;;  %v2726_v44 = vsel %vm1970_vm3, %v2625_v32, %v6406_v12  ;;  %v2641_v33 = vsel %vm1970_vm3, %v2625_v32, 0.0 }
 0x6be   : > { %v2639_v41 = vsel %vm1970_vm3, %v2620_v23, 0.0  ;;  %v2656_v10 = vmul.f32 %v2620_v23, %v2620_v23  ;;  %v2668_v37 = vadd.f32 %v2667_v38, %v2666_v53  ;;  %v2725_v40 = vsel %vm1970_vm3, %v2620_v23, %v6405_v57 }
 0x6bf   : > { %v2640_v0 = vadd.f32 %v2639_v41, %v2638_v58  ;;  %v6249_v36 = vpack.c.bf16 %v2726_v44, %v2725_v40  ;;  %v2671_v13 = vsel %vm1970_vm3, %v2657_v18, 0.0  ;;  %v2969_v41 = vld [vmem:[%s6925_s12 + $0x70] sm:$0xff] }
 0x6c0   : > { %v2669_v50 = vsel %vm1970_vm3, %v2656_v10, 0.0  ;;  %v5583_v10 = vld [vmem:[%s6678_s28 + $0xb] ss:$0 sm:$0xff] }
 0x6c1   : > { %v2642_v42 = vadd.f32 %v2641_v33, %v2640_v0  ;;  %v2670_v19 = vadd.f32 %v2669_v50, %v2668_v37  ;;  %6250 = vmatprep.subr.bf16.mxu1 %v6249_v36 }
 0x6c2   : > { %6252 = vmatpush3.bf16.msra.mxu1 %v6249_v36 }
 0x6c3   : > { %v2643_v43 = vrot.slane %v2642_v42, 4  ;;  %v2672_v25 = vadd.f32 %v2671_v13, %v2670_v19  ;;  %6352 = vmatprep.subr.msk.mxu1 %vm2519_vm12, %v7877_v6 }
 0x6c5   : > { %v2644_v3 = vadd.f32 %v2643_v43, %v2642_v42  ;;  %v2673_v60 = vrot.slane %v2672_v25, 4  ;;  %5964 = vmatmul.mubr.msk.f32.vlgmr.msra.gmra.mrb[16].mxu1 %vm1324_vm15, %v7920_v1 }
 0x6c6   : > { %5966 = vmatprep.mubr.msk.f32.mxu1 %vm1324_vm15, %v1623_v28  ;;  %6353 = vmatpush3.msk.msra.mxu1 %vm2519_vm12, %v7877_v6  ;;  %v1740_v6 = vld [vmem:[%s6678_s28 + $0x9] sm:$0x1] }
 0x6c7   : > { %v2645_v52 = vrot.slane %v2644_v3, 2  ;;  %v2674_v35 = vadd.f32 %v2673_v60, %v2672_v25  ;;  %5977 = vmatprep.subr.mxu1 %v2969_v41 }
 0x6c9   : > { %v2646_v39 = vadd.f32 %v2645_v52, %v2644_v3  ;;  %v2675_v27 = vrot.slane %v2674_v35, 2  ;;  %5967 = vmatmul.mubr.msk.f32.gmra.mrb[18].mxu1 %vm1324_vm15, %v1624_v63 }
 0x6cb   : > { %v2647_v16 = vrot.slane %v2646_v39, 1  ;;  %v2676_v31 = vadd.f32 %v2675_v27, %v2674_v35  ;;  %v3140_v35 = vld [vmem:[%s6925_s12 + $0x78] sm:$0xff] }
 0x6cd   : > { %v2648_v21 = vadd.f32 %v2647_v16, %v2646_v39  ;;  %v2677_v14 = vrot.slane %v2676_v31, 1  ;;  %v3141_v39 = vld [vmem:[%s6925_s12 + $0x80] sm:$0xff]  ;;  %v5589_v16 = vld [vmem:[%s6678_s28 + $0xc] ss:$0 sm:$0xff] }
 0x6ce   : > { %v6253_v27 = vpack.c.bf16 %v3141_v39, %v3140_v35 }
 0x6cf   : > { %v2649_v62 = vmul.f32 0.015625, %v2648_v21  ;;  %v2678_v2 = vadd.f32 %v2677_v14, %v2676_v31 }
 0x6d0   : > { %6254 = vmatprep.subr.bf16.mxu0 %v6253_v27 }
 0x6d1   : > { %v2679_v7 = vmul.f32 0.015625, %v2678_v2  ;;  %v2680_v24 = vmul.f32 %v2649_v62, %v2649_v62 }
 0x6d3   : > { %v2681_v46 = vsub.f32 %v2679_v7, %v2680_v24 }
 0x6d5   : > { %v2682_v45 = vadd.f32 1e-05, %v2681_v46 }
 0x6d7   : > { %6428 = vrsqrt.f32 %v2682_v45 }
 0x6e1   : > { %v6429_v8 = vpop.eup %6428 }
 0x6e2   : > { %v2684_v55 = vmul.f32 %v6429_v8, %v1740_v6 }
 0x6e4   : > { %v2685_v54 = vmul.f32 %v2684_v55, %v2649_v62  ;;  %v2827_v48 = vrot.slane %v2684_v55, %v7477_v20 }
 0x6e6   : > { %v2686_v30 = vsub.f32 %v1741_v29, %v2685_v54 }
 0x6e8   : > { %v2835_v34 = vrot.slane %v2686_v30, %v7477_v20 }
 0x798   : > { %v5965_v26 = vpop.f32.mrb[16].mxu1 }
 0x799   : > { %v2829_v15 = vmul.f32 %v5965_v26, %v2827_v48  ;;  %2955 = vrot.lane.b32.xlu1 %v5965_v26, %s6467_s19  ;;  %v2805_v17 = vpop.f32.mrb[17].mxu1 }
 0x79a   : > { %v2828_v22 = vmul.f32 %v2827_v48, %v2805_v17  ;;  %2953 = vrot.lane.b32.xlu0 %v2805_v17, %s6467_s19 }
 0x79b   : > { %v2837_v12 = vadd.f32 %v2835_v34, %v2829_v15 }
 0x79c   : > { %v2836_v5 = vadd.f32 %v2835_v34, %v2828_v22  ;;  %v5968_v56 = vpop.f32.mrb[18].mxu1 }
 0x79d   : > { %v2831_v32 = vmul.f32 %v5968_v56, %v2827_v48  ;;  %2959 = vrot.lane.b32.xlu1 %v5968_v56, %s6467_s19  ;;  %v2815_v11 = vpop.f32.mrb[19].mxu1  ;;  %v2841_v23 = vmax.f32 %v2837_v12, 0.0 }
 0x79e   : > { %v2840_v57 = vmax.f32 %v2836_v5, 0.0  ;;  %v2830_v53 = vmul.f32 %v2827_v48, %v2815_v11  ;;  %2957 = vrot.lane.b32.xlu0 %v2815_v11, %s6467_s19 }
 0x79f   : > { %v2839_v58 = vadd.f32 %v2835_v34, %v2831_v32 }
 0x7a0   : > { %v2838_v38 = vadd.f32 %v2835_v34, %v2830_v53  ;;  %5971 = vmatprep.mubr.msk.f32.mxu0 %vm1970_vm3, %v2840_v57 }
 0x7a1   : > { %5972 = vmatmul.mubr.msk.f32.vlgmr.msra.gmra.mrb[24].mxu0 %vm1970_vm3, %v2841_v23  ;;  %v2843_v44 = vmax.f32 %v2839_v58, 0.0 }
 0x7a2   : > { %v2842_v18 = vmax.f32 %v2838_v38, 0.0  ;;  %6256 = vmatpush3.bf16.msra.mxu0 %v6253_v27 }
 0x7a4   : > { %5974 = vmatprep.mubr.msk.f32.mxu1 %vm1970_vm3, %v2842_v18 }
 0x7a5   : > { %5975 = vmatmul.mubr.msk.f32.vlgmr.msra.gmra.mrb[20].mxu1 %vm1970_vm3, %v2843_v44 }
 0x7a6   : > { %5978 = vmatpush3.msra.mxu1 %v2969_v41 }
 0x80b   : > { %v2956_v33 = vpop.permute.xlu1 %2955 }
 0x80c   : > { %v2954_v40 = vpop.permute.xlu0 %2953 }
 0x80f   : > { %v2960_v60 = vpop.permute.xlu1 %2959 }
 0x810   : > { %v2958_v3 = vpop.permute.xlu0 %2957 }
 0x874   : > { %v5973_v37 = vpop.f32.mrb[24].mxu0 }
 0x875   : > { %v2936_v0 = vadd.f32 %v5973_v37, %v5583_v10  ;;  %v2930_v36 = vpop.f32.mrb[25].mxu0 }
 0x876   : > { %v2931_v50 = vadd.f32 %v5583_v10, %v2930_v36 }
 0x877   : > { %v2966_v13 = vadd.f32 %v2956_v33, %v2936_v0 }
 0x878   : > { %v2965_v42 = vadd.f32 %v2954_v40, %v2931_v50  ;;  %v5976_v19 = vpop.f32.mrb[20].mxu1 }
 0x879   : > { %v2946_v43 = vadd.f32 %v5976_v19, %v5583_v10  ;;  %v2940_v25 = vpop.f32.mrb[21].mxu1 }
 0x87a   : > { %v2941_v28 = vadd.f32 %v5583_v10, %v2940_v25  ;;  %5979 = vmatprep.mubr.msk.f32.mxu1 %vm1744_vm14, %v2965_v42  ;;  %v3071_v25 = vld [vmem:[%s6678_s28 + $0xd] sm:$0x1] }
 0x87b   : > { %5980 = vmatmul.mubr.msk.f32.vlgmr.msra.gmra.mrb[22].mxu1 %vm1744_vm14, %v2966_v13  ;;  %v2968_v52 = vadd.f32 %v2960_v60, %v2946_v43  ;;  %v3072_v60 = vld [vmem:[%s6678_s28 + $0xe] sm:$0x1] }
 0x87c   : > { %v2967_v63 = vadd.f32 %v2958_v3, %v2941_v28 }
 0x87e   : > { %5982 = vmatprep.mubr.msk.f32.mxu1 %vm1744_vm14, %v2967_v63 }
 0x87f   : > { %5983 = vmatmul.mubr.msk.f32.gmra.mrb[24].mxu1 %vm1744_vm14, %v2968_v52 }
 0x94e   : > { %v5981_v31 = vpop.f32.mrb[22].mxu1 }
 0x94f   : > { %v7954_v21 = vadd.f32 %v5981_v31, %v5589_v16  ;;  %v3052_v14 = vpop.f32.mrb[23].mxu1 }
 0x950   : > { %v7956_v62 = vadd.f32 %v5589_v16, %v3052_v14 }
 0x951   : > { %v3082_v2 = vsel %vm252_vm0, %v7954_v21, 0.0  ;;  %v3096_v7 = vmul.f32 %v7954_v21, %v7954_v21 }
 0x952   : > { %v3081_v24 = vsel %vm252_vm0, %v7956_v62, 0.0  ;;  %v3095_v46 = vmul.f32 %v7956_v62, %v7956_v62  ;;  %v5984_v45 = vpop.f32.mrb[24].mxu1  ;;  %v6407_v6 = vpack.i.bf16 %v7954_v21, %v7956_v62 }
 0x953   : > { %v3100_v8 = vsel %vm252_vm0, %v3096_v7, 0.0  ;;  %v3083_v55 = vadd.f32 %v3082_v2, %v3081_v24  ;;  %v7969_v54 = vadd.f32 %v5984_v45, %v5589_v16  ;;  %v3062_v29 = vpop.f32.mrb[25].mxu1 }
 0x954   : > { %v3099_v30 = vsel %vm252_vm0, %v3095_v46, 0.0  ;;  %v7972_v48 = vadd.f32 %v5589_v16, %v3062_v29 }
 0x955   : > { %v3101_v26 = vadd.f32 %v3100_v8, %v3099_v30  ;;  %v3098_v15 = vmul.f32 %v7969_v54, %v7969_v54  ;;  %v3086_v5 = vsel %vm252_vm0, %v7969_v54, 0.0  ;;  %v5594_v30 = vld [vmem:[%s6678_s28 + $0xf] ss:$0 sm:$0xff] }
 0x956   : > { %v3084_v34 = vsel %vm252_vm0, %v7972_v48, 0.0  ;;  %v3097_v17 = vmul.f32 %v7972_v48, %v7972_v48  ;;  %v6412_v22 = vpack.i.bf16 %v7969_v54, %v7972_v48 }
 0x957   : > { %v3085_v12 = vadd.f32 %v3084_v34, %v3083_v55  ;;  %v3104_v57 = vsel %vm252_vm0, %v3098_v15, 0.0 }
 0x958   : > { %v3102_v56 = vsel %vm252_vm0, %v3097_v17, 0.0 }
 0x959   : > { %v3087_v32 = vadd.f32 %v3086_v5, %v3085_v12  ;;  %v3103_v11 = vadd.f32 %v3102_v56, %v3101_v26 }
 0x95b   : > { %v3088_v53 = vrot.slane %v3087_v32, 4  ;;  %v3105_v23 = vadd.f32 %v3104_v57, %v3103_v11 }
 0x95d   : > { %v3089_v58 = vadd.f32 %v3088_v53, %v3087_v32  ;;  %v3106_v38 = vrot.slane %v3105_v23, 4 }
 0x95f   : > { %v3090_v18 = vrot.slane %v3089_v58, 2  ;;  %v3107_v44 = vadd.f32 %v3106_v38, %v3105_v23 }
 0x961   : > { %v3091_v41 = vadd.f32 %v3090_v18, %v3089_v58  ;;  %v3108_v10 = vrot.slane %v3107_v44, 2 }
 0x963   : > { %v3092_v37 = vrot.slane %v3091_v41, 1  ;;  %v3109_v40 = vadd.f32 %v3108_v10, %v3107_v44 }
 0x965   : > { %v3093_v0 = vadd.f32 %v3092_v37, %v3091_v41  ;;  %v3110_v36 = vrot.slane %v3109_v40, 1 }
 0x967   : > { %v3094_v33 = vmul.f32 0.03125, %v3093_v0  ;;  %v3111_v50 = vadd.f32 %v3110_v36, %v3109_v40 }
 0x969   : > { %v3112_v42 = vmul.f32 0.03125, %v3111_v50  ;;  %v3113_v19 = vmul.f32 %v3094_v33, %v3094_v33 }
 0x96b   : > { %v3114_v13 = vsub.f32 %v3112_v42, %v3113_v19 }
 0x96d   : > { %v3115_v43 = vadd.f32 1e-05, %v3114_v13 }
 0x96f   : > { %6430 = vrsqrt.f32 %v3115_v43 }
 0x979   : > { %v6431_v28 = vpop.eup %6430 }
 0x97a   : > { %v3117_v3 = vmul.f32 %v6431_v28, %v3071_v25 }
 0x97c   : > { %v3123_v63 = vrot.slane %v3117_v3, %v7477_v20  ;;  %v3118_v52 = vmul.f32 %v3117_v3, %v3094_v33 }
 0x97e   : > { %v3126_v35 = vmul.f32 %v3123_v63, %v7972_v48  ;;  %v3119_v39 = vsub.f32 %v3072_v60, %v3118_v52  ;;  %v3124_v27 = vmul.f32 %v3123_v63, %v7956_v62  ;;  %v3125_v16 = vmul.f32 %v3123_v63, %v7954_v21 }
 0x97f   : > { %v3127_v31 = vmul.f32 %v3123_v63, %v7969_v54 }
 0x980   : > { %v3131_v14 = vrot.slane %v3119_v39, %v7477_v20 }
 0x982   : > { %v3132_v2 = vadd.f32 %v3131_v14, %v3124_v27  ;;  %v3133_v7 = vadd.f32 %v3131_v14, %v3125_v16  ;;  %v3134_v24 = vadd.f32 %v3131_v14, %v3126_v35  ;;  %v3135_v46 = vadd.f32 %v3131_v14, %v3127_v31 }
 0x984   : > { %v3136_v45 = vmax.f32 %v3132_v2, 0.0  ;;  %v3137_v8 = vmax.f32 %v3133_v7, 0.0  ;;  %v3138_v55 = vmax.f32 %v3134_v24, 0.0  ;;  %v3139_v29 = vmax.f32 %v3135_v46, 0.0  ;;  %v3074_v46 = vld [vmem:[%s6678_s28 + $0x10] sm:$0x1] }
 0x986   : > { %5989 = vmatprep.mubr.msk.f32.mxu0 %vm252_vm0, %v3136_v45 }
 0x987   : > { %5990 = vmatmul.mubr.msk.f32.vlgmr.msra.gmra.mrb[26].mxu0 %vm252_vm0, %v3137_v8  ;;  %v3315_v8 = vand.u32 15, %v7363_v51 }
 0x988   : > { %5992 = vmatprep.mubr.msk.f32.mxu0 %vm252_vm0, %v3138_v55 }
 0x98b   : > { %5993 = vmatmul.mubr.msk.f32.gmra.mrb[28].mxu0 %vm252_vm0, %v3139_v29  ;;  %v3075_v29 = vld [vmem:[%s6678_s28 + $0x11] sm:$0x1] }
 0x98c   : > { %6015 = vmatprep.mubr.msk.f32.mxu0 %vm1290_vm13, %v7500_v9 }
 0xa5a   : > { %v5991_v26 = vpop.f32.mrb[26].mxu0 }
 0xa5b   : > { %v3230_v15 = vadd.f32 %v5991_v26, %v5594_v30  ;;  %v3224_v34 = vpop.f32.mrb[27].mxu0 }
 0xa5c   : > { %v3225_v17 = vadd.f32 %v5594_v30, %v3224_v34  ;;  %v3351_v34 = vadd.s32 4294967295, %v3315_v8 }
 0xa5d   : > { %v3244_v12 = vsel %vm2464_vm7, %v3230_v15, 0.0  ;;  %v3258_v5 = vmul.f32 %v3230_v15, %v3230_v15 }
 0xa5e   : > { %v3243_v56 = vsel %vm2464_vm7, %v3225_v17, 0.0  ;;  %v3257_v32 = vmul.f32 %v3225_v17, %v3225_v17  ;;  %v5994_v11 = vpop.f32.mrb[28].mxu0  ;;  %vm3355_vm8 = vcmp.ge.s32.totalorder %v3351_v34, 0 }
 0xa5f   : > { %v3262_v57 = vsel %vm2464_vm7, %v3258_v5, 0.0  ;;  %v3245_v53 = vadd.f32 %v3244_v12, %v3243_v56  ;;  %v3240_v23 = vadd.f32 %v5994_v11, %v5594_v30  ;;  %v3234_v58 = vpop.f32.mrb[29].mxu0 }
 0xa60   : > { %v3261_v38 = vsel %vm2464_vm7, %v3257_v32, 0.0  ;;  %v3235_v18 = vadd.f32 %v5594_v30, %v3234_v58  ;;  %v3313_v58 = vand.u32 15, %v8428_v61 }
 0xa61   : > { %v3263_v44 = vadd.f32 %v3262_v57, %v3261_v38  ;;  %v3260_v41 = vmul.f32 %v3240_v23, %v3240_v23  ;;  %v3248_v0 = vsel %vm2464_vm7, %v3240_v23, 0.0  ;;  %v3314_v57 = vand.u32 15, %v7360_v47 }
 0xa62   : > { %v3246_v10 = vsel %vm2464_vm7, %v3235_v18, 0.0  ;;  %v3259_v37 = vmul.f32 %v3235_v18, %v3235_v18 }
 0xa63   : > { %v3247_v40 = vadd.f32 %v3246_v10, %v3245_v53  ;;  %v3266_v42 = vsel %vm2464_vm7, %v3260_v41, 0.0  ;;  %v3382_v10 = vadd.s32 1, %v3314_v57 }
 0xa64   : > { %v3264_v36 = vsel %vm2464_vm7, %v3259_v37, 0.0 }
 0xa65   : > { %v3249_v33 = vadd.f32 %v3248_v0, %v3247_v40  ;;  %v3265_v50 = vadd.f32 %v3264_v36, %v3263_v44  ;;  %v3317_v0 = vadd.s32 4294967294, %v3313_v58  ;;  %v3319_v36 = vadd.s32 4294967294, %v3315_v8 }
 0xa66   : > { %vm3390_vm12 = vcmp.lt.s32.totalorder %v3382_v10, 16 }
 0xa67   : > { %v3250_v19 = vrot.slane %v3249_v33, 4  ;;  %v3267_v13 = vadd.f32 %v3266_v42, %v3265_v50  ;;  %vm3323_vm10 = vcmp.ge.s32.totalorder %v3319_v36, 0  ;;  %vm3321_vm3 = vcmp.ge.s32.totalorder %v3317_v0, 0 }
 0xa69   : > { %v3251_v43 = vadd.f32 %v3250_v19, %v3249_v33  ;;  %v3268_v25 = vrot.slane %v3267_v13, 4 }
 0xa6b   : > { %v3252_v28 = vrot.slane %v3251_v43, 2  ;;  %v3269_v3 = vadd.f32 %v3268_v25, %v3267_v13 }
 0xa6d   : > { %v3253_v60 = vadd.f32 %v3252_v28, %v3251_v43  ;;  %v3270_v63 = vrot.slane %v3269_v3, 2 }
 0xa6f   : > { %v3254_v52 = vrot.slane %v3253_v60, 1  ;;  %v3271_v35 = vadd.f32 %v3270_v63, %v3269_v3 }
 0xa71   : > { %v3255_v39 = vadd.f32 %v3254_v52, %v3253_v60  ;;  %v3272_v27 = vrot.slane %v3271_v35, 1 }
 0xa73   : > { %v3256_v16 = vmul.f32 0.03125, %v3255_v39  ;;  %v3273_v31 = vadd.f32 %v3272_v27, %v3271_v35 }
 0xa75   : > { %v3274_v14 = vmul.f32 0.03125, %v3273_v31  ;;  %v3275_v2 = vmul.f32 %v3256_v16, %v3256_v16 }
 0xa77   : > { %v3276_v7 = vsub.f32 %v3274_v14, %v3275_v2 }
 0xa79   : > { %v3277_v24 = vadd.f32 1e-05, %v3276_v7 }
 0xa7b   : > { %6432 = vrsqrt.f32 %v3277_v24 }
 0xa85   : > { %v6433_v45 = vpop.eup %6432 }
 0xa86   : > { %v3279_v55 = vmul.f32 %v6433_v45, %v3074_v46 }
 0xa88   : > { %v3280_v30 = vmul.f32 %v3279_v55, %v3256_v16  ;;  %v3285_v26 = vrot.slane %v3279_v55, %v7477_v20 }
 0xa8a   : > { %v3281_v12 = vsub.f32 %v3075_v29, %v3280_v30  ;;  %v3288_v5 = vmul.f32 %v3285_v26, %v3235_v18  ;;  %v3287_v56 = vmul.f32 %v3285_v26, %v3230_v15  ;;  %v3286_v32 = vmul.f32 %v3285_v26, %v3225_v17  ;;  %v3302_v29 = vld [vmem:[%s6925_s12 + $0x88] sm:$0xff]  ;;  %v3303_v30 = vld [vmem:[%s6925_s12 + $0x90] sm:$0xff] }
 0xa8b   : > { %v3289_v11 = vmul.f32 %v3285_v26, %v3240_v23  ;;  %v8018_v17 = vadd.s32 4294967295, %v3313_v58  ;;  %v3367_v23 = vsel %vm3355_vm8, 1.0, %v8444_v59  ;;  %v6257_v58 = vpack.c.bf16 %v3303_v30, %v3302_v29 }
 0xa8c   : > { %v3293_v53 = vrot.slane %v3281_v12, %v7477_v20  ;;  %vm3535_vm8 = vcmask 1043456  }
 0xa8d   : > { %6258 = vmatprep.subr.bf16.mxu1 %v6257_v58 }
 0xa8e   : > { %v3296_v38 = vadd.f32 %v3293_v53, %v3288_v5  ;;  %v3295_v51 = vadd.f32 %v3293_v53, %v3287_v56  ;;  %v3294_v44 = vadd.f32 %v3293_v53, %v3286_v32  ;;  %v3297_v41 = vadd.f32 %v3293_v53, %v3289_v11  ;;  %6260 = vmatpush3.bf16.msra.mxu1 %v6257_v58 }
 0xa8f   : > { %v3335_v5 = vsel %vm3323_vm10, 1.0, %v8444_v59  ;;  %v3316_v56 = vand.u32 15, %v7367_v49  ;;  %v3333_v53 = vsel %vm3321_vm3, 1.0, %v8444_v59  ;;  %v3398_v49 = vsel %vm3390_vm12, 1.0, %v8444_v59 }
 0xa90   : > { %v3300_v37 = vmax.f32 %v3296_v38, 0.0  ;;  %v3299_v40 = vmax.f32 %v3295_v51, 0.0  ;;  %v3298_v18 = vmax.f32 %v3294_v44, 0.0  ;;  %v3301_v15 = vmax.f32 %v3297_v41, 0.0 }
 0xa91   : > { %v3416_v0 = vadd.s32 2, %v3316_v56 }
 0xa92   : > { %3459 = vrot.lane.b32.xlu1 %v3299_v40, %s6465_s18  ;;  %3457 = vrot.lane.b32.xlu0 %v3298_v18, %s6465_s18  ;;  %v3373_v33 = vrot.slane %v3298_v18, 1  ;;  %v3374_v50 = vrot.slane %v3299_v40, 1  ;;  %v3341_v42 = vrot.slane %v3298_v18, 7  ;;  %v3342_v19 = vrot.slane %v3299_v40, 7 }
 0xa93   : > { %v3405_v13 = vrot.slane %v3298_v18, 2  ;;  %v3406_v43 = vrot.slane %v3299_v40, 2  ;;  %v3343_v25 = vrot.slane %v3300_v37, 7  ;;  %v3344_v28 = vrot.slane %v3301_v15, 7 }
 0xa94   : > { %v3379_v3 = vsel %vm776_vm1, %v3373_v33, %v3374_v50  ;;  %v3347_v60 = vsel %vm647_vm4, %v3341_v42, %v3342_v19  ;;  %v3375_v63 = vrot.slane %v3300_v37, 1  ;;  %v3376_v52 = vrot.slane %v3301_v15, 1 }
 0xa95   : > { %v3411_v35 = vsel %vm8451_vm9, %v3405_v13, %v3406_v43  ;;  %v3345_v39 = vsel %vm647_vm4, %v3343_v25, %v3344_v28  ;;  %v3348_v27 = vsel %vm647_vm4, %v3344_v28, %v3341_v42  ;;  %v3346_v16 = vsel %vm647_vm4, %v3342_v19, %v3343_v25 }
 0xa96   : > { %3463 = vrot.lane.b32.xlu1 %v3301_v15, %s6465_s18  ;;  %3461 = vrot.lane.b32.xlu0 %v3300_v37, %s6465_s18  ;;  %v3377_v31 = vsel %vm776_vm1, %v3375_v63, %v3376_v52  ;;  %v3378_v14 = vsel %vm776_vm1, %v3374_v50, %v3375_v63  ;;  %v3407_v2 = vrot.slane %v3300_v37, 2  ;;  %v3371_v7 = vmul.f32 %v3367_v23, %v3346_v16 }
 0xa97   : > { %v3380_v24 = vsel %vm776_vm1, %v3376_v52, %v3373_v33  ;;  %v3408_v46 = vrot.slane %v3301_v15, 2  ;;  %v3306_v8 = vrot.slane %v3299_v40, 6  ;;  %v3305_v55 = vrot.slane %v3298_v18, 6  ;;  %v3304_v40 = vld [vmem:[%s6925_s12 + $0x98] sm:$0xf] }
 0xa98   : > { %v3410_v45 = vsel %vm8452_vm2, %v3406_v43, %v3407_v2  ;;  %v3307_v12 = vrot.slane %v3300_v37, 6  ;;  %v3308_v11 = vrot.slane %v3301_v15, 6  ;;  %vm3353_vm9 = vcmp.ge.s32.totalorder %v8018_v17, 0  ;;  %5999 = vmatprep.subr.msk.mxu1 %vm3535_vm8, %v3304_v40 }
 0xa99   : > { %v3409_v26 = vsel %vm8453_vm11, %v3407_v2, %v3408_v46  ;;  %v3412_v34 = vsel %vm8454_vm6, %v3408_v46, %v3405_v13  ;;  %v3311_v32 = vsel %vm487_vm5, %v3305_v55, %v3306_v8  ;;  %v3414_v18 = vadd.s32 2, %v3314_v57  ;;  %6000 = vmatpush3.msk.msra.mxu1 %vm3535_vm8, %v3304_v40 }
 0xa9a   : > { %3473 = vrot.lane.b32.xlu0 %v3379_v3, %s6468_s20  ;;  %3443 = vrot.lane.b32.xlu1 %v3347_v60, %s6462_s13  ;;  %v3310_v38 = vsel %vm487_vm5, %v3306_v8, %v3307_v12  ;;  %v3309_v51 = vsel %vm487_vm5, %v3307_v12, %v3308_v11  ;;  %v3312_v44 = vsel %vm487_vm5, %v3308_v11, %v3305_v55  ;;  %v3384_v15 = vadd.s32 1, %v3316_v56  ;;  %v5599_v56 = vld [vmem:[%s6678_s28 + $0x12] ss:$0 sm:$0xff] }
 0xa9b   : > { %v3339_v41 = vmul.f32 %v3335_v5, %v3310_v38  ;;  %v3337_v37 = vmul.f32 %v3333_v53, %v3312_v44  ;;  %v3402_v23 = vmul.f32 %v3398_v49, %v3378_v14  ;;  %v3365_v10 = vsel %vm3353_vm9, 1.0, %v8444_v59 }
 0xa9c   : > { %vm3422_vm10 = vcmp.lt.s32.totalorder %v3414_v18, 16  ;;  %vm3392_vm3 = vcmp.lt.s32.totalorder %v3384_v15, 16  ;;  %v3369_v17 = vmul.f32 %v3365_v10, %v3348_v27  ;;  %vm3424_vm12 = vcmp.lt.s32.totalorder %v3416_v0, 16 }
 0xa9d   : > { %v3430_v36 = vsel %vm3422_vm10, 1.0, %v8444_v59  ;;  %v3400_v57 = vsel %vm3392_vm3, 1.0, %v8444_v59  ;;  %v3432_v42 = vsel %vm3424_vm12, 1.0, %v8444_v59  ;;  %vm3509_vm2 = vcmask 97280  }
 0xa9e   : > { %3489 = vrot.lane.b32.xlu0 %v3411_v35, %s6460_s8  ;;  %3447 = vrot.lane.b32.xlu1 %v3345_v39, %s6462_s13  ;;  %v3434_v33 = vmul.f32 %v3430_v36, %v3410_v45  ;;  %v3404_v50 = vmul.f32 %v3400_v57, %v3380_v24  ;;  %v3436_v19 = vmul.f32 %v3432_v42, %v3412_v34  ;;  %vm3522_vm11 = vcmask 162816  }
 0xaa2   : > { %3477 = vrot.lane.b32.xlu0 %v3377_v31, %s6468_s20  ;;  %3475 = vrot.lane.b32.xlu1 %v3402_v23, %s6468_s20 }
 0xaa6   : > { %3441 = vrot.lane.b32.xlu0 %v3369_v17, %s6462_s13  ;;  %3445 = vrot.lane.b32.xlu1 %v3371_v7, %s6462_s13 }
 0xaaa   : > { %3491 = vrot.lane.b32.xlu0 %v3434_v33, %s6460_s8  ;;  %3479 = vrot.lane.b32.xlu1 %v3404_v50, %s6468_s20 }
 0xaae   : > { %3493 = vrot.lane.b32.xlu0 %v3409_v26, %s6460_s8  ;;  %3495 = vrot.lane.b32.xlu1 %v3436_v19, %s6460_s8 }
 0xab2   : > { %6408 = vrot.lane.b32.xlu0 %v6407_v6, %s6462_s13  ;;  %6413 = vrot.lane.b32.xlu1 %v6412_v22, %s6462_s13 }
 0xb04   : > { %v3460_v13 = vpop.permute.xlu1 %3459  ;;  %v3458_v43 = vpop.permute.xlu0 %3457 }
 0xb08   : > { %v3464_v25 = vpop.permute.xlu1 %3463  ;;  %v3462_v28 = vpop.permute.xlu0 %3461 }
 0xb0c   : > { %v3474_v3 = vpop.permute.xlu0 %3473  ;;  %v3444_v60 = vpop.permute.xlu1 %3443 }
 0xb0d   : > { %v3502_v27 = vsel %vm2464_vm7, %v3311_v32, %v3444_v60 }
 0xb0e   : > { %v3506_v48 = vsel %vm1744_vm14, %v3502_v27, %v3460_v13 }
 0xb10   : > { %v3490_v63 = vpop.permute.xlu0 %3489  ;;  %v3448_v52 = vpop.permute.xlu1 %3447 }
 0xb11   : > { %v3504_v31 = vsel %vm2464_vm7, %v3309_v51, %v3448_v52 }
 0xb12   : > { %v3508_v8 = vsel %vm1744_vm14, %v3504_v31, %v3464_v25 }
 0xb14   : > { %v3478_v35 = vpop.permute.xlu0 %3477  ;;  %v3476_v39 = vpop.permute.xlu1 %3475 }
 0xb15   : > { %v3511_v14 = vsel %vm3509_vm2, %v3506_v48, %v3476_v39 }
 0xb18   : > { %v3442_v16 = vpop.permute.xlu0 %3441  ;;  %v3446_v21 = vpop.permute.xlu1 %3445 }
 0xb19   : > { %v3501_v62 = vsel %vm2464_vm7, %v3337_v37, %v3442_v16  ;;  %v3503_v54 = vsel %vm2464_vm7, %v3339_v41, %v3446_v21 }
 0xb1a   : > { %v3505_v6 = vsel %vm1744_vm14, %v3501_v62, %v3458_v43  ;;  %v3507_v46 = vsel %vm1744_vm14, %v3503_v54, %v3462_v28 }
 0xb1b   : > { %v3510_v22 = vsel %vm3509_vm2, %v3505_v6, %v3474_v3  ;;  %v3512_v30 = vsel %vm3509_vm2, %v3507_v46, %v3478_v35 }
 0xb1c   : > { %v3492_v2 = vpop.permute.xlu0 %3491  ;;  %v3480_v7 = vpop.permute.xlu1 %3479  ;;  %v3514_v24 = vsel %vm252_vm0, %v3510_v22, %v3490_v63 }
 0xb1d   : > { %v3515_v45 = vsel %vm252_vm0, %v3511_v14, %v3492_v2  ;;  %6001 = vmatprep.mubr.msk.f32.mxu1 %vm3522_vm11, %v3514_v24  ;;  %v3513_v55 = vsel %vm3509_vm2, %v3508_v8, %v3480_v7 }
 0xb1e   : > { %6002 = vmatmul.mubr.msk.f32.vlgmr.msra.gmra.mrb[26].mxu1 %vm3522_vm11, %v3515_v45 }
 0xb20   : > { %v3494_v29 = vpop.permute.xlu0 %3493  ;;  %v3496_v26 = vpop.permute.xlu1 %3495 }
 0xb21   : > { %v3516_v34 = vsel %vm252_vm0, %v3512_v30, %v3494_v29  ;;  %v3517_v12 = vsel %vm252_vm0, %v3513_v55, %v3496_v26 }
 0xb22   : > { %6004 = vmatprep.mubr.msk.f32.mxu1 %vm3522_vm11, %v3516_v34 }
 0xb23   : > { %6005 = vmatmul.mubr.msk.f32.gmra.mrb[28].mxu1 %vm3522_vm11, %v3517_v12  ;;  %v3077_v12 = vld [vmem:[%s6678_s28 + $0x13] sm:$0x1]  ;;  %vm8455_vm11 = vcmp.lt.s32.totalorder %v8428_v61, 6 }
 0xb24   : > { %v6409_v5 = vpop.permute.xlu0 %6408  ;;  %v6414_v44 = vpop.permute.xlu1 %6413 }
 0xb25   : > { %v6411_v11 = vunpack.i.h.bf16 %v6409_v5  ;;  %v6410_v38 = vunpack.i.l.bf16 %v6409_v5  ;;  %v6416_v36 = vunpack.i.h.bf16 %v6414_v44  ;;  %v6415_v42 = vunpack.i.l.bf16 %v6414_v44 }
 0xbf1   : > { %v6003_v32 = vpop.f32.mrb[26].mxu1 }
 0xbf2   : > { %v3611_v53 = vadd.f32 %v6003_v32, %v5599_v56  ;;  %v3605_v58 = vpop.f32.mrb[27].mxu1  ;;  %v3776_v32 = vld [vmem:[%s6925_s12 + $0xa0] sm:$0xf] }
 0xbf3   : > { %v3606_v51 = vadd.f32 %v5599_v56, %v3605_v58 }
 0xbf4   : > { %v3625_v41 = vsel %vm2464_vm7, %v3611_v53, 0.0  ;;  %v3639_v49 = vmul.f32 %v3611_v53, %v3611_v53  ;;  %v3680_v37 = vsel %vm2464_vm7, %v3611_v53, %v6411_v11  ;;  %v3078_v11 = vld [vmem:[%s6678_s28 + $0x14] sm:$0x1] }
 0xbf5   : > { %v3624_v40 = vsel %vm2464_vm7, %v3606_v51, 0.0  ;;  %v3638_v18 = vmul.f32 %v3606_v51, %v3606_v51  ;;  %v3679_v15 = vsel %vm2464_vm7, %v3606_v51, %v6410_v38 }
 0xbf6   : > { %v3643_v23 = vsel %vm2464_vm7, %v3639_v49, 0.0  ;;  %v3626_v10 = vadd.f32 %v3625_v41, %v3624_v40  ;;  %v6006_v0 = vpop.f32.mrb[28].mxu1  ;;  %v6261_v17 = vpack.c.bf16 %v3680_v37, %v3679_v15 }
 0xbf7   : > { %v3642_v57 = vsel %vm2464_vm7, %v3638_v18, 0.0  ;;  %v3621_v33 = vadd.f32 %v6006_v0, %v5599_v56  ;;  %v3615_v50 = vpop.f32.mrb[29].mxu1 }
 0xbf8   : > { %v3644_v19 = vadd.f32 %v3643_v23, %v3642_v57  ;;  %v3616_v13 = vadd.f32 %v5599_v56, %v3615_v50  ;;  %6262 = vmatprep.subr.bf16.mxu0 %v6261_v17  ;;  %v3875_v23 = vld [vmem:[%s6925_s12 + $0xa8] sm:$0xff] }
 0xbf9   : > { %6264 = vmatpush3.bf16.msra.mxu0 %v6261_v17  ;;  %v3682_v43 = vsel %vm2464_vm7, %v3621_v33, %v6416_v36  ;;  %v3641_v25 = vmul.f32 %v3621_v33, %v3621_v33  ;;  %v3629_v35 = vsel %vm2464_vm7, %v3621_v33, 0.0  ;;  %v5607_v17 = vld [vmem:[%s6678_s28 + $0x15] ss:$0 sm:$0xff] }
 0xbfa   : > { %v3627_v28 = vsel %vm2464_vm7, %v3616_v13, 0.0  ;;  %v3640_v3 = vmul.f32 %v3616_v13, %v3616_v13  ;;  %v3681_v60 = vsel %vm2464_vm7, %v3616_v13, %v6415_v42 }
 0xbfb   : > { %v3628_v63 = vadd.f32 %v3627_v28, %v3626_v10  ;;  %v6265_v52 = vpack.c.bf16 %v3682_v43, %v3681_v60  ;;  %v3647_v21 = vsel %vm2464_vm7, %v3641_v25, 0.0  ;;  %v3876_v10 = vld [vmem:[%s6925_s12 + $0xb0] sm:$0xff]  ;;  %v4015_v25 = vld [vmem:[%s6925_s12 + $0xb8] sm:$0xff]  ;;  %v4016_v28 = vld [vmem:[%s6925_s12 + $0xc0] sm:$0xff] }
 0xbfc   : > { %v3645_v39 = vsel %vm2464_vm7, %v3640_v3, 0.0  ;;  %v6269_v0 = vpack.c.bf16 %v3876_v10, %v3875_v23  ;;  %v4017_v3 = vld [vmem:[%s6925_s12 + $0xc8] sm:$0xff]  ;;  %v6273_v60 = vpack.c.bf16 %v4016_v28, %v4015_v25 }
 0xbfd   : > { %v3630_v27 = vadd.f32 %v3629_v35, %v3628_v63  ;;  %v3646_v16 = vadd.f32 %v3645_v39, %v3644_v19  ;;  %6266 = vmatprep.subr.bf16.mxu0 %v6265_v52  ;;  %v4018_v63 = vld [vmem:[%s6925_s12 + $0xd0] sm:$0xff] }
 0xbfe   : > { %6268 = vmatpush3.bf16.msra.mxu0 %v6265_v52  ;;  %6270 = vmatprep.subr.bf16.mxu1 %v6269_v0  ;;  %v6277_v52 = vpack.c.bf16 %v4018_v63, %v4017_v3  ;;  %v5611_v35 = vld [vmem:[%s6678_s28 + $0x16] ss:$0 sm:$0xff] }
 0xbff   : > { %v3631_v62 = vrot.slane %v3630_v27, 4  ;;  %v3648_v6 = vadd.f32 %v3647_v21, %v3646_v16  ;;  %6018 = vmatprep.subr.msk.mxu0 %vm3535_vm8, %v3776_v32  ;;  %6272 = vmatpush3.bf16.msra.mxu1 %v6269_v0 }
 0xc01   : > { %v3632_v54 = vadd.f32 %v3631_v62, %v3630_v27  ;;  %v3649_v48 = vrot.slane %v3648_v6, 4  ;;  %6016 = vmatmul.mubr.msk.f32.vlgmr.msra.gmra.mrb[30].mxu0 %vm1290_vm13, %v7920_v1 }
 0xc02   : > { %6019 = vmatpush3.msk.msra.mxu0 %vm3535_vm8, %v3776_v32 }
 0xc03   : > { %v3633_v22 = vrot.slane %v3632_v54, 2  ;;  %v3650_v31 = vadd.f32 %v3649_v48, %v3648_v6  ;;  %6274 = vmatprep.subr.bf16.mxu0 %v6273_v60 }
 0xc05   : > { %v3634_v14 = vadd.f32 %v3633_v22, %v3632_v54  ;;  %v3651_v2 = vrot.slane %v3650_v31, 2 }
 0xc07   : > { %v3652_v7 = vadd.f32 %v3651_v2, %v3650_v31  ;;  %v3635_v24 = vrot.slane %v3634_v14, 1 }
 0xc09   : > { %v3653_v46 = vrot.slane %v3652_v7, 1  ;;  %v3636_v45 = vadd.f32 %v3635_v24, %v3634_v14 }
 0xc0b   : > { %v3654_v8 = vadd.f32 %v3653_v46, %v3652_v7  ;;  %v3637_v55 = vmul.f32 0.03125, %v3636_v45 }
 0xc0d   : > { %v3655_v29 = vmul.f32 0.03125, %v3654_v8  ;;  %v3656_v30 = vmul.f32 %v3637_v55, %v3637_v55 }
 0xc0f   : > { %v3657_v26 = vsub.f32 %v3655_v29, %v3656_v30 }
 0xc11   : > { %v3658_v34 = vadd.f32 1e-05, %v3657_v26 }
 0xc13   : > { %6434 = vrsqrt.f32 %v3658_v34 }
 0xc1d   : > { %v6435_v1 = vpop.eup %6434 }
 0xc1e   : > { %v3660_v5 = vmul.f32 %v6435_v1, %v3077_v12 }
 0xc20   : > { %v3661_v56 = vmul.f32 %v3660_v5, %v3637_v55  ;;  %v3765_v58 = vrot.slane %v3660_v5, %v7477_v20 }
 0xc22   : > { %v3662_v53 = vsub.f32 %v3078_v11, %v3661_v56 }
 0xc24   : > { %v3771_v44 = vrot.slane %v3662_v53, %v7477_v20 }
 0xcd4   : > { %v6017_v38 = vpop.f32.mrb[30].mxu0 }
 0xcd5   : > { %v3767_v51 = vmul.f32 %v6017_v38, %v3765_v58  ;;  %3869 = vrot.lane.b32.xlu1 %v6017_v38, %s6469_s21  ;;  %v3753_v41 = vpop.f32.mrb[31].mxu0  ;;  %v3962_v38 = vld [vmem:[%s6678_s28 + $0x17] sm:$0x1] }
 0xcd6   : > { %v3766_v49 = vmul.f32 %v3765_v58, %v3753_v41  ;;  %3867 = vrot.lane.b32.xlu0 %v3753_v41, %s6469_s21  ;;  %v3963_v41 = vld [vmem:[%s6678_s28 + $0x18] sm:$0x1] }
 0xcd7   : > { %v3773_v37 = vadd.f32 %v3771_v44, %v3767_v51 }
 0xcd8   : > { %v3772_v40 = vadd.f32 %v3771_v44, %v3766_v49 }
 0xcd9   : > { %v3775_v15 = vmax.f32 %v3773_v37, 0.0 }
 0xcda   : > { %v3774_v18 = vmax.f32 %v3772_v40, 0.0 }
 0xcdc   : > { %6020 = vmatprep.mubr.msk.f32.mxu0 %vm2464_vm7, %v3774_v18 }
 0xcdd   : > { %6021 = vmatmul.mubr.msk.f32.vlgmr.msra.gmra.mrb[32].mxu0 %vm2464_vm7, %v3775_v15 }
 0xcde   : > { %6276 = vmatpush3.bf16.msra.mxu0 %v6273_v60 }
 0xcdf   : > { %6278 = vmatprep.subr.bf16.mxu0 %v6277_v52 }
 0xce2   : > { %6280 = vmatpush3.bf16.msra.mxu0 %v6277_v52 }
 0xd47   : > { %v3870_v19 = vpop.permute.xlu1 %3869 }
 0xd48   : > { %v3868_v42 = vpop.permute.xlu0 %3867 }
 0xdb0   : > { %v6022_v36 = vpop.f32.mrb[32].mxu0 }
 0xdb1   : > { %v3862_v57 = vadd.f32 %v6022_v36, %v5607_v17  ;;  %v3856_v33 = vpop.f32.mrb[33].mxu0 }
 0xdb2   : > { %v3857_v50 = vadd.f32 %v5607_v17, %v3856_v33 }
 0xdb3   : > { %v3874_v43 = vadd.f32 %v3870_v19, %v3862_v57  ;;  %v5614_v57 = vld [vmem:[%s6678_s28 + $0x19] ss:$0 sm:$0xff] }
 0xdb4   : > { %v3873_v13 = vadd.f32 %v3868_v42, %v3857_v50 }
 0xdb6   : > { %6027 = vmatprep.mubr.msk.f32.mxu1 %vm252_vm0, %v3873_v13 }
 0xdb7   : > { %6028 = vmatmul.mubr.msk.f32.vlgmr.msra.gmra.mrb[30].mxu1 %vm252_vm0, %v3874_v43 }
 0xe8a   : > { %v6029_v39 = vpop.f32.mrb[30].mxu1 }
 0xe8b   : > { %v8149_v27 = vadd.f32 %v6029_v39, %v5611_v35  ;;  %v3953_v16 = vpop.f32.mrb[31].mxu1 }
 0xe8c   : > { %v8151_v21 = vadd.f32 %v5611_v35, %v3953_v16 }
 0xe8d   : > { %v3973_v62 = vsel %vm1290_vm13, %v8149_v27, 0.0  ;;  %v3983_v6 = vmul.f32 %v8149_v27, %v8149_v27 }
 0xe8e   : > { %v3972_v54 = vsel %vm1290_vm13, %v8151_v21, 0.0  ;;  %v3982_v48 = vmul.f32 %v8151_v21, %v8151_v21  ;;  %v6417_v22 = vpack.i.bf16 %v8149_v27, %v8151_v21 }
 0xe8f   : > { %v3985_v31 = vsel %vm1290_vm13, %v3983_v6, 0.0  ;;  %v3974_v14 = vadd.f32 %v3973_v62, %v3972_v54 }
 0xe90   : > { %v3984_v2 = vsel %vm1290_vm13, %v3982_v48, 0.0 }
 0xe91   : > { %v3975_v7 = vrot.slane %v3974_v14, 4  ;;  %v3986_v24 = vadd.f32 %v3985_v31, %v3984_v2 }
 0xe93   : > { %v3976_v46 = vadd.f32 %v3975_v7, %v3974_v14  ;;  %v3987_v45 = vrot.slane %v3986_v24, 4 }
 0xe95   : > { %v3977_v8 = vrot.slane %v3976_v46, 2  ;;  %v3988_v55 = vadd.f32 %v3987_v45, %v3986_v24 }
 0xe97   : > { %v3978_v29 = vadd.f32 %v3977_v8, %v3976_v46  ;;  %v3989_v30 = vrot.slane %v3988_v55, 2 }
 0xe99   : > { %v3979_v26 = vrot.slane %v3978_v29, 1  ;;  %v3990_v34 = vadd.f32 %v3989_v30, %v3988_v55  ;;  %v3965_v30 = vld [vmem:[%s6678_s28 + $0x1a] sm:$0x1] }
 0xe9b   : > { %v3980_v12 = vadd.f32 %v3979_v26, %v3978_v29  ;;  %v3991_v1 = vrot.slane %v3990_v34, 1  ;;  %v4157_v26 = vand.u32 7, %v7360_v47 }
 0xe9d   : > { %v3981_v5 = vmul.f32 0.0625, %v3980_v12  ;;  %v3992_v56 = vadd.f32 %v3991_v1, %v3990_v34  ;;  %v4156_v34 = vand.u32 7, %v8428_v61 }
 0xe9f   : > { %v3993_v32 = vmul.f32 0.0625, %v3992_v56  ;;  %v3994_v11 = vmul.f32 %v3981_v5, %v3981_v5 }
 0xea1   : > { %v3995_v53 = vsub.f32 %v3993_v32, %v3994_v11  ;;  %v4174_v11 = vadd.s32 4294967295, %v4156_v34 }
 0xea3   : > { %v3996_v58 = vadd.f32 1e-05, %v3995_v53  ;;  %v4175_v53 = vadd.s32 4294967295, %v4157_v26  ;;  %vm4176_vm6 = vcmp.ge.s32.totalorder %v4174_v11, 0 }
 0xea5   : > { %6436 = vrsqrt.f32 %v3996_v58  ;;  %v4190_v58 = vadd.s32 1, %v4156_v34  ;;  %vm4177_vm9 = vcmp.ge.s32.totalorder %v4175_v53, 0 }
 0xea7   : > { %vm4194_vm10 = vcmp.lt.s32.totalorder %v4190_v58, 8 }
 0xeaf   : > { %v6437_v51 = vpop.eup %6436 }
 0xeb0   : > { %v3998_v44 = vmul.f32 %v6437_v51, %v3962_v38 }
 0xeb2   : > { %v4004_v49 = vrot.slane %v3998_v44, %v7477_v20  ;;  %v3999_v37 = vmul.f32 %v3998_v44, %v3981_v5  ;;  %v3966_v5 = vld [vmem:[%s6678_s28 + $0x1b] sm:$0x1] }
 0xeb4   : > { %v4005_v40 = vmul.f32 %v4004_v49, %v8151_v21  ;;  %v4006_v18 = vmul.f32 %v4004_v49, %v8149_v27  ;;  %v4000_v15 = vsub.f32 %v3963_v41, %v3999_v37  ;;  %v4158_v41 = vadd.s32 4294967294, %v4156_v34  ;;  %v4147_v49 = vld [vmem:[%s6925_s12 + $0xd8] sm:$0xff]  ;;  %v4148_v37 = vld [vmem:[%s6925_s12 + $0xe0] sm:$0xff] }
 0xeb5   : > { %v6281_v47 = vpack.c.bf16 %v4148_v37, %v4147_v49 }
 0xeb6   : > { %v4010_v23 = vrot.slane %v4000_v15, %v7477_v20  ;;  %v4159_v15 = vadd.s32 4294967294, %v4157_v26  ;;  %vm4160_vm3 = vcmp.ge.s32.totalorder %v4158_v41, 0 }
 0xeb7   : > { %6282 = vmatprep.subr.bf16.mxu1 %v6281_v47 }
 0xeb8   : > { %v4011_v10 = vadd.f32 %v4010_v23, %v4005_v40  ;;  %v4012_v0 = vadd.f32 %v4010_v23, %v4006_v18  ;;  %v4191_v18 = vadd.s32 1, %v4157_v26  ;;  %6284 = vmatpush3.bf16.msra.mxu1 %v6281_v47  ;;  %vm4161_vm2 = vcmp.ge.s32.totalorder %v4159_v15, 0 }
 0xeb9   : > { %v6471_v15 = vmov 0.0|0.0  }
 0xeba   : > { %v4013_v17 = vmax.f32 %v4011_v10, 0.0  ;;  %v4014_v36 = vmax.f32 %v4012_v0, 0.0  ;;  %v4149_v0 = vld [vmem:[%s6925_s12 + $0xe8] sm:$0xff]  ;;  %vm4195_vm12 = vcmp.lt.s32.totalorder %v4191_v18, 8  ;;  %6289 = vmatprep.subr.bf16.mxu0 %v6471_v15 }
 0xebc   : > { %6038 = vmatprep.mubr.msk.f32.mxu0 %vm1290_vm13, %v4013_v17  ;;  %v4150_v17 = vld [vmem:[%s6925_s12 + $0xf0] sm:$0xff] }
 0xebd   : > { %6039 = vmatmul.mubr.msk.f32.vlgmr.msra.gmra.mrb[34].mxu0 %vm1290_vm13, %v4014_v36  ;;  %v4182_v36 = vsel %vm4176_vm6, 1.0, %v8444_v59 }
 0xf90   : > { %v6040_v33 = vpop.f32.mrb[34].mxu0 }
 0xf91   : > { %v4101_v50 = vadd.f32 %v6040_v33, %v5614_v57  ;;  %v4095_v42 = vpop.f32.mrb[35].mxu0  ;;  %v6285_v33 = vpack.c.bf16 %v4150_v17, %v4149_v0 }
 0xf92   : > { %v4096_v19 = vadd.f32 %v5614_v57, %v4095_v42  ;;  %v4183_v57 = vsel %vm4177_vm9, 1.0, %v8444_v59  ;;  %vm4263_vm9 = vcmask 326656  }
 0xf93   : > { %v4105_v13 = vsel %vm1744_vm14, %v4101_v50, 0.0  ;;  %v4115_v43 = vmul.f32 %v4101_v50, %v4101_v50  ;;  %6286 = vmatprep.subr.bf16.mxu1 %v6285_v33 }
 0xf94   : > { %v4104_v25 = vsel %vm1744_vm14, %v4096_v19, 0.0  ;;  %v4114_v28 = vmul.f32 %v4096_v19, %v4096_v19  ;;  %6288 = vmatpush3.bf16.msra.mxu1 %v6285_v33 }
 0xf95   : > { %v4117_v3 = vsel %vm1744_vm14, %v4115_v43, 0.0  ;;  %v4106_v60 = vadd.f32 %v4105_v13, %v4104_v25  ;;  %v4206_v13 = vadd.s32 2, %v4156_v34  ;;  %v4207_v43 = vadd.s32 2, %v4157_v26 }
 0xf96   : > { %v4116_v63 = vsel %vm1744_vm14, %v4114_v28, 0.0  ;;  %v4166_v25 = vsel %vm4160_vm3, 1.0, %v8444_v59 }
 0xf97   : > { %v4107_v52 = vrot.slane %v4106_v60, 4  ;;  %v4118_v35 = vadd.f32 %v4117_v3, %v4116_v63  ;;  %vm4211_vm6 = vcmp.lt.s32.totalorder %v4207_v43, 8 }
 0xf99   : > { %v4108_v39 = vadd.f32 %v4107_v52, %v4106_v60  ;;  %v4119_v16 = vrot.slane %v4118_v35, 4  ;;  %v4151_v52 = vld [vmem:[%s6925_s12 + $0xf8] sm:$0xff] }
 0xf9a   : > { %6049 = vmatprep.subr.mxu1 %v4151_v52 }
 0xf9b   : > { %v4109_v62 = vrot.slane %v4108_v39, 2  ;;  %v4120_v6 = vadd.f32 %v4119_v16, %v4118_v35  ;;  %6050 = vmatpush3.msra.mxu1 %v4151_v52 }
 0xf9c   : > { %6061 = vmatprep.subr.mxu1 %v8444_v59 }
 0xf9d   : > { %v4110_v54 = vadd.f32 %v4109_v62, %v4108_v39  ;;  %v4121_v48 = vrot.slane %v4120_v6, 2 }
 0xf9f   : > { %v4111_v31 = vrot.slane %v4110_v54, 1  ;;  %v4122_v14 = vadd.f32 %v4121_v48, %v4120_v6 }
 0xfa1   : > { %v4112_v2 = vadd.f32 %v4111_v31, %v4110_v54  ;;  %v4123_v7 = vrot.slane %v4122_v14, 1 }
 0xfa3   : > { %v4113_v24 = vmul.f32 0.0625, %v4112_v2  ;;  %v4124_v46 = vadd.f32 %v4123_v7, %v4122_v14  ;;  %v4199_v7 = vsel %vm4195_vm12, 1.0, %v8444_v59 }
 0xfa5   : > { %v4125_v45 = vmul.f32 0.0625, %v4124_v46  ;;  %v4126_v8 = vmul.f32 %v4113_v24, %v4113_v24 }
 0xfa7   : > { %v4127_v55 = vsub.f32 %v4125_v45, %v4126_v8 }
 0xfa9   : > { %v4128_v29 = vadd.f32 1e-05, %v4127_v55 }
 0xfab   : > { %6438 = vrsqrt.f32 %v4128_v29 }
 0xfb5   : > { %v6439_v12 = vpop.eup %6438 }
 0xfb6   : > { %v4130_v1 = vmul.f32 %v6439_v12, %v3965_v30 }
 0xfb8   : > { %v4131_v56 = vmul.f32 %v4130_v1, %v4113_v24  ;;  %v4136_v32 = vrot.slane %v4130_v1, %v7477_v20  ;;  %v4167_v24 = vsel %vm4161_vm2, 1.0, %v8444_v59  ;;  %v4215_v1 = vsel %vm4211_vm6, 1.0, %v8444_v59 }
 0xfba   : > { %v4132_v38 = vsub.f32 %v3966_v5, %v4131_v56  ;;  %v4137_v51 = vmul.f32 %v4136_v32, %v4096_v19  ;;  %v4138_v44 = vmul.f32 %v4136_v32, %v4101_v50  ;;  %v4198_v19 = vsel %vm4194_vm10, 1.0, %v8444_v59 }
 0xfbb   : > { %vm6472_vm10 = vmmov 0  }
 0xfbc   : > { %v4142_v40 = vrot.slane %v4132_v38, %v7477_v20  ;;  %6058 = vmatprep.mubr.msk.f32.mxu0 %vm6472_vm10, %v8444_v59 }
 0xfbe   : > { %v4143_v23 = vadd.f32 %v4142_v40, %v4137_v51  ;;  %v4144_v10 = vadd.f32 %v4142_v40, %v4138_v44 }
 0xfc0   : > { %v4145_v50 = vmax.f32 %v4143_v23, 0.0  ;;  %v4146_v42 = vmax.f32 %v4144_v10, 0.0  ;;  %v5617_v10 = vld [vmem:[%s6678_s28 + $0x1c] ss:$0 sm:$0xff] }
 0xfc2   : > { %4230 = vrot.lane.b32.xlu1 %v4146_v42, %s6460_s8  ;;  %4228 = vrot.lane.b32.xlu0 %v4145_v50, %s6460_s8  ;;  %v4170_v28 = vrot.slane %v4145_v50, 7  ;;  %v4171_v3 = vrot.slane %v4146_v42, 7  ;;  %v4186_v60 = vrot.slane %v4145_v50, 1  ;;  %v4187_v63 = vrot.slane %v4146_v42, 1 }
 0xfc3   : > { %v4202_v35 = vrot.slane %v4145_v50, 2  ;;  %v4203_v39 = vrot.slane %v4146_v42, 2  ;;  %v4153_v16 = vrot.slane %v4146_v42, 6  ;;  %v4152_v62 = vrot.slane %v4145_v50, 6 }
 0xfc4   : > { %v4173_v6 = vsel %vm647_vm4, %v4171_v3, %v4170_v28  ;;  %v4172_v54 = vsel %vm647_vm4, %v4170_v28, %v4171_v3  ;;  %v4188_v48 = vsel %vm776_vm1, %v4186_v60, %v4187_v63  ;;  %v4189_v31 = vsel %vm776_vm1, %v4187_v63, %v4186_v60  ;;  %vm8456_vm4 = vmmov %vm8455_vm11 }
 0xfc5   : > { %v4184_v14 = vmul.f32 %v4182_v36, %v4173_v6  ;;  %v4185_v2 = vmul.f32 %v4183_v57, %v4172_v54  ;;  %v4204_v46 = vsel %vm8455_vm11, %v4202_v35, %v4203_v39  ;;  %v4205_v45 = vsel %vm8456_vm4, %v4203_v39, %v4202_v35 }
 0xfc6   : > { %v4155_v8 = vsel %vm487_vm5, %v4153_v16, %v4152_v62  ;;  %v4154_v55 = vsel %vm487_vm5, %v4152_v62, %v4153_v16  ;;  %vm4210_vm1 = vcmp.lt.s32.totalorder %v4206_v13, 8  ;;  %v4200_v26 = vmul.f32 %v4198_v19, %v4188_v48 }
 0xfc7   : > { %4220 = vrot.lane.b32.xlu0 %v4184_v14, %s6465_s18  ;;  %4222 = vrot.lane.b32.xlu1 %v4185_v2, %s6465_s18  ;;  %v4168_v29 = vmul.f32 %v4166_v25, %v4155_v8  ;;  %v4169_v30 = vmul.f32 %v4167_v24, %v4154_v55  ;;  %v4201_v34 = vmul.f32 %v4199_v7, %v4189_v31  ;;  %v4214_v12 = vsel %vm4210_vm1, 1.0, %v8444_v59 }
 0xfc8   : > { %v4216_v5 = vmul.f32 %v4214_v12, %v4204_v46  ;;  %v4217_v56 = vmul.f32 %v4215_v1, %v4205_v45  ;;  %vm4254_vm5 = vcmask 195584   ;;  %vm8457_vm4 = vcmask 392192  }
 0xfc9   : > { %vm8458_vm1 = vcmask 654336  }
 0xfcb   : > { %4236 = vrot.lane.b32.xlu0 %v4200_v26, %s6470_s22  ;;  %4238 = vrot.lane.b32.xlu1 %v4201_v34, %s6470_s22  ;;  %v3968_v26 = vld [vmem:[%s6678_s28 + $0x1d] sm:$0x1] }
 0xfcf   : > { %4244 = vrot.lane.b32.xlu0 %v4216_v5, %s6456_s5  ;;  %4246 = vrot.lane.b32.xlu1 %v4217_v56, %s6456_s5  ;;  %v4467_v5 = vld [vmem:[%s6925_s12 + $0x100] sm:$0xff]  ;;  %v4550_v56 = vld [vmem:[%s6925_s12 + $0x108] sm:$0xff] }
 0xfd3   : > { %6418 = vrot.lane.b32.xlu0 %v6417_v22, %s6465_s18 }
0x1034   : > { %v4231_v32 = vpop.permute.xlu1 %4230  ;;  %v4229_v11 = vpop.permute.xlu0 %4228 }
0x1039   : > { %v4221_v53 = vpop.permute.xlu0 %4220  ;;  %v4223_v58 = vpop.permute.xlu1 %4222 }
0x103a   : > { %v4250_v38 = vsel %vm1744_vm14, %v4168_v29, %v4221_v53  ;;  %v4251_v51 = vsel %vm1744_vm14, %v4169_v30, %v4223_v58  ;;  %v3969_v53 = vld [vmem:[%s6678_s28 + $0x1e] sm:$0x1] }
0x103b   : > { %v4252_v49 = vsel %vm252_vm0, %v4250_v38, %v4229_v11  ;;  %v4253_v37 = vsel %vm252_vm0, %v4251_v51, %v4231_v32  ;;  %v4551_v32 = vld [vmem:[%s6925_s12 + $0x110] sm:$0xff] }
0x103c   : > { %v6293_v11 = vpack.c.bf16 %v4551_v32, %v4550_v56 }
0x103d   : > { %v4237_v44 = vpop.permute.xlu0 %4236  ;;  %v4239_v41 = vpop.permute.xlu1 %4238 }
0x103e   : > { %v4255_v47 = vsel %vm4254_vm5, %v4252_v49, %v4237_v44  ;;  %v4256_v27 = vsel %vm4254_vm5, %v4253_v37, %v4239_v41 }
0x1041   : > { %v4245_v21 = vpop.permute.xlu0 %4244  ;;  %v4247_v22 = vpop.permute.xlu1 %4246 }
0x1042   : > { %v4257_v40 = vsel %vm1290_vm13, %v4255_v47, %v4245_v21  ;;  %v4258_v18 = vsel %vm1290_vm13, %v4256_v27, %v4247_v22  ;;  %v4552_v27 = vld [vmem:[%s6925_s12 + $0x118] sm:$0xff]  ;;  %v4553_v21 = vld [vmem:[%s6925_s12 + $0x120] sm:$0xff] }
0x1043   : > { %6051 = vmatprep.mubr.msk.f32.mxu1 %vm4263_vm9, %v4257_v40  ;;  %v6296_v22 = vpack.c.bf16 %v4553_v21, %v4552_v27  ;;  %v5621_v40 = vld [vmem:[%s6678_s28 + $0x1f] ss:$0 sm:$0xff] }
0x1044   : > { %6052 = vmatmul.mubr.msk.f32.vlgmr.msra.gmra.mrb[32].mxu1 %vm4263_vm9, %v4258_v18  ;;  %v4798_v27 = vld [vmem:[%s6925_s12 + $0x178] sm:$0xff] }
0x1045   : > { %6063 = vmatprep.mubr.msk.f32.mxu1 %vm6472_vm10, %v8444_v59  ;;  %v6419_v23 = vpop.permute.xlu0 %6418  ;;  %6062 = vmatpush3.msra.mxu1 %v4467_v5  ;;  %v4631_v5 = vld [vmem:[%s6678_s28 + $0x21] sm:$0x1] }
0x1046   : > { %v6421_v17 = vunpack.i.h.bf16 %v6419_v23  ;;  %v6420_v33 = vunpack.i.l.bf16 %v6419_v23  ;;  %6298 = vmatprep.subr.bf16.mxu1 %v6471_v15 }
0x1117   : > { %v6053_v0 = vpop.f32.mrb[32].mxu1 }
0x1118   : > { %v4342_v36 = vadd.f32 %v6053_v0, %v5617_v10  ;;  %v4336_v57 = vpop.f32.mrb[33].mxu1 }
0x1119   : > { %v4337_v50 = vadd.f32 %v5617_v10, %v4336_v57  ;;  %v4677_v57 = vld [vmem:[%s6925_s12 + $0x130] sm:$0xff] }
0x111a   : > { %v4346_v42 = vsel %vm1744_vm14, %v4342_v36, 0.0  ;;  %v4356_v19 = vmul.f32 %v4342_v36, %v4342_v36  ;;  %v4383_v13 = vsel %vm1744_vm14, %v4342_v36, %v6421_v17  ;;  %v4676_v36 = vld [vmem:[%s6925_s12 + $0x128] sm:$0xff] }
0x111b   : > { %v4345_v43 = vsel %vm1744_vm14, %v4337_v50, 0.0  ;;  %v4355_v25 = vmul.f32 %v4337_v50, %v4337_v50  ;;  %v4382_v28 = vsel %vm1744_vm14, %v4337_v50, %v6420_v33  ;;  %v4678_v33 = vld [vmem:[%s6925_s12 + $0x138] sm:$0xff]  ;;  %v6299_v50 = vpack.c.bf16 %v4677_v57, %v4676_v36 }
0x111c   : > { %v4358_v3 = vsel %vm1744_vm14, %v4356_v19, 0.0  ;;  %v4347_v60 = vadd.f32 %v4346_v42, %v4345_v43  ;;  %v6290_v63 = vpack.c.bf16 %v4383_v13, %v4382_v28  ;;  %v4679_v42 = vld [vmem:[%s6925_s12 + $0x140] sm:$0xff]  ;;  %v4680_v13 = vld [vmem:[%s6925_s12 + $0x148] sm:$0xff]  ;;  %v4681_v43 = vld [vmem:[%s6925_s12 + $0x150] sm:$0xff] }
0x111d   : > { %v4357_v52 = vsel %vm1744_vm14, %v4355_v25, 0.0  ;;  %v6302_v19 = vpack.c.bf16 %v4679_v42, %v4678_v33  ;;  %v6305_v25 = vpack.c.bf16 %v4681_v43, %v4680_v13  ;;  %v4682_v28 = vld [vmem:[%s6925_s12 + $0x158] sm:$0xff] }
0x111e   : > { %v4348_v35 = vrot.slane %v4347_v60, 4  ;;  %v4359_v39 = vadd.f32 %v4358_v3, %v4357_v52  ;;  %6291 = vmatpush3.bf16.msra.mxu0 %v6290_v63  ;;  %v4683_v3 = vld [vmem:[%s6925_s12 + $0x160] sm:$0xff] }
0x111f   : > { %6292 = vmatprep.subr.bf16.mxu0 %v6471_v15  ;;  %v5623_v63 = vld [vmem:[%s6678_s28 + $0x20] ss:$0 sm:$0xff] }
0x1120   : > { %v4349_v16 = vadd.f32 %v4348_v35, %v4347_v60  ;;  %v4360_v62 = vrot.slane %v4359_v39, 4  ;;  %v6308_v60 = vpack.c.bf16 %v4683_v3, %v4682_v28 }
0x1121   : > { %6059 = vmatmul.mubr.msk.f32.vlgmr.msra.gmra.mrb[36].mxu0 %vm252_vm0, %v7500_v9 }
0x1122   : > { %v4350_v6 = vrot.slane %v4349_v16, 2  ;;  %v4361_v54 = vadd.f32 %v4360_v62, %v4359_v39  ;;  %6074 = vmatprep.mubr.msk.f32.mxu0 %vm6472_vm10, %v8444_v59  ;;  %6294 = vmatpush3.bf16.msra.mxu0 %v6293_v11  ;;  %v4632_v11 = vld [vmem:[%s6678_s28 + $0x22] sm:$0x1] }
0x1123   : > { %6295 = vmatprep.subr.bf16.mxu0 %v6471_v15 }
0x1124   : > { %v4351_v48 = vadd.f32 %v4350_v6, %v4349_v16  ;;  %v4362_v31 = vrot.slane %v4361_v54, 2 }
0x1126   : > { %v4352_v14 = vrot.slane %v4351_v48, 1  ;;  %v4363_v2 = vadd.f32 %v4362_v31, %v4361_v54  ;;  %6297 = vmatpush3.bf16.msra.mxu0 %v6296_v22  ;;  %v4799_v22 = vld [vmem:[%s6925_s12 + $0x180] sm:$0xff] }
0x1127   : > { %6310 = vmatprep.subr.bf16.mxu0 %v6471_v15 }
0x1128   : > { %v4364_v7 = vrot.slane %v4363_v2, 1  ;;  %v4353_v24 = vadd.f32 %v4352_v14, %v4351_v48 }
0x112a   : > { %v4365_v46 = vadd.f32 %v4364_v7, %v4363_v2  ;;  %v4354_v45 = vmul.f32 0.0625, %v4353_v24 }
0x112c   : > { %v4366_v8 = vmul.f32 0.0625, %v4365_v46  ;;  %v4367_v55 = vmul.f32 %v4354_v45, %v4354_v45 }
0x112e   : > { %v4368_v29 = vsub.f32 %v4366_v8, %v4367_v55 }
0x1130   : > { %v4369_v30 = vadd.f32 1e-05, %v4368_v29 }
0x1132   : > { %6440 = vrsqrt.f32 %v4369_v30 }
0x113c   : > { %v6441_v34 = vpop.eup %6440 }
0x113d   : > { %v4371_v12 = vmul.f32 %v6441_v34, %v3968_v26 }
0x113f   : > { %v4372_v1 = vmul.f32 %v4371_v12, %v4354_v45  ;;  %v4459_v38 = vrot.slane %v4371_v12, %v7477_v20 }
0x1141   : > { %v4373_v58 = vsub.f32 %v3969_v53, %v4372_v1 }
0x1143   : > { %v4464_v41 = vrot.slane %v4373_v58, %v7477_v20 }
0x11f4   : > { %v4452_v51 = vpop.f32.mrb[36].mxu0 }
0x11f5   : > { %v4460_v44 = vmul.f32 %v4459_v38, %v4452_v51  ;;  %4546 = vrot.lane.b32.xlu1 %v4452_v51, %s6473_s23  ;;  %v6060_v49 = vpop.f32.mrb[37].mxu0 }
0x11f7   : > { %v4465_v37 = vadd.f32 %v4464_v41, %v4460_v44 }
0x11f9   : > { %v4466_v47 = vmax.f32 %v4465_v37, 0.0  ;;  %v4796_v37 = vld [vmem:[%s6925_s12 + $0x168] sm:$0xff] }
0x11fb   : > { %6064 = vmatmul.mubr.msk.f32.vlgmr.msra.gmra.mrb[34].mxu1 %vm1744_vm14, %v4466_v47  ;;  %v4797_v47 = vld [vmem:[%s6925_s12 + $0x170] sm:$0xff] }
0x11fc   : > { %6093 = vmatprep.mubr.msk.f32.mxu1 %vm6472_vm10, %v8444_v59  ;;  %6300 = vmatpush3.bf16.msra.mxu1 %v6299_v50  ;;  %v6311_v21 = vpack.c.bf16 %v4797_v47, %v4796_v37 }
0x11fd   : > { %6301 = vmatprep.subr.bf16.mxu1 %v6471_v15 }
0x1200   : > { %6303 = vmatpush3.bf16.msra.mxu1 %v6302_v19 }
0x1201   : > { %6304 = vmatprep.subr.bf16.mxu1 %v6471_v15 }
0x1204   : > { %6306 = vmatpush3.bf16.msra.mxu1 %v6305_v25 }
0x1205   : > { %6307 = vmatprep.subr.bf16.mxu1 %v6471_v15 }
0x1208   : > { %6309 = vmatpush3.bf16.msra.mxu1 %v6308_v60 }
0x1209   : > { %6119 = vmatprep.subr.mxu1 %v8444_v59 }
0x1267   : > { %v4547_v0 = vpop.permute.xlu1 %4546 }
0x12ce   : > { %v4541_v18 = vpop.f32.mrb[34].mxu1 }
0x12cf   : > { %v4542_v23 = vadd.f32 %v5621_v40, %v4541_v18  ;;  %v6065_v10 = vpop.f32.mrb[35].mxu1  ;;  %v6314_v40 = vpack.c.bf16 %v4799_v22, %v4798_v27  ;;  %v4800_v18 = vld [vmem:[%s6925_s12 + $0x188] sm:$0xff] }
0x12d1   : > { %v4549_v17 = vadd.f32 %v4547_v0, %v4542_v23  ;;  %v4801_v23 = vld [vmem:[%s6925_s12 + $0x190] sm:$0xff]  ;;  %v5625_v0 = vld [vmem:[%s6678_s28 + $0x23] ss:$0 sm:$0xff] }
0x12d2   : > { %v6317_v10 = vpack.c.bf16 %v4801_v23, %v4800_v18 }
0x12d3   : > { %6075 = vmatmul.mubr.msk.f32.vlgmr.msra.gmra.mrb[38].mxu0 %vm1290_vm13, %v4549_v17 }
0x12d4   : > { %6116 = vmatprep.mubr.msk.f32.mxu0 %vm6472_vm10, %v8444_v59  ;;  %6312 = vmatpush3.bf16.msra.mxu0 %v6311_v21 }
0x12d5   : > { %6313 = vmatprep.subr.bf16.mxu0 %v6471_v15 }
0x12d8   : > { %6315 = vmatpush3.bf16.msra.mxu0 %v6314_v40 }
0x12d9   : > { %6316 = vmatprep.subr.bf16.mxu0 %v6471_v15 }
0x12dc   : > { %6318 = vmatpush3.bf16.msra.mxu0 %v6317_v10 }
0x12dd   : > { %6319 = vmatprep.subr.bf16.mxu0 %v6471_v15 }
0x13a6   : > { %v4627_v52 = vpop.f32.mrb[38].mxu0 }
0x13a7   : > { %v8281_v35 = vadd.f32 %v5623_v63, %v4627_v52  ;;  %v6076_v39 = vpop.f32.mrb[39].mxu0 }
0x13a9   : > { %v4641_v16 = vsel %vm1324_vm15, %v8281_v35, 0.0  ;;  %v4649_v62 = vmul.f32 %v8281_v35, %v8281_v35 }
0x13aa   : > { %v4642_v6 = vrot.slane %v4641_v16, 4 }
0x13ab   : > { %v4650_v54 = vsel %vm1324_vm15, %v4649_v62, 0.0 }
0x13ac   : > { %v4643_v48 = vadd.f32 %v4642_v6, %v4641_v16  ;;  %v4651_v31 = vrot.slane %v4650_v54, 4 }
0x13ae   : > { %v4644_v14 = vrot.slane %v4643_v48, 2  ;;  %v4652_v2 = vadd.f32 %v4651_v31, %v4650_v54 }
0x13b0   : > { %v4645_v7 = vadd.f32 %v4644_v14, %v4643_v48  ;;  %v4653_v24 = vrot.slane %v4652_v2, 2 }
0x13b2   : > { %v4646_v46 = vrot.slane %v4645_v7, 1  ;;  %v4654_v45 = vadd.f32 %v4653_v24, %v4652_v2  ;;  %v4634_v2 = vld [vmem:[%s6678_s28 + $0x24] sm:$0x1] }
0x13b3   : > { %v4803_v24 = vld [vmem:[%s6925_s12 + $0x1a0] sm:$0xff] }
0x13b4   : > { %v4647_v8 = vadd.f32 %v4646_v46, %v4645_v7  ;;  %v4655_v55 = vrot.slane %v4654_v45, 1  ;;  %v4802_v7 = vld [vmem:[%s6925_s12 + $0x198] sm:$0xff] }
0x13b6   : > { %v4648_v29 = vmul.f32 0.125, %v4647_v8  ;;  %v4656_v30 = vadd.f32 %v4655_v55, %v4654_v45  ;;  %v4807_v45 = vand.u32 3, %v8428_v61  ;;  %v6320_v8 = vpack.c.bf16 %v4803_v24, %v4802_v7 }
0x13b8   : > { %v4657_v26 = vmul.f32 0.125, %v4656_v30  ;;  %v4658_v34 = vmul.f32 %v4648_v29, %v4648_v29  ;;  %6321 = vmatpush3.bf16.msra.mxu0 %v6320_v8 }
0x13b9   : > { %6322 = vmatprep.subr.bf16.mxu0 %v6471_v15 }
0x13ba   : > { %v4659_v12 = vsub.f32 %v4657_v26, %v4658_v34  ;;  %v4829_v34 = vadd.s32 2, %v4807_v45 }
0x13bc   : > { %v4660_v1 = vadd.f32 1e-05, %v4659_v12  ;;  %v4804_v12 = vld [vmem:[%s6925_s12 + $0x1a8] sm:$0xff]  ;;  %vm4831_vm3 = vcmp.lt.s32.totalorder %v4829_v34, 4 }
0x13be   : > { %6442 = vrsqrt.f32 %v4660_v1  ;;  %v4805_v1 = vld [vmem:[%s6925_s12 + $0x1b0] sm:$0xff] }
0x13c8   : > { %v6443_v56 = vpop.eup %6442 }
0x13c9   : > { %v4662_v32 = vmul.f32 %v6443_v56, %v4631_v5  ;;  %v4815_v56 = vadd.s32 4294967295, %v4807_v45 }
0x13cb   : > { %v4663_v53 = vmul.f32 %v4662_v32, %v4648_v29  ;;  %v4668_v58 = vrot.slane %v4662_v32, %v7477_v20  ;;  %v4635_v29 = vld [vmem:[%s6678_s28 + $0x25] sm:$0x1]  ;;  %v4808_v32 = vadd.s32 4294967294, %v4807_v45  ;;  %vm4816_vm12 = vcmp.ge.s32.totalorder %v4815_v56, 0 }
0x13cd   : > { %v4664_v38 = vsub.f32 %v4632_v11, %v4663_v53  ;;  %v4669_v51 = vmul.f32 %v4668_v58, %v8281_v35  ;;  %v6323_v11 = vpack.c.bf16 %v4805_v1, %v4804_v12  ;;  %vm4809_vm2 = vcmp.ge.s32.totalorder %v4808_v32, 0 }
0x13cf   : > { %v4673_v44 = vrot.slane %v4664_v38, %v7477_v20  ;;  %6324 = vmatpush3.bf16.msra.mxu0 %v6323_v11  ;;  %v4822_v38 = vadd.s32 1, %v4807_v45  ;;  %v4638_v11 = vld [vmem:[%s6678_s28 + $0x28] sm:$0x1] }
0x13d0   : > { %6150 = vmatprep.subr.mxu0 %v8444_v59 }
0x13d1   : > { %v4674_v41 = vadd.f32 %v4673_v44, %v4669_v51  ;;  %v4833_v44 = vsel %vm4831_vm3, 1.0, %v8444_v59  ;;  %vm4824_vm11 = vcmp.lt.s32.totalorder %v4822_v38, 4 }
0x13d2   : > { %v4826_v23 = vsel %vm4824_vm11, 1.0, %v8444_v59 }
0x13d3   : > { %v4675_v49 = vmax.f32 %v4674_v41, 0.0  ;;  %v4819_v41 = vsel %vm4816_vm12, 1.0, %v8444_v59 }
0x13d5   : > { %6094 = vmatmul.mubr.msk.f32.vlgmr.msra.gmra.mrb[36].mxu1 %vm1324_vm15, %v4675_v49  ;;  %v4812_v49 = vsel %vm4809_vm2, 1.0, %v8444_v59 }
0x13d6   : > { %6121 = vmatprep.mubr.msk.f32.mxu1 %vm6472_vm10, %v8444_v59 }
0x14a8   : > { %v4757_v17 = vpop.f32.mrb[36].mxu1 }
0x14a9   : > { %v4758_v36 = vadd.f32 %v5625_v0, %v4757_v17  ;;  %v6095_v57 = vpop.f32.mrb[37].mxu1 }
0x14ab   : > { %v4761_v33 = vsel %vm252_vm0, %v4758_v36, 0.0  ;;  %v4769_v50 = vmul.f32 %v4758_v36, %v4758_v36 }
0x14ac   : > { %v4762_v42 = vrot.slane %v4761_v33, 4 }
0x14ad   : > { %v4770_v19 = vsel %vm252_vm0, %v4769_v50, 0.0 }
0x14ae   : > { %v4763_v13 = vadd.f32 %v4762_v42, %v4761_v33  ;;  %v4771_v43 = vrot.slane %v4770_v19, 4 }
0x14b0   : > { %v4764_v25 = vrot.slane %v4763_v13, 2  ;;  %v4772_v28 = vadd.f32 %v4771_v43, %v4770_v19 }
0x14b2   : > { %v4765_v3 = vadd.f32 %v4764_v25, %v4763_v13  ;;  %v4773_v60 = vrot.slane %v4772_v28, 2 }
0x14b4   : > { %v4766_v63 = vrot.slane %v4765_v3, 1  ;;  %v4774_v52 = vadd.f32 %v4773_v60, %v4772_v28  ;;  %v5044_v60 = vld [vmem:[%s6925_s12 + $0x1b8] sm:$0xff] }
0x14b6   : > { %v4767_v39 = vadd.f32 %v4766_v63, %v4765_v3  ;;  %v4775_v16 = vrot.slane %v4774_v52, 1  ;;  %v5045_v63 = vld [vmem:[%s6925_s12 + $0x1c0] sm:$0xff] }
0x14b8   : > { %v4768_v62 = vmul.f32 0.125, %v4767_v39  ;;  %v4776_v6 = vadd.f32 %v4775_v16, %v4774_v52  ;;  %v6326_v52 = vpack.c.bf16 %v5045_v63, %v5044_v60  ;;  %v8459_v60 = vld [vmem:[#allocation5_spill] sm:$0xff] }
0x14ba   : > { %v4777_v54 = vmul.f32 0.125, %v4776_v6  ;;  %v4778_v48 = vmul.f32 %v4768_v62, %v4768_v62 }
0x14bc   : > { %v4779_v31 = vsub.f32 %v4777_v54, %v4778_v48 }
0x14be   : > { %v4780_v14 = vadd.f32 1e-05, %v4779_v31 }
0x14c0   : > { %6444 = vrsqrt.f32 %v4780_v14 }
0x14ca   : > { %v6445_v46 = vpop.eup %6444 }
0x14cb   : > { %v4782_v55 = vmul.f32 %v6445_v46, %v4634_v2 }
0x14cd   : > { %v4783_v30 = vmul.f32 %v4782_v55, %v4768_v62  ;;  %v4788_v26 = vrot.slane %v4782_v55, %v7477_v20 }
0x14cf   : > { %v4784_v5 = vsub.f32 %v4635_v29, %v4783_v30  ;;  %v4789_v53 = vmul.f32 %v4788_v26, %v4758_v36 }
0x14d1   : > { %v4793_v58 = vrot.slane %v4784_v5, %v7477_v20  ;;  %v4637_v5 = vld [vmem:[%s6678_s28 + $0x27] sm:$0x1] }
0x14d3   : > { %v4794_v61 = vadd.f32 %v4793_v58, %v4789_v53 }
0x14d5   : > { %v4795_v51 = vmax.f32 %v4794_v61, 0.0 }
0x14d7   : > { %4840 = vrot.lane.b32.xlu1 %v4795_v51, %s6456_s5  ;;  %v4828_v37 = vrot.slane %v4795_v51, 2  ;;  %v4814_v47 = vrot.slane %v4795_v51, 7  ;;  %v4806_v27 = vrot.slane %v4795_v51, 6  ;;  %v4821_v40 = vrot.slane %v4795_v51, 1 }
0x14d9   : > { %v4834_v21 = vmul.f32 %v4833_v44, %v4828_v37  ;;  %v4820_v22 = vmul.f32 %v4819_v41, %v4814_v47  ;;  %v4813_v18 = vmul.f32 %v4812_v49, %v4806_v27  ;;  %v4827_v10 = vmul.f32 %v4826_v23, %v4821_v40  ;;  %v5128_v41 = vld [vmem:[%s6925_s12 + $0x1c8] sm:$0xff]  ;;  %v5129_v49 = vld [vmem:[%s6925_s12 + $0x1d0] sm:$0xff] }
0x14da   : > { %v6329_v47 = vpack.c.bf16 %v5129_v49, %v5128_v41 }
0x14db   : > { %4848 = vrot.lane.b32.xlu1 %v4834_v21, %s6458_s7  ;;  %4836 = vrot.lane.b32.xlu0 %v4820_v22, %s6460_s8  ;;  %v5130_v21 = vld [vmem:[%s6925_s12 + $0x1d8] sm:$0xff]  ;;  %v5131_v22 = vld [vmem:[%s6925_s12 + $0x1e0] sm:$0xff] }
0x14dc   : > { %v6332_v40 = vpack.c.bf16 %v5131_v22, %v5130_v21 }
0x14df   : > { %4844 = vrot.lane.b32.xlu0 %v4827_v10, %s6457_s6  ;;  %v5134_v10 = vld [vmem:[%s6925_s12 + $0x1f8] sm:$0xff] }
0x14e3   : > { %4957 = vrot.lane.b32.xlu0 %v8281_v35, %s6460_s8  ;;  %v5627_v35 = vld [vmem:[%s6678_s28 + $0x26] ss:$0 sm:$0xff] }
0x1549   : > { %v4841_v0 = vpop.permute.xlu1 %4840 }
0x154d   : > { %v4837_v17 = vpop.permute.xlu0 %4836  ;;  %v4849_v50 = vpop.permute.xlu1 %4848 }
0x154e   : > { %v4851_v36 = vsel %vm252_vm0, %v4813_v18, %v4837_v17  ;;  %v5133_v18 = vld [vmem:[%s6925_s12 + $0x1f0] sm:$0xff] }
0x154f   : > { %v4852_v33 = vsel %vm1290_vm13, %v4851_v36, %v4841_v0  ;;  %v5135_v0 = vld [vmem:[%s6925_s12 + $0x200] sm:$0xff]  ;;  %v5630_v36 = vld [vmem:[%s6678_s28 + $0x29] ss:$0 sm:$0xff]  ;;  %vm5446_vm13 = vcmask 254976  }
0x1550   : > { %v6338_v17 = vpack.c.bf16 %v5135_v0, %v5134_v10 }
0x1551   : > { %v4845_v57 = vpop.permute.xlu0 %4844 }
0x1552   : > { %v4853_v42 = vsel %vm8457_vm4, %v4852_v33, %v4845_v57 }
0x1553   : > { %v4854_v19 = vsel %vm1324_vm15, %v4853_v42, %v4849_v50 }
0x1554   : > { %6117 = vmatmul.mubr.msk.f32.vlgmr.msra.gmra.mrb[40].mxu0 %vm8458_vm1, %v4854_v19 }
0x1555   : > { %6152 = vmatprep.mubr.msk.f32.mxu0 %vm6472_vm10, %v8444_v59  ;;  %v4958_v28 = vpop.permute.xlu0 %4957 }
0x1627   : > { %v4928_v13 = vpop.f32.mrb[40].mxu0 }
0x1628   : > { %v4929_v43 = vadd.f32 %v5627_v35, %v4928_v13  ;;  %v6118_v25 = vpop.f32.mrb[41].mxu0  ;;  %v5632_v35 = vld [vmem:[%s6678_s28 + $0x2a] ss:$0 sm:$0xff]  ;;  %s5534_s28 = sshll.u32 %s8462_s16, 1 }
0x1629   : > { %s235_s6 = scalar_lea.vmem %s8403_s4, %s5534_s28 }
0x162a   : > { %v4960_v3 = vsel %vm252_vm0, %v4929_v43, %v4958_v28  ;;  %v4932_v39 = vsel %vm252_vm0, %v4929_v43, 0.0  ;;  %v4940_v16 = vmul.f32 %v4929_v43, %v4929_v43  ;;  %v5365_v28 = vld [vmem:[%s221_s29] sm:$0xff] }
0x162b   : > { %6120 = vmatpush3.msra.mxu1 %v4960_v3  ;;  %v4933_v62 = vrot.slane %v4932_v39, 4  ;;  %v5366_v3 = vld [vmem:[%s221_s29 + $0x8] sm:$0xff] }
0x162c   : > { %6122 = vmatmul.mubr.msk.f32.vlgmr.msra.gmra.mrb[38].mxu1 %vm1744_vm14, %v7500_v9  ;;  %6325 = vmatprep.subr.bf16.mxu1 %v6471_v15  ;;  %v4941_v6 = vsel %vm252_vm0, %v4940_v16, 0.0  ;;  %v5368_v16 = vld [vmem:[%s221_s29 + $0x18] sm:$0xff] }
0x162d   : > { %6128 = vmatprep.mubr.msk.f32.mxu1 %vm6472_vm10, %v8444_v59  ;;  %6327 = vmatpush3.bf16.msra.mxu1 %v6326_v52  ;;  %v4934_v54 = vadd.f32 %v4933_v62, %v4932_v39  ;;  %v4942_v48 = vrot.slane %v4941_v6, 4  ;;  %v6341_v52 = vpack.c.bf16 %v5366_v3, %v5365_v28  ;;  %v5367_v39 = vld [vmem:[%s221_s29 + $0x10] sm:$0xff]  ;;  %v5369_v62 = vld [vmem:[%s221_s29 + $0x20] sm:$0xff] }
0x162e   : > { %6328 = vmatprep.subr.bf16.mxu1 %v6471_v15 }
0x162f   : > { %v4935_v31 = vrot.slane %v4934_v54, 2  ;;  %v4943_v14 = vadd.f32 %v4942_v48, %v4941_v6  ;;  %v5370_v6 = vld [vmem:[%s221_s29 + $0x28] sm:$0xff]  ;;  %v5372_v48 = vld [vmem:[%s221_s29 + $0x38] sm:$0xff] }
0x1631   : > { %v4936_v2 = vadd.f32 %v4935_v31, %v4934_v54  ;;  %v4944_v7 = vrot.slane %v4943_v14, 2  ;;  %v5371_v54 = vld [vmem:[%s221_s29 + $0x30] sm:$0xff] }
0x1632   : > { %v6350_v31 = vpack.c.bf16 %v5372_v48, %v5371_v54 }
0x1633   : > { %v4937_v24 = vrot.slane %v4936_v2, 1  ;;  %v4945_v46 = vadd.f32 %v4944_v7, %v4943_v14 }
0x1635   : > { %v4938_v45 = vadd.f32 %v4937_v24, %v4936_v2  ;;  %v4946_v8 = vrot.slane %v4945_v46, 1 }
0x1637   : > { %v4947_v55 = vadd.f32 %v4946_v8, %v4945_v46  ;;  %v4939_v29 = vmul.f32 0.125, %v4938_v45 }
0x1639   : > { %v4948_v30 = vmul.f32 0.125, %v4947_v55  ;;  %v4949_v26 = vmul.f32 %v4939_v29, %v4939_v29 }
0x163b   : > { %v4950_v34 = vsub.f32 %v4948_v30, %v4949_v26 }
0x163d   : > { %v4951_v12 = vadd.f32 1e-05, %v4950_v34 }
0x163f   : > { %6446 = vrsqrt.f32 %v4951_v12 }
0x1649   : > { %v6447_v1 = vpop.eup %6446 }
0x164a   : > { %v4953_v56 = vmul.f32 %v6447_v1, %v4637_v5 }
0x164c   : > { %v4954_v32 = vmul.f32 %v4953_v56, %v4939_v29  ;;  %v5036_v58 = vrot.slane %v4953_v56, %v7477_v20 }
0x164e   : > { %v4955_v53 = vsub.f32 %v4638_v11, %v4954_v32 }
0x1650   : > { %v5041_v51 = vrot.slane %v4955_v53, %v7477_v20  ;;  %v5132_v20 = vld [vmem:[%s6925_s12 + $0x1e8] sm:$0xff] }
0x1651   : > { %v6335_v23 = vpack.c.bf16 %v5133_v18, %v5132_v20 }
0x16ff   : > { %v5029_v61 = vpop.f32.mrb[38].mxu1 }
0x1700   : > { %v5037_v38 = vmul.f32 %v5036_v58, %v5029_v61  ;;  %5124 = vrot.lane.b32.xlu1 %v5029_v61, %s6474_s24  ;;  %v6123_v44 = vpop.f32.mrb[39].mxu1 }
0x1702   : > { %v5042_v37 = vadd.f32 %v5041_v51, %v5037_v38 }
0x1704   : > { %v5043_v27 = vmax.f32 %v5042_v37, 0.0 }
0x1706   : > { %6129 = vmatmul.mubr.msk.f32.vlgmr.msra.gmra.mrb[40].mxu1 %vm252_vm0, %v5043_v27  ;;  %vm8460_vm0 = vcmp.eq.s32.totalorder %v7289_v4, %v8459_v60  ;;  %v6347_v4 = vpack.c.bf16 %v5370_v6, %v5369_v62 }
0x1707   : > { %6330 = vmatpush3.bf16.msra.mxu1 %v6329_v47  ;;  %6147 = vmatprep.mubr.msk.f32.mxu1 %vm6472_vm10, %v8444_v59  ;;  %v5290_v63 = vsel %vm8460_vm0, 1.0, %v8444_v59 }
0x1708   : > { %6331 = vmatprep.subr.bf16.mxu1 %v6471_v15 }
0x170b   : > { %6333 = vmatpush3.bf16.msra.mxu1 %v6332_v40 }
0x170c   : > { %6334 = vmatprep.subr.bf16.mxu1 %v6471_v15 }
0x170f   : > { %6336 = vmatpush3.bf16.msra.mxu1 %v6335_v23 }
0x1710   : > { %6337 = vmatprep.subr.bf16.mxu1 %v6471_v15 }
0x1713   : > { %6339 = vmatpush3.bf16.msra.mxu1 %v6338_v17 }
0x1772   : > { %v5125_v42 = vpop.permute.xlu1 %5124 }
0x17d9   : > { %v5119_v57 = vpop.f32.mrb[40].mxu1 }
0x17da   : > { %v5120_v33 = vadd.f32 %v5630_v36, %v5119_v57  ;;  %v6130_v50 = vpop.f32.mrb[41].mxu1 }
0x17dc   : > { %v5127_v19 = vadd.f32 %v5125_v42, %v5120_v33 }
0x17de   : > { %6148 = vmatmul.mubr.msk.f32.vlgmr.msra.gmra.mrb[42].mxu1 %vm1324_vm15, %v5127_v19 }
0x18b1   : > { %v5209_v13 = vpop.f32.mrb[42].mxu1 }
0x18b2   : > { %v5210_v43 = vadd.f32 %v5632_v35, %v5209_v13  ;;  %v6149_v25 = vpop.f32.mrb[43].mxu1 }
0x18b4   : > { %6151 = vmatpush3.msk.msra.mxu0 %vm3535_vm8, %v5210_v43 }
0x18b5   : > { %6153 = vmatmul.mubr.msk.f32.vlgmr.msra.gmra.mrb[42].mxu0 %vm2464_vm7, %v7500_v9  ;;  %6155 = vmatprep.subr.mxu0 %v8444_v59  ;;  %v6344_v9 = vpack.c.bf16 %v5368_v16, %v5367_v39 }
0x18b6   : > { %6156 = vmatpush3.msk.msra.mxu0 %vm3535_vm8, %v5210_v43  ;;  %6157 = vmatprep.mubr.msk.f32.mxu0 %vm6472_vm10, %v8444_v59 }
0x18b7   : > { %6340 = vmatprep.subr.bf16.mxu0 %v6471_v15 }
0x18b9   : > { %6158 = vmatmul.mubr.msk.f32.vlgmr.msra.gmra.mrb[44].mxu0 %vm2464_vm7, %v5290_v63 }
0x18ba   : > { %6342 = vmatpush3.bf16.msra.mxu0 %v6341_v52  ;;  %6176 = vmatprep.mubr.msk.f32.mxu0 %vm6472_vm10, %v8444_v59 }
0x18bb   : > { %6343 = vmatprep.subr.bf16.mxu0 %v6471_v15 }
0x18be   : > { %6345 = vmatpush3.bf16.msra.mxu0 %v6344_v9 }
0x18bf   : > { %6346 = vmatprep.subr.bf16.mxu0 %v6471_v15 }
0x18c2   : > { %6348 = vmatpush3.bf16.msra.mxu0 %v6347_v4 }
0x18c3   : > { %6349 = vmatprep.subr.bf16.mxu0 %v6471_v15 }
0x18c6   : > { %6351 = vmatpush3.bf16.msra.mxu0 %v6350_v31 }
0x1988   : > { %v5284_v14 = vpop.f32.mrb[42].mxu0 }
0x1989   : > { %v6154_v2 = vpop.f32.mrb[43].mxu0 }
0x198c   : > { %v5360_v7 = vpop.f32.mrb[44].mxu0 }
0x198d   : > { %v5364_v59 = vmax.f32 %v5284_v14, %v5360_v7  ;;  %v6159_v24 = vpop.f32.mrb[45].mxu0 }
0x198f   : > { %6177 = vmatmul.mubr.msk.f32.vlgmr.msra.gmra.mrb[46].mxu0 %vm1324_vm15, %v5364_v59 }
0x1a62   : > { %v5442_v46 = vpop.f32.mrb[46].mxu0 }
0x1a63   : > { %5447 = vst.msk [vmem:[%s235_s6] sm:$0x3] %vm5446_vm13, %v5442_v46  ;;  %v6178_v15 = vpop.f32.mrb[47].mxu0 }
0x1a64 PF: > { %s14_s15 = sadd.s32 1, %s6454_s15  }
0x1a65   : > { %p11_p4 = scmp.ge.s32.totalorder %s14_s15, 4  }
0x1a67   :  { %13 = sbr.rel (!%p11_p4) target bundleno = 1 (0x1), region = 72 }

</bundles_post_ra>
